<compile_context>
chip_gen: v6e
topology: v6e:2x2x1
jax: 0.10.0
libtpu: 0.0.40
codegen_flags: <defaults>
</compile_context>

<pallas_src>
import math
from functools import partial

import jax
import jax.numpy as jnp
from jax import lax
from jax.experimental import pallas as pl
from jax.experimental.pallas import tpu as pltpu

F32 = jnp.float32
BF16 = jnp.bfloat16


# ----------------------------------------------------------------------------
# helpers
# ----------------------------------------------------------------------------
def _layernorm(x, g, b, eps):
    # torch.nn.LayerNorm over the last dim (biased variance), f32 math.
    mu = jnp.mean(x, axis=-1, keepdims=True)
    var = jnp.mean(jnp.square(x - mu), axis=-1, keepdims=True)
    return (x - mu) * lax.rsqrt(var + eps) * g + b


# ----------------------------------------------------------------------------
# fused forward kernel (single grid step, all weights resident)
# ----------------------------------------------------------------------------
def _transformer_kernel(nheads, eps,
                        src_ref, pe_ref,
                        w0i_ref, b0i_ref, w0h_ref, b0h_ref,
                        w1i_ref, b1i_ref, w1h_ref, b1h_ref,
                        wqkv_ref, bqkv_ref, wo_ref, bo_ref,
                        wf1_ref, bf1_ref, wf2_ref, bf2_ref,
                        g1_ref, be1_ref, g2_ref, be2_ref,
                        ng_ref, nb_ref,
                        out_ref):
    BT, _ = src_ref.shape
    H = pe_ref.shape[-1]                 # pe pre-tiled to (BT, H)
    T = out_ref.shape[-1] // H           # output is (B, T*H)
    B = BT // T
    L = wqkv_ref.shape[0]
    dh = H // nheads

    # ---------------- GRU embedding (2 layers), gates packed (r|z|n) --------
    xb = src_ref[...].astype(BF16)
    gi = jnp.dot(xb, w0i_ref[...], preferred_element_type=F32) + b0i_ref[...]
    gi3 = gi.reshape(B, T, 3 * H)        # leading-dim split (lane dim kept)

    w0h = w0h_ref[...]; b0h = b0h_ref[...]
    w1i = w1i_ref[...]; b1i = b1i_ref[...]
    w1h = w1h_ref[...]; b1h = b1h_ref[...]

    h0 = jnp.zeros((B, H), F32)
    h1 = jnp.zeros((B, H), F32)

    # Assemble GRU outputs into a register-resident (BT,H) value with
    # lane-aligned selects (no masked sub-tile stores, no VMEM scratch):
    # row b*T + t <- h1(t)[b].
    x2d = jnp.zeros((BT, H), F32)
    row_t = lax.broadcasted_iota(jnp.int32, (BT, 1), 0) % T

    for t in range(T):                   # T static & small: fully unrolled
        gi_t = gi3[:, t, :]
        gh = jnp.dot(h0.astype(BF16), w0h, preferred_element_type=F32) + b0h
        r = jax.nn.sigmoid(gi_t[:, 0:H] + gh[:, 0:H])
        z = jax.nn.sigmoid(gi_t[:, H:2 * H] + gh[:, H:2 * H])
        n = jnp.tanh(gi_t[:, 2 * H:3 * H] + r * gh[:, 2 * H:3 * H])
        h0 = (1.0 - z) * n + z * h0

        xi = jnp.dot(h0.astype(BF16), w1i, preferred_element_type=F32) + b1i
        hh = jnp.dot(h1.astype(BF16), w1h, preferred_element_type=F32) + b1h
        r1 = jax.nn.sigmoid(xi[:, 0:H] + hh[:, 0:H])
        z1 = jax.nn.sigmoid(xi[:, H:2 * H] + hh[:, H:2 * H])
        n1 = jnp.tanh(xi[:, 2 * H:3 * H] + r1 * hh[:, 2 * H:3 * H])
        h1 = (1.0 - z1) * n1 + z1 * h1

        h1_rows = jnp.broadcast_to(h1[:, None, :], (B, T, H)).reshape(BT, H)
        x2d = jnp.where(row_t == t, h1_rows, x2d)

    # additive sinusoidal positional encoding (dropout = identity)
    x2d = x2d + pe_ref[...]

    # ---------------- encoder layers (post-norm), weights resident ----------
    scale = 1.0 / math.sqrt(dh)
    for l in range(L):                   # L static: fully unrolled
        xb = x2d.astype(BF16)

        # fused packed QKV projection: one (BT,H)@(H,3H) matmul
        qkv = (jnp.dot(xb, wqkv_ref[l], preferred_element_type=F32)
               + bqkv_ref[l])
        q2d, k2d, v2d = qkv[:, 0:H], qkv[:, H:2 * H], qkv[:, 2 * H:3 * H]

        # fold heads into the einsum batch axis: (nheads*B, T, dh)
        def to_heads(a2d):
            return jnp.concatenate(
                [a2d[:, h * dh:(h + 1) * dh].reshape(B, T, dh)
                 for h in range(nheads)], axis=0).astype(BF16)

        q = to_heads(q2d)
        k = to_heads(k2d)
        v = to_heads(v2d)

        s = jnp.einsum('bqd,bkd->bqk', q, k,
                       preferred_element_type=F32) * scale
        s = s - jnp.max(s, axis=-1, keepdims=True)
        p = jnp.exp(s)
        p = p * pl.reciprocal(jnp.sum(p, axis=-1, keepdims=True), approx=True)
        o = jnp.einsum('bqk,bkd->bqd', p.astype(BF16), v,
                       preferred_element_type=F32)

        # concat heads back along lanes -> (BT, H); one fused out-projection
        o2d = jnp.concatenate(
            [o[h * B:(h + 1) * B].reshape(BT, dh) for h in range(nheads)],
            axis=-1)
        attn = (jnp.dot(o2d.astype(BF16), wo_ref[l],
                        preferred_element_type=F32) + bo_ref[l])

        x1 = _layernorm(x2d + attn, g1_ref[l], be1_ref[l], eps)

        # feed-forward: linear1 -> relu -> linear2
        ff = (jnp.dot(x1.astype(BF16), wf1_ref[l],
                      preferred_element_type=F32) + bf1_ref[l])
        ff = jnp.maximum(ff, 0.0)
        ff = (jnp.dot(ff.astype(BF16), wf2_ref[l],
                      preferred_element_type=F32) + bf2_ref[l])

        x2d = _layernorm(x1 + ff, g2_ref[l], be2_ref[l], eps)

    # ---------------- final encoder LayerNorm, lane-dense output ------------
    xf = _layernorm(x2d, ng_ref[...], nb_ref[...], eps)      # (BT, H)
    xf3 = xf.reshape(B, T, H)                                 # leading split
    out_ref[...] = jnp.concatenate([xf3[:, t, :] for t in range(T)], axis=-1)


# ----------------------------------------------------------------------------
# wrapper
# ----------------------------------------------------------------------------
def transformer_forward(src, params, nheads, eps=1e-5):
    B, T, D = src.shape
    H = params["pe"].shape[-1]

    src2d = src.reshape(B * T, D)
    # PE pre-tiled to the kernel's batch-major (BT, H) row order (free XLA op)
    pe2d = jnp.tile(params["pe"][:T], (B, 1))

    inputs = (src2d, pe2d,
              params["w0i"], params["b0i"], params["w0h"], params["b0h"],
              params["w1i"], params["b1i"], params["w1h"], params["b1h"],
              params["wqkv"], params["bqkv"], params["wo"], params["bo"],
              params["wf1"], params["bf1"], params["wf2"], params["bf2"],
              params["g1"], params["be1"], params["g2"], params["be2"],
              params["norm_g"], params["norm_b"])

    def full_spec(a):
        nd = a.ndim
        return pl.BlockSpec(a.shape, lambda i, _nd=nd: (0,) * _nd)

    out2d = pl.pallas_call(
        partial(_transformer_kernel, nheads, eps),
        out_shape=jax.ShapeDtypeStruct((B, T * H), jnp.float32),
        grid=(1,),
        in_specs=[full_spec(a) for a in inputs],
        out_specs=pl.BlockSpec((B, T * H), lambda i: (0, 0)),
        compiler_params=pltpu.CompilerParams(
            dimension_semantics=("arbitrary",)),
    )(*inputs)

    seq = out2d.reshape(B, T, H)
    return {
        "sequence_output": seq,
        "final_hidden_state": seq[:, -1, :],
        "sindy_loss": None,
    }


# ----------------------------------------------------------------------------
# positional encoding table
# TODO(synk): PositionalEncoding class body not provided in the reference;
# standard additive sinusoidal PE (x + pe[:seq_len], dropout=identity) assumed.
# ----------------------------------------------------------------------------
def sinusoidal_pe(seq_len, d_model):
    pos = jnp.arange(seq_len, dtype=jnp.float32)[:, None]
    div = jnp.exp(jnp.arange(0, d_model, 2, dtype=jnp.float32)
                  * (-math.log(10000.0) / d_model))
    pe = jnp.zeros((seq_len, d_model), jnp.float32)
    pe = pe.at[:, 0::2].set(jnp.sin(pos * div))
    pe = pe.at[:, 1::2].set(jnp.cos(pos * div))
    return pe


# ----------------------------------------------------------------------------
# deterministic parameter init (kernel-friendly packed layouts)
# ----------------------------------------------------------------------------
def init_params(key, D, H, FF, nlayers, nheads, pe_len):
    keys = iter(jax.random.split(key, 64))

    def nrm(shape, dtype=BF16, scale=0.1):
        return (scale * jax.random.normal(next(keys), shape, jnp.float32)
                ).astype(dtype)

    return {
        # GRU layers 0/1: gate weights packed (r|z|n) along the output dim,
        # stored bf16; biases f32.
        "w0i": nrm((D, 3 * H)), "b0i": nrm((1, 3 * H), F32),
        "w0h": nrm((H, 3 * H)), "b0h": nrm((1, 3 * H), F32),
        "w1i": nrm((H, 3 * H)), "b1i": nrm((1, 3 * H), F32),
        "w1h": nrm((H, 3 * H)), "b1h": nrm((1, 3 * H), F32),
        # Encoder layers stacked on a leading layer axis (all VMEM-resident);
        # attention projection packed (q|k|v) along the output dim.
        "wqkv": nrm((nlayers, H, 3 * H)),
        "bqkv": nrm((nlayers, 1, 3 * H), F32),
        "wo": nrm((nlayers, H, H)), "bo": nrm((nlayers, 1, H), F32),
        "wf1": nrm((nlayers, H, FF)), "bf1": nrm((nlayers, 1, FF), F32),
        "wf2": nrm((nlayers, FF, H)), "bf2": nrm((nlayers, 1, H), F32),
        "g1": jnp.ones((nlayers, 1, H), F32),
        "be1": jnp.zeros((nlayers, 1, H), F32),
        "g2": jnp.ones((nlayers, 1, H), F32),
        "be2": jnp.zeros((nlayers, 1, H), F32),
        "norm_g": jnp.ones((1, H), F32),
        "norm_b": jnp.zeros((1, H), F32),
        "pe": sinusoidal_pe(pe_len, H),
    }


# ----------------------------------------------------------------------------
if __name__ == "__main__":
    # batch=2, seq(window)=8, d_model(input)=4, hidden=32, nhead=4,
    # dim_feedforward=64, num_encoder_layers=2
    B, T, D = 2, 8, 4
    H, NHEADS, FF, NLAYERS = 32, 4, 64, 2
    WINDOW = 8

    key = jax.random.PRNGKey(0)
    kp, kx = jax.random.split(key)
    params = init_params(kp, D, H, FF, NLAYERS, NHEADS, pe_len=WINDOW + 10)
    src = jax.random.normal(kx, (B, T, D), jnp.float32)

    fwd = jax.jit(partial(transformer_forward, nheads=NHEADS))
    out = fwd(src, params)
    jax.block_until_ready(out["sequence_output"])
    jax.block_until_ready(out["final_hidden_state"])

    assert out["sequence_output"].shape == (B, T, H)
    assert out["final_hidden_state"].shape == (B, H)
    assert out["sindy_loss"] is None
    print("KERNEL_OK")
</pallas_src>

<mosaic_0001>
module attributes {stable_mosaic.version = 11 : i64} {
  func.func @_transformer_kernel(%arg0: i32, %arg1: memref<16x4xf32, #tpu.memory_space<vmem>>, %arg2: memref<16x32xf32, #tpu.memory_space<vmem>>, %arg3: memref<4x96xbf16, #tpu.memory_space<vmem>>, %arg4: memref<1x96xf32, #tpu.memory_space<vmem>>, %arg5: memref<32x96xbf16, #tpu.memory_space<vmem>>, %arg6: memref<1x96xf32, #tpu.memory_space<vmem>>, %arg7: memref<32x96xbf16, #tpu.memory_space<vmem>>, %arg8: memref<1x96xf32, #tpu.memory_space<vmem>>, %arg9: memref<32x96xbf16, #tpu.memory_space<vmem>>, %arg10: memref<1x96xf32, #tpu.memory_space<vmem>>, %arg11: memref<2x32x96xbf16, #tpu.memory_space<vmem>>, %arg12: memref<2x1x96xf32, #tpu.memory_space<vmem>>, %arg13: memref<2x32x32xbf16, #tpu.memory_space<vmem>>, %arg14: memref<2x1x32xf32, #tpu.memory_space<vmem>>, %arg15: memref<2x32x64xbf16, #tpu.memory_space<vmem>>, %arg16: memref<2x1x64xf32, #tpu.memory_space<vmem>>, %arg17: memref<2x64x32xbf16, #tpu.memory_space<vmem>>, %arg18: memref<2x1x32xf32, #tpu.memory_space<vmem>>, %arg19: memref<2x1x32xf32, #tpu.memory_space<vmem>>, %arg20: memref<2x1x32xf32, #tpu.memory_space<vmem>>, %arg21: memref<2x1x32xf32, #tpu.memory_space<vmem>>, %arg22: memref<2x1x32xf32, #tpu.memory_space<vmem>>, %arg23: memref<1x32xf32, #tpu.memory_space<vmem>>, %arg24: memref<1x32xf32, #tpu.memory_space<vmem>>, %arg25: memref<2x256xf32, #tpu.memory_space<vmem>>) attributes {dimension_semantics = [#tpu.dimension_semantics<arbitrary>], iteration_bounds = array<i64: 1>, scalar_prefetch = 0 : i64, scratch_operands = 0 : i64, tpu.core_type = #tpu.core_type<tc>, window_params = [{pipeline_mode = #tpu.pipeline_mode<synchronous>, transform_indices = @transform_0, window_bounds = array<i64: 16, 4>}, {pipeline_mode = #tpu.pipeline_mode<synchronous>, transform_indices = @transform_1, window_bounds = array<i64: 16, 32>}, {pipeline_mode = #tpu.pipeline_mode<synchronous>, transform_indices = @transform_2, window_bounds = array<i64: 4, 96>}, {pipeline_mode = #tpu.pipeline_mode<synchronous>, transform_indices = @transform_3, window_bounds = array<i64: 1, 96>}, {pipeline_mode = #tpu.pipeline_mode<synchronous>, transform_indices = @transform_4, window_bounds = array<i64: 32, 96>}, {pipeline_mode = #tpu.pipeline_mode<synchronous>, transform_indices = @transform_5, window_bounds = array<i64: 1, 96>}, {pipeline_mode = #tpu.pipeline_mode<synchronous>, transform_indices = @transform_6, window_bounds = array<i64: 32, 96>}, {pipeline_mode = #tpu.pipeline_mode<synchronous>, transform_indices = @transform_7, window_bounds = array<i64: 1, 96>}, {pipeline_mode = #tpu.pipeline_mode<synchronous>, transform_indices = @transform_8, window_bounds = array<i64: 32, 96>}, {pipeline_mode = #tpu.pipeline_mode<synchronous>, transform_indices = @transform_9, window_bounds = array<i64: 1, 96>}, {pipeline_mode = #tpu.pipeline_mode<synchronous>, transform_indices = @transform_10, window_bounds = array<i64: 2, 32, 96>}, {pipeline_mode = #tpu.pipeline_mode<synchronous>, transform_indices = @transform_11, window_bounds = array<i64: 2, 1, 96>}, {pipeline_mode = #tpu.pipeline_mode<synchronous>, transform_indices = @transform_12, window_bounds = array<i64: 2, 32, 32>}, {pipeline_mode = #tpu.pipeline_mode<synchronous>, transform_indices = @transform_13, window_bounds = array<i64: 2, 1, 32>}, {pipeline_mode = #tpu.pipeline_mode<synchronous>, transform_indices = @transform_14, window_bounds = array<i64: 2, 32, 64>}, {pipeline_mode = #tpu.pipeline_mode<synchronous>, transform_indices = @transform_15, window_bounds = array<i64: 2, 1, 64>}, {pipeline_mode = #tpu.pipeline_mode<synchronous>, transform_indices = @transform_16, window_bounds = array<i64: 2, 64, 32>}, {pipeline_mode = #tpu.pipeline_mode<synchronous>, transform_indices = @transform_17, window_bounds = array<i64: 2, 1, 32>}, {pipeline_mode = #tpu.pipeline_mode<synchronous>, transform_indices = @transform_18, window_bounds = array<i64: 2, 1, 32>}, {pipeline_mode = #tpu.pipeline_mode<synchronous>, transform_indices = @transform_19, window_bounds = array<i64: 2, 1, 32>}, {pipeline_mode = #tpu.pipeline_mode<synchronous>, transform_indices = @transform_20, window_bounds = array<i64: 2, 1, 32>}, {pipeline_mode = #tpu.pipeline_mode<synchronous>, transform_indices = @transform_21, window_bounds = array<i64: 2, 1, 32>}, {pipeline_mode = #tpu.pipeline_mode<synchronous>, transform_indices = @transform_22, window_bounds = array<i64: 1, 32>}, {pipeline_mode = #tpu.pipeline_mode<synchronous>, transform_indices = @transform_23, window_bounds = array<i64: 1, 32>}, {pipeline_mode = #tpu.pipeline_mode<synchronous>, transform_indices = @transform_24, window_bounds = array<i64: 2, 256>}]} {
    %c0 = arith.constant 0 : index
    %c0_0 = arith.constant 0 : index
    %0 = vector.load %arg1[%c0, %c0_0] : memref<16x4xf32, #tpu.memory_space<vmem>>, vector<16x4xf32>
    %1 = arith.truncf %0 : vector<16x4xf32> to vector<16x4xbf16>
    %c0_1 = arith.constant 0 : index
    %c0_2 = arith.constant 0 : index
    %2 = vector.load %arg3[%c0_1, %c0_2] : memref<4x96xbf16, #tpu.memory_space<vmem>>, vector<4x96xbf16>
    %cst = arith.constant dense<0.000000e+00> : vector<16x96xf32>
    %3 = tpu.matmul %1, %2, %cst {dimension_numbers = #tpu.dot_dimension_numbers<[1], [0], [0], [1], [0, 0, 1, 1], [], []>} : vector<16x4xbf16>, vector<4x96xbf16>, vector<16x96xf32> -> vector<16x96xf32>
    %c0_3 = arith.constant 0 : index
    %c0_4 = arith.constant 0 : index
    %4 = vector.load %arg4[%c0_3, %c0_4] : memref<1x96xf32, #tpu.memory_space<vmem>>, vector<1x96xf32>
    %5 = vector.broadcast %4 : vector<1x96xf32> to vector<16x96xf32>
    %6 = arith.addf %3, %5 : vector<16x96xf32>
    %7 = vector.shape_cast %6 : vector<16x96xf32> to vector<2x8x96xf32>
    %c0_5 = arith.constant 0 : index
    %c0_6 = arith.constant 0 : index
    %8 = vector.load %arg5[%c0_5, %c0_6] : memref<32x96xbf16, #tpu.memory_space<vmem>>, vector<32x96xbf16>
    %c0_7 = arith.constant 0 : index
    %c0_8 = arith.constant 0 : index
    %9 = vector.load %arg6[%c0_7, %c0_8] : memref<1x96xf32, #tpu.memory_space<vmem>>, vector<1x96xf32>
    %c0_9 = arith.constant 0 : index
    %c0_10 = arith.constant 0 : index
    %10 = vector.load %arg7[%c0_9, %c0_10] : memref<32x96xbf16, #tpu.memory_space<vmem>>, vector<32x96xbf16>
    %c0_11 = arith.constant 0 : index
    %c0_12 = arith.constant 0 : index
    %11 = vector.load %arg8[%c0_11, %c0_12] : memref<1x96xf32, #tpu.memory_space<vmem>>, vector<1x96xf32>
    %c0_13 = arith.constant 0 : index
    %c0_14 = arith.constant 0 : index
    %12 = vector.load %arg9[%c0_13, %c0_14] : memref<32x96xbf16, #tpu.memory_space<vmem>>, vector<32x96xbf16>
    %c0_15 = arith.constant 0 : index
    %c0_16 = arith.constant 0 : index
    %13 = vector.load %arg10[%c0_15, %c0_16] : memref<1x96xf32, #tpu.memory_space<vmem>>, vector<1x96xf32>
    %cst_17 = arith.constant 0.000000e+00 : f32
    %14 = vector.broadcast %cst_17 : f32 to vector<2x32xf32>
    %cst_18 = arith.constant 0.000000e+00 : f32
    %15 = vector.broadcast %cst_18 : f32 to vector<2x32xf32>
    %cst_19 = arith.constant 0.000000e+00 : f32
    %16 = vector.broadcast %cst_19 : f32 to vector<16x32xf32>
    %17 = tpu.iota {dimensions = array<i32: 0>} : vector<16x1xi32>
    %c8_i32 = arith.constant 8 : i32
    %c0_i32 = arith.constant 0 : i32
    %18 = arith.cmpi eq, %c8_i32, %c0_i32 : i32
    %c1_i32 = arith.constant 1 : i32
    %19 = arith.select %18, %c1_i32, %c8_i32 : i32
    %20 = vector.broadcast %19 : i32 to vector<16x1xi32>
    %21 = arith.remsi %17, %20 : vector<16x1xi32>
    %c0_i32_20 = arith.constant 0 : i32
    %22 = vector.broadcast %c0_i32_20 : i32 to vector<16x1xi32>
    %23 = arith.cmpi ne, %21, %22 : vector<16x1xi32>
    %c0_i32_21 = arith.constant 0 : i32
    %24 = vector.broadcast %c0_i32_21 : i32 to vector<16x1xi32>
    %25 = arith.cmpi slt, %21, %24 : vector<16x1xi32>
    %c0_i32_22 = arith.constant 0 : i32
    %26 = arith.cmpi slt, %19, %c0_i32_22 : i32
    %27 = vector.broadcast %26 : i1 to vector<16x1xi1>
    %28 = vector.broadcast %27 : vector<16x1xi1> to vector<16x1xi1>
    %29 = arith.xori %25, %28 : vector<16x1xi1>
    %30 = arith.andi %29, %23 : vector<16x1xi1>
    %31 = vector.broadcast %19 : i32 to vector<16x1xi32>
    %32 = arith.addi %21, %31 : vector<16x1xi32>
    %33 = arith.select %30, %32, %21 : vector<16x1xi1>, vector<16x1xi32>
    %34 = vector.extract_strided_slice %7 {offsets = [0, 0, 0], sizes = [2, 1, 96], strides = [1, 1, 1]} : vector<2x8x96xf32> to vector<2x1x96xf32>
    %35 = vector.shape_cast %34 : vector<2x1x96xf32> to vector<2x96xf32>
    %36 = arith.truncf %14 : vector<2x32xf32> to vector<2x32xbf16>
    %cst_23 = arith.constant dense<0.000000e+00> : vector<2x96xf32>
    %37 = tpu.matmul %36, %8, %cst_23 {dimension_numbers = #tpu.dot_dimension_numbers<[1], [0], [0], [1], [0, 0, 1, 1], [], []>} : vector<2x32xbf16>, vector<32x96xbf16>, vector<2x96xf32> -> vector<2x96xf32>
    %38 = vector.broadcast %9 : vector<1x96xf32> to vector<2x96xf32>
    %39 = arith.addf %37, %38 : vector<2x96xf32>
    %40 = vector.extract_strided_slice %35 {offsets = [0, 0], sizes = [2, 32], strides = [1, 1]} : vector<2x96xf32> to vector<2x32xf32>
    %41 = vector.extract_strided_slice %39 {offsets = [0, 0], sizes = [2, 32], strides = [1, 1]} : vector<2x96xf32> to vector<2x32xf32>
    %42 = arith.addf %40, %41 : vector<2x32xf32>
    %43 = arith.negf %42 : vector<2x32xf32>
    %44 = math.exp %43 : vector<2x32xf32>
    %cst_24 = arith.constant 1.000000e+00 : f32
    %45 = vector.broadcast %cst_24 : f32 to vector<2x32xf32>
    %46 = arith.addf %45, %44 : vector<2x32xf32>
    %47 = arith.divf %45, %46 : vector<2x32xf32>
    %48 = vector.extract_strided_slice %35 {offsets = [0, 32], sizes = [2, 32], strides = [1, 1]} : vector<2x96xf32> to vector<2x32xf32>
    %49 = vector.extract_strided_slice %39 {offsets = [0, 32], sizes = [2, 32], strides = [1, 1]} : vector<2x96xf32> to vector<2x32xf32>
    %50 = arith.addf %48, %49 : vector<2x32xf32>
    %51 = arith.negf %50 : vector<2x32xf32>
    %52 = math.exp %51 : vector<2x32xf32>
    %cst_25 = arith.constant 1.000000e+00 : f32
    %53 = vector.broadcast %cst_25 : f32 to vector<2x32xf32>
    %54 = arith.addf %53, %52 : vector<2x32xf32>
    %55 = arith.divf %53, %54 : vector<2x32xf32>
    %56 = vector.extract_strided_slice %35 {offsets = [0, 64], sizes = [2, 32], strides = [1, 1]} : vector<2x96xf32> to vector<2x32xf32>
    %57 = vector.extract_strided_slice %39 {offsets = [0, 64], sizes = [2, 32], strides = [1, 1]} : vector<2x96xf32> to vector<2x32xf32>
    %58 = arith.mulf %47, %57 : vector<2x32xf32>
    %59 = arith.addf %56, %58 : vector<2x32xf32>
    %60 = math.tanh %59 : vector<2x32xf32>
    %cst_26 = arith.constant 1.000000e+00 : f32
    %61 = vector.broadcast %cst_26 : f32 to vector<2x32xf32>
    %62 = arith.subf %61, %55 : vector<2x32xf32>
    %63 = arith.mulf %62, %60 : vector<2x32xf32>
    %64 = arith.mulf %55, %14 : vector<2x32xf32>
    %65 = arith.addf %63, %64 : vector<2x32xf32>
    %66 = arith.truncf %65 : vector<2x32xf32> to vector<2x32xbf16>
    %cst_27 = arith.constant dense<0.000000e+00> : vector<2x96xf32>
    %67 = tpu.matmul %66, %10, %cst_27 {dimension_numbers = #tpu.dot_dimension_numbers<[1], [0], [0], [1], [0, 0, 1, 1], [], []>} : vector<2x32xbf16>, vector<32x96xbf16>, vector<2x96xf32> -> vector<2x96xf32>
    %68 = vector.broadcast %11 : vector<1x96xf32> to vector<2x96xf32>
    %69 = arith.addf %67, %68 : vector<2x96xf32>
    %70 = arith.truncf %15 : vector<2x32xf32> to vector<2x32xbf16>
    %cst_28 = arith.constant dense<0.000000e+00> : vector<2x96xf32>
    %71 = tpu.matmul %70, %12, %cst_28 {dimension_numbers = #tpu.dot_dimension_numbers<[1], [0], [0], [1], [0, 0, 1, 1], [], []>} : vector<2x32xbf16>, vector<32x96xbf16>, vector<2x96xf32> -> vector<2x96xf32>
    %72 = vector.broadcast %13 : vector<1x96xf32> to vector<2x96xf32>
    %73 = arith.addf %71, %72 : vector<2x96xf32>
    %74 = vector.extract_strided_slice %69 {offsets = [0, 0], sizes = [2, 32], strides = [1, 1]} : vector<2x96xf32> to vector<2x32xf32>
    %75 = vector.extract_strided_slice %73 {offsets = [0, 0], sizes = [2, 32], strides = [1, 1]} : vector<2x96xf32> to vector<2x32xf32>
    %76 = arith.addf %74, %75 : vector<2x32xf32>
    %77 = arith.negf %76 : vector<2x32xf32>
    %78 = math.exp %77 : vector<2x32xf32>
    %cst_29 = arith.constant 1.000000e+00 : f32
    %79 = vector.broadcast %cst_29 : f32 to vector<2x32xf32>
    %80 = arith.addf %79, %78 : vector<2x32xf32>
    %81 = arith.divf %79, %80 : vector<2x32xf32>
    %82 = vector.extract_strided_slice %69 {offsets = [0, 32], sizes = [2, 32], strides = [1, 1]} : vector<2x96xf32> to vector<2x32xf32>
    %83 = vector.extract_strided_slice %73 {offsets = [0, 32], sizes = [2, 32], strides = [1, 1]} : vector<2x96xf32> to vector<2x32xf32>
    %84 = arith.addf %82, %83 : vector<2x32xf32>
    %85 = arith.negf %84 : vector<2x32xf32>
    %86 = math.exp %85 : vector<2x32xf32>
    %cst_30 = arith.constant 1.000000e+00 : f32
    %87 = vector.broadcast %cst_30 : f32 to vector<2x32xf32>
    %88 = arith.addf %87, %86 : vector<2x32xf32>
    %89 = arith.divf %87, %88 : vector<2x32xf32>
    %90 = vector.extract_strided_slice %69 {offsets = [0, 64], sizes = [2, 32], strides = [1, 1]} : vector<2x96xf32> to vector<2x32xf32>
    %91 = vector.extract_strided_slice %73 {offsets = [0, 64], sizes = [2, 32], strides = [1, 1]} : vector<2x96xf32> to vector<2x32xf32>
    %92 = arith.mulf %81, %91 : vector<2x32xf32>
    %93 = arith.addf %90, %92 : vector<2x32xf32>
    %94 = math.tanh %93 : vector<2x32xf32>
    %cst_31 = arith.constant 1.000000e+00 : f32
    %95 = vector.broadcast %cst_31 : f32 to vector<2x32xf32>
    %96 = arith.subf %95, %89 : vector<2x32xf32>
    %97 = arith.mulf %96, %94 : vector<2x32xf32>
    %98 = arith.mulf %89, %15 : vector<2x32xf32>
    %99 = arith.addf %97, %98 : vector<2x32xf32>
    %100 = vector.shape_cast %99 : vector<2x32xf32> to vector<2x1x32xf32>
    %101 = vector.shape_cast %100 : vector<2x1x32xf32> to vector<2x1x32xf32>
    %102 = vector.broadcast %101 : vector<2x1x32xf32> to vector<2x8x32xf32>
    %103 = vector.shape_cast %102 : vector<2x8x32xf32> to vector<16x32xf32>
    %c0_i32_32 = arith.constant 0 : i32
    %104 = vector.broadcast %c0_i32_32 : i32 to vector<16x1xi32>
    %105 = arith.cmpi eq, %33, %104 : vector<16x1xi32>
    %106 = vector.shape_cast %105 : vector<16x1xi1> to vector<16x1xi1>
    %107 = vector.broadcast %106 : vector<16x1xi1> to vector<16x32xi1>
    %108 = arith.select %107, %103, %16 : vector<16x32xi1>, vector<16x32xf32>
    %109 = vector.extract_strided_slice %7 {offsets = [0, 1, 0], sizes = [2, 1, 96], strides = [1, 1, 1]} : vector<2x8x96xf32> to vector<2x1x96xf32>
    %110 = vector.shape_cast %109 : vector<2x1x96xf32> to vector<2x96xf32>
    %111 = arith.truncf %65 : vector<2x32xf32> to vector<2x32xbf16>
    %cst_33 = arith.constant dense<0.000000e+00> : vector<2x96xf32>
    %112 = tpu.matmul %111, %8, %cst_33 {dimension_numbers = #tpu.dot_dimension_numbers<[1], [0], [0], [1], [0, 0, 1, 1], [], []>} : vector<2x32xbf16>, vector<32x96xbf16>, vector<2x96xf32> -> vector<2x96xf32>
    %113 = vector.broadcast %9 : vector<1x96xf32> to vector<2x96xf32>
    %114 = arith.addf %112, %113 : vector<2x96xf32>
    %115 = vector.extract_strided_slice %110 {offsets = [0, 0], sizes = [2, 32], strides = [1, 1]} : vector<2x96xf32> to vector<2x32xf32>
    %116 = vector.extract_strided_slice %114 {offsets = [0, 0], sizes = [2, 32], strides = [1, 1]} : vector<2x96xf32> to vector<2x32xf32>
    %117 = arith.addf %115, %116 : vector<2x32xf32>
    %118 = arith.negf %117 : vector<2x32xf32>
    %119 = math.exp %118 : vector<2x32xf32>
    %cst_34 = arith.constant 1.000000e+00 : f32
    %120 = vector.broadcast %cst_34 : f32 to vector<2x32xf32>
    %121 = arith.addf %120, %119 : vector<2x32xf32>
    %122 = arith.divf %120, %121 : vector<2x32xf32>
    %123 = vector.extract_strided_slice %110 {offsets = [0, 32], sizes = [2, 32], strides = [1, 1]} : vector<2x96xf32> to vector<2x32xf32>
    %124 = vector.extract_strided_slice %114 {offsets = [0, 32], sizes = [2, 32], strides = [1, 1]} : vector<2x96xf32> to vector<2x32xf32>
    %125 = arith.addf %123, %124 : vector<2x32xf32>
    %126 = arith.negf %125 : vector<2x32xf32>
    %127 = math.exp %126 : vector<2x32xf32>
    %cst_35 = arith.constant 1.000000e+00 : f32
    %128 = vector.broadcast %cst_35 : f32 to vector<2x32xf32>
    %129 = arith.addf %128, %127 : vector<2x32xf32>
    %130 = arith.divf %128, %129 : vector<2x32xf32>
    %131 = vector.extract_strided_slice %110 {offsets = [0, 64], sizes = [2, 32], strides = [1, 1]} : vector<2x96xf32> to vector<2x32xf32>
    %132 = vector.extract_strided_slice %114 {offsets = [0, 64], sizes = [2, 32], strides = [1, 1]} : vector<2x96xf32> to vector<2x32xf32>
    %133 = arith.mulf %122, %132 : vector<2x32xf32>
    %134 = arith.addf %131, %133 : vector<2x32xf32>
    %135 = math.tanh %134 : vector<2x32xf32>
    %cst_36 = arith.constant 1.000000e+00 : f32
    %136 = vector.broadcast %cst_36 : f32 to vector<2x32xf32>
    %137 = arith.subf %136, %130 : vector<2x32xf32>
    %138 = arith.mulf %137, %135 : vector<2x32xf32>
    %139 = arith.mulf %130, %65 : vector<2x32xf32>
    %140 = arith.addf %138, %139 : vector<2x32xf32>
    %141 = arith.truncf %140 : vector<2x32xf32> to vector<2x32xbf16>
    %cst_37 = arith.constant dense<0.000000e+00> : vector<2x96xf32>
    %142 = tpu.matmul %141, %10, %cst_37 {dimension_numbers = #tpu.dot_dimension_numbers<[1], [0], [0], [1], [0, 0, 1, 1], [], []>} : vector<2x32xbf16>, vector<32x96xbf16>, vector<2x96xf32> -> vector<2x96xf32>
    %143 = vector.broadcast %11 : vector<1x96xf32> to vector<2x96xf32>
    %144 = arith.addf %142, %143 : vector<2x96xf32>
    %145 = arith.truncf %99 : vector<2x32xf32> to vector<2x32xbf16>
    %cst_38 = arith.constant dense<0.000000e+00> : vector<2x96xf32>
    %146 = tpu.matmul %145, %12, %cst_38 {dimension_numbers = #tpu.dot_dimension_numbers<[1], [0], [0], [1], [0, 0, 1, 1], [], []>} : vector<2x32xbf16>, vector<32x96xbf16>, vector<2x96xf32> -> vector<2x96xf32>
    %147 = vector.broadcast %13 : vector<1x96xf32> to vector<2x96xf32>
    %148 = arith.addf %146, %147 : vector<2x96xf32>
    %149 = vector.extract_strided_slice %144 {offsets = [0, 0], sizes = [2, 32], strides = [1, 1]} : vector<2x96xf32> to vector<2x32xf32>
    %150 = vector.extract_strided_slice %148 {offsets = [0, 0], sizes = [2, 32], strides = [1, 1]} : vector<2x96xf32> to vector<2x32xf32>
    %151 = arith.addf %149, %150 : vector<2x32xf32>
    %152 = arith.negf %151 : vector<2x32xf32>
    %153 = math.exp %152 : vector<2x32xf32>
    %cst_39 = arith.constant 1.000000e+00 : f32
    %154 = vector.broadcast %cst_39 : f32 to vector<2x32xf32>
    %155 = arith.addf %154, %153 : vector<2x32xf32>
    %156 = arith.divf %154, %155 : vector<2x32xf32>
    %157 = vector.extract_strided_slice %144 {offsets = [0, 32], sizes = [2, 32], strides = [1, 1]} : vector<2x96xf32> to vector<2x32xf32>
    %158 = vector.extract_strided_slice %148 {offsets = [0, 32], sizes = [2, 32], strides = [1, 1]} : vector<2x96xf32> to vector<2x32xf32>
    %159 = arith.addf %157, %158 : vector<2x32xf32>
    %160 = arith.negf %159 : vector<2x32xf32>
    %161 = math.exp %160 : vector<2x32xf32>
    %cst_40 = arith.constant 1.000000e+00 : f32
    %162 = vector.broadcast %cst_40 : f32 to vector<2x32xf32>
    %163 = arith.addf %162, %161 : vector<2x32xf32>
    %164 = arith.divf %162, %163 : vector<2x32xf32>
    %165 = vector.extract_strided_slice %144 {offsets = [0, 64], sizes = [2, 32], strides = [1, 1]} : vector<2x96xf32> to vector<2x32xf32>
    %166 = vector.extract_strided_slice %148 {offsets = [0, 64], sizes = [2, 32], strides = [1, 1]} : vector<2x96xf32> to vector<2x32xf32>
    %167 = arith.mulf %156, %166 : vector<2x32xf32>
    %168 = arith.addf %165, %167 : vector<2x32xf32>
    %169 = math.tanh %168 : vector<2x32xf32>
    %cst_41 = arith.constant 1.000000e+00 : f32
    %170 = vector.broadcast %cst_41 : f32 to vector<2x32xf32>
    %171 = arith.subf %170, %164 : vector<2x32xf32>
    %172 = arith.mulf %171, %169 : vector<2x32xf32>
    %173 = arith.mulf %164, %99 : vector<2x32xf32>
    %174 = arith.addf %172, %173 : vector<2x32xf32>
    %175 = vector.shape_cast %174 : vector<2x32xf32> to vector<2x1x32xf32>
    %176 = vector.shape_cast %175 : vector<2x1x32xf32> to vector<2x1x32xf32>
    %177 = vector.broadcast %176 : vector<2x1x32xf32> to vector<2x8x32xf32>
    %178 = vector.shape_cast %177 : vector<2x8x32xf32> to vector<16x32xf32>
    %c1_i32_42 = arith.constant 1 : i32
    %179 = vector.broadcast %c1_i32_42 : i32 to vector<16x1xi32>
    %180 = arith.cmpi eq, %33, %179 : vector<16x1xi32>
    %181 = vector.shape_cast %180 : vector<16x1xi1> to vector<16x1xi1>
    %182 = vector.broadcast %181 : vector<16x1xi1> to vector<16x32xi1>
    %183 = arith.select %182, %178, %108 : vector<16x32xi1>, vector<16x32xf32>
    %184 = vector.extract_strided_slice %7 {offsets = [0, 2, 0], sizes = [2, 1, 96], strides = [1, 1, 1]} : vector<2x8x96xf32> to vector<2x1x96xf32>
    %185 = vector.shape_cast %184 : vector<2x1x96xf32> to vector<2x96xf32>
    %186 = arith.truncf %140 : vector<2x32xf32> to vector<2x32xbf16>
    %cst_43 = arith.constant dense<0.000000e+00> : vector<2x96xf32>
    %187 = tpu.matmul %186, %8, %cst_43 {dimension_numbers = #tpu.dot_dimension_numbers<[1], [0], [0], [1], [0, 0, 1, 1], [], []>} : vector<2x32xbf16>, vector<32x96xbf16>, vector<2x96xf32> -> vector<2x96xf32>
    %188 = vector.broadcast %9 : vector<1x96xf32> to vector<2x96xf32>
    %189 = arith.addf %187, %188 : vector<2x96xf32>
    %190 = vector.extract_strided_slice %185 {offsets = [0, 0], sizes = [2, 32], strides = [1, 1]} : vector<2x96xf32> to vector<2x32xf32>
    %191 = vector.extract_strided_slice %189 {offsets = [0, 0], sizes = [2, 32], strides = [1, 1]} : vector<2x96xf32> to vector<2x32xf32>
    %192 = arith.addf %190, %191 : vector<2x32xf32>
    %193 = arith.negf %192 : vector<2x32xf32>
    %194 = math.exp %193 : vector<2x32xf32>
    %cst_44 = arith.constant 1.000000e+00 : f32
    %195 = vector.broadcast %cst_44 : f32 to vector<2x32xf32>
    %196 = arith.addf %195, %194 : vector<2x32xf32>
    %197 = arith.divf %195, %196 : vector<2x32xf32>
    %198 = vector.extract_strided_slice %185 {offsets = [0, 32], sizes = [2, 32], strides = [1, 1]} : vector<2x96xf32> to vector<2x32xf32>
    %199 = vector.extract_strided_slice %189 {offsets = [0, 32], sizes = [2, 32], strides = [1, 1]} : vector<2x96xf32> to vector<2x32xf32>
    %200 = arith.addf %198, %199 : vector<2x32xf32>
    %201 = arith.negf %200 : vector<2x32xf32>
    %202 = math.exp %201 : vector<2x32xf32>
    %cst_45 = arith.constant 1.000000e+00 : f32
    %203 = vector.broadcast %cst_45 : f32 to vector<2x32xf32>
    %204 = arith.addf %203, %202 : vector<2x32xf32>
    %205 = arith.divf %203, %204 : vector<2x32xf32>
    %206 = vector.extract_strided_slice %185 {offsets = [0, 64], sizes = [2, 32], strides = [1, 1]} : vector<2x96xf32> to vector<2x32xf32>
    %207 = vector.extract_strided_slice %189 {offsets = [0, 64], sizes = [2, 32], strides = [1, 1]} : vector<2x96xf32> to vector<2x32xf32>
    %208 = arith.mulf %197, %207 : vector<2x32xf32>
    %209 = arith.addf %206, %208 : vector<2x32xf32>
    %210 = math.tanh %209 : vector<2x32xf32>
    %cst_46 = arith.constant 1.000000e+00 : f32
    %211 = vector.broadcast %cst_46 : f32 to vector<2x32xf32>
    %212 = arith.subf %211, %205 : vector<2x32xf32>
    %213 = arith.mulf %212, %210 : vector<2x32xf32>
    %214 = arith.mulf %205, %140 : vector<2x32xf32>
    %215 = arith.addf %213, %214 : vector<2x32xf32>
    %216 = arith.truncf %215 : vector<2x32xf32> to vector<2x32xbf16>
    %cst_47 = arith.constant dense<0.000000e+00> : vector<2x96xf32>
    %217 = tpu.matmul %216, %10, %cst_47 {dimension_numbers = #tpu.dot_dimension_numbers<[1], [0], [0], [1], [0, 0, 1, 1], [], []>} : vector<2x32xbf16>, vector<32x96xbf16>, vector<2x96xf32> -> vector<2x96xf32>
    %218 = vector.broadcast %11 : vector<1x96xf32> to vector<2x96xf32>
    %219 = arith.addf %217, %218 : vector<2x96xf32>
    %220 = arith.truncf %174 : vector<2x32xf32> to vector<2x32xbf16>
    %cst_48 = arith.constant dense<0.000000e+00> : vector<2x96xf32>
    %221 = tpu.matmul %220, %12, %cst_48 {dimension_numbers = #tpu.dot_dimension_numbers<[1], [0], [0], [1], [0, 0, 1, 1], [], []>} : vector<2x32xbf16>, vector<32x96xbf16>, vector<2x96xf32> -> vector<2x96xf32>
    %222 = vector.broadcast %13 : vector<1x96xf32> to vector<2x96xf32>
    %223 = arith.addf %221, %222 : vector<2x96xf32>
    %224 = vector.extract_strided_slice %219 {offsets = [0, 0], sizes = [2, 32], strides = [1, 1]} : vector<2x96xf32> to vector<2x32xf32>
    %225 = vector.extract_strided_slice %223 {offsets = [0, 0], sizes = [2, 32], strides = [1, 1]} : vector<2x96xf32> to vector<2x32xf32>
    %226 = arith.addf %224, %225 : vector<2x32xf32>
    %227 = arith.negf %226 : vector<2x32xf32>
    %228 = math.exp %227 : vector<2x32xf32>
    %cst_49 = arith.constant 1.000000e+00 : f32
    %229 = vector.broadcast %cst_49 : f32 to vector<2x32xf32>
    %230 = arith.addf %229, %228 : vector<2x32xf32>
    %231 = arith.divf %229, %230 : vector<2x32xf32>
    %232 = vector.extract_strided_slice %219 {offsets = [0, 32], sizes = [2, 32], strides = [1, 1]} : vector<2x96xf32> to vector<2x32xf32>
    %233 = vector.extract_strided_slice %223 {offsets = [0, 32], sizes = [2, 32], strides = [1, 1]} : vector<2x96xf32> to vector<2x32xf32>
    %234 = arith.addf %232, %233 : vector<2x32xf32>
    %235 = arith.negf %234 : vector<2x32xf32>
    %236 = math.exp %235 : vector<2x32xf32>
    %cst_50 = arith.constant 1.000000e+00 : f32
    %237 = vector.broadcast %cst_50 : f32 to vector<2x32xf32>
    %238 = arith.addf %237, %236 : vector<2x32xf32>
    %239 = arith.divf %237, %238 : vector<2x32xf32>
    %240 = vector.extract_strided_slice %219 {offsets = [0, 64], sizes = [2, 32], strides = [1, 1]} : vector<2x96xf32> to vector<2x32xf32>
    %241 = vector.extract_strided_slice %223 {offsets = [0, 64], sizes = [2, 32], strides = [1, 1]} : vector<2x96xf32> to vector<2x32xf32>
    %242 = arith.mulf %231, %241 : vector<2x32xf32>
    %243 = arith.addf %240, %242 : vector<2x32xf32>
    %244 = math.tanh %243 : vector<2x32xf32>
    %cst_51 = arith.constant 1.000000e+00 : f32
    %245 = vector.broadcast %cst_51 : f32 to vector<2x32xf32>
    %246 = arith.subf %245, %239 : vector<2x32xf32>
    %247 = arith.mulf %246, %244 : vector<2x32xf32>
    %248 = arith.mulf %239, %174 : vector<2x32xf32>
    %249 = arith.addf %247, %248 : vector<2x32xf32>
    %250 = vector.shape_cast %249 : vector<2x32xf32> to vector<2x1x32xf32>
    %251 = vector.shape_cast %250 : vector<2x1x32xf32> to vector<2x1x32xf32>
    %252 = vector.broadcast %251 : vector<2x1x32xf32> to vector<2x8x32xf32>
    %253 = vector.shape_cast %252 : vector<2x8x32xf32> to vector<16x32xf32>
    %c2_i32 = arith.constant 2 : i32
    %254 = vector.broadcast %c2_i32 : i32 to vector<16x1xi32>
    %255 = arith.cmpi eq, %33, %254 : vector<16x1xi32>
    %256 = vector.shape_cast %255 : vector<16x1xi1> to vector<16x1xi1>
    %257 = vector.broadcast %256 : vector<16x1xi1> to vector<16x32xi1>
    %258 = arith.select %257, %253, %183 : vector<16x32xi1>, vector<16x32xf32>
    %259 = vector.extract_strided_slice %7 {offsets = [0, 3, 0], sizes = [2, 1, 96], strides = [1, 1, 1]} : vector<2x8x96xf32> to vector<2x1x96xf32>
    %260 = vector.shape_cast %259 : vector<2x1x96xf32> to vector<2x96xf32>
    %261 = arith.truncf %215 : vector<2x32xf32> to vector<2x32xbf16>
    %cst_52 = arith.constant dense<0.000000e+00> : vector<2x96xf32>
    %262 = tpu.matmul %261, %8, %cst_52 {dimension_numbers = #tpu.dot_dimension_numbers<[1], [0], [0], [1], [0, 0, 1, 1], [], []>} : vector<2x32xbf16>, vector<32x96xbf16>, vector<2x96xf32> -> vector<2x96xf32>
    %263 = vector.broadcast %9 : vector<1x96xf32> to vector<2x96xf32>
    %264 = arith.addf %262, %263 : vector<2x96xf32>
    %265 = vector.extract_strided_slice %260 {offsets = [0, 0], sizes = [2, 32], strides = [1, 1]} : vector<2x96xf32> to vector<2x32xf32>
    %266 = vector.extract_strided_slice %264 {offsets = [0, 0], sizes = [2, 32], strides = [1, 1]} : vector<2x96xf32> to vector<2x32xf32>
    %267 = arith.addf %265, %266 : vector<2x32xf32>
    %268 = arith.negf %267 : vector<2x32xf32>
    %269 = math.exp %268 : vector<2x32xf32>
    %cst_53 = arith.constant 1.000000e+00 : f32
    %270 = vector.broadcast %cst_53 : f32 to vector<2x32xf32>
    %271 = arith.addf %270, %269 : vector<2x32xf32>
    %272 = arith.divf %270, %271 : vector<2x32xf32>
    %273 = vector.extract_strided_slice %260 {offsets = [0, 32], sizes = [2, 32], strides = [1, 1]} : vector<2x96xf32> to vector<2x32xf32>
    %274 = vector.extract_strided_slice %264 {offsets = [0, 32], sizes = [2, 32], strides = [1, 1]} : vector<2x96xf32> to vector<2x32xf32>
    %275 = arith.addf %273, %274 : vector<2x32xf32>
    %276 = arith.negf %275 : vector<2x32xf32>
    %277 = math.exp %276 : vector<2x32xf32>
    %cst_54 = arith.constant 1.000000e+00 : f32
    %278 = vector.broadcast %cst_54 : f32 to vector<2x32xf32>
    %279 = arith.addf %278, %277 : vector<2x32xf32>
    %280 = arith.divf %278, %279 : vector<2x32xf32>
    %281 = vector.extract_strided_slice %260 {offsets = [0, 64], sizes = [2, 32], strides = [1, 1]} : vector<2x96xf32> to vector<2x32xf32>
    %282 = vector.extract_strided_slice %264 {offsets = [0, 64], sizes = [2, 32], strides = [1, 1]} : vector<2x96xf32> to vector<2x32xf32>
    %283 = arith.mulf %272, %282 : vector<2x32xf32>
    %284 = arith.addf %281, %283 : vector<2x32xf32>
    %285 = math.tanh %284 : vector<2x32xf32>
    %cst_55 = arith.constant 1.000000e+00 : f32
    %286 = vector.broadcast %cst_55 : f32 to vector<2x32xf32>
    %287 = arith.subf %286, %280 : vector<2x32xf32>
    %288 = arith.mulf %287, %285 : vector<2x32xf32>
    %289 = arith.mulf %280, %215 : vector<2x32xf32>
    %290 = arith.addf %288, %289 : vector<2x32xf32>
    %291 = arith.truncf %290 : vector<2x32xf32> to vector<2x32xbf16>
    %cst_56 = arith.constant dense<0.000000e+00> : vector<2x96xf32>
    %292 = tpu.matmul %291, %10, %cst_56 {dimension_numbers = #tpu.dot_dimension_numbers<[1], [0], [0], [1], [0, 0, 1, 1], [], []>} : vector<2x32xbf16>, vector<32x96xbf16>, vector<2x96xf32> -> vector<2x96xf32>
    %293 = vector.broadcast %11 : vector<1x96xf32> to vector<2x96xf32>
    %294 = arith.addf %292, %293 : vector<2x96xf32>
    %295 = arith.truncf %249 : vector<2x32xf32> to vector<2x32xbf16>
    %cst_57 = arith.constant dense<0.000000e+00> : vector<2x96xf32>
    %296 = tpu.matmul %295, %12, %cst_57 {dimension_numbers = #tpu.dot_dimension_numbers<[1], [0], [0], [1], [0, 0, 1, 1], [], []>} : vector<2x32xbf16>, vector<32x96xbf16>, vector<2x96xf32> -> vector<2x96xf32>
    %297 = vector.broadcast %13 : vector<1x96xf32> to vector<2x96xf32>
    %298 = arith.addf %296, %297 : vector<2x96xf32>
    %299 = vector.extract_strided_slice %294 {offsets = [0, 0], sizes = [2, 32], strides = [1, 1]} : vector<2x96xf32> to vector<2x32xf32>
    %300 = vector.extract_strided_slice %298 {offsets = [0, 0], sizes = [2, 32], strides = [1, 1]} : vector<2x96xf32> to vector<2x32xf32>
    %301 = arith.addf %299, %300 : vector<2x32xf32>
    %302 = arith.negf %301 : vector<2x32xf32>
    %303 = math.exp %302 : vector<2x32xf32>
    %cst_58 = arith.constant 1.000000e+00 : f32
    %304 = vector.broadcast %cst_58 : f32 to vector<2x32xf32>
    %305 = arith.addf %304, %303 : vector<2x32xf32>
    %306 = arith.divf %304, %305 : vector<2x32xf32>
    %307 = vector.extract_strided_slice %294 {offsets = [0, 32], sizes = [2, 32], strides = [1, 1]} : vector<2x96xf32> to vector<2x32xf32>
    %308 = vector.extract_strided_slice %298 {offsets = [0, 32], sizes = [2, 32], strides = [1, 1]} : vector<2x96xf32> to vector<2x32xf32>
    %309 = arith.addf %307, %308 : vector<2x32xf32>
    %310 = arith.negf %309 : vector<2x32xf32>
    %311 = math.exp %310 : vector<2x32xf32>
    %cst_59 = arith.constant 1.000000e+00 : f32
    %312 = vector.broadcast %cst_59 : f32 to vector<2x32xf32>
    %313 = arith.addf %312, %311 : vector<2x32xf32>
    %314 = arith.divf %312, %313 : vector<2x32xf32>
    %315 = vector.extract_strided_slice %294 {offsets = [0, 64], sizes = [2, 32], strides = [1, 1]} : vector<2x96xf32> to vector<2x32xf32>
    %316 = vector.extract_strided_slice %298 {offsets = [0, 64], sizes = [2, 32], strides = [1, 1]} : vector<2x96xf32> to vector<2x32xf32>
    %317 = arith.mulf %306, %316 : vector<2x32xf32>
    %318 = arith.addf %315, %317 : vector<2x32xf32>
    %319 = math.tanh %318 : vector<2x32xf32>
    %cst_60 = arith.constant 1.000000e+00 : f32
    %320 = vector.broadcast %cst_60 : f32 to vector<2x32xf32>
    %321 = arith.subf %320, %314 : vector<2x32xf32>
    %322 = arith.mulf %321, %319 : vector<2x32xf32>
    %323 = arith.mulf %314, %249 : vector<2x32xf32>
    %324 = arith.addf %322, %323 : vector<2x32xf32>
    %325 = vector.shape_cast %324 : vector<2x32xf32> to vector<2x1x32xf32>
    %326 = vector.shape_cast %325 : vector<2x1x32xf32> to vector<2x1x32xf32>
    %327 = vector.broadcast %326 : vector<2x1x32xf32> to vector<2x8x32xf32>
    %328 = vector.shape_cast %327 : vector<2x8x32xf32> to vector<16x32xf32>
    %c3_i32 = arith.constant 3 : i32
    %329 = vector.broadcast %c3_i32 : i32 to vector<16x1xi32>
    %330 = arith.cmpi eq, %33, %329 : vector<16x1xi32>
    %331 = vector.shape_cast %330 : vector<16x1xi1> to vector<16x1xi1>
    %332 = vector.broadcast %331 : vector<16x1xi1> to vector<16x32xi1>
    %333 = arith.select %332, %328, %258 : vector<16x32xi1>, vector<16x32xf32>
    %334 = vector.extract_strided_slice %7 {offsets = [0, 4, 0], sizes = [2, 1, 96], strides = [1, 1, 1]} : vector<2x8x96xf32> to vector<2x1x96xf32>
    %335 = vector.shape_cast %334 : vector<2x1x96xf32> to vector<2x96xf32>
    %336 = arith.truncf %290 : vector<2x32xf32> to vector<2x32xbf16>
    %cst_61 = arith.constant dense<0.000000e+00> : vector<2x96xf32>
    %337 = tpu.matmul %336, %8, %cst_61 {dimension_numbers = #tpu.dot_dimension_numbers<[1], [0], [0], [1], [0, 0, 1, 1], [], []>} : vector<2x32xbf16>, vector<32x96xbf16>, vector<2x96xf32> -> vector<2x96xf32>
    %338 = vector.broadcast %9 : vector<1x96xf32> to vector<2x96xf32>
    %339 = arith.addf %337, %338 : vector<2x96xf32>
    %340 = vector.extract_strided_slice %335 {offsets = [0, 0], sizes = [2, 32], strides = [1, 1]} : vector<2x96xf32> to vector<2x32xf32>
    %341 = vector.extract_strided_slice %339 {offsets = [0, 0], sizes = [2, 32], strides = [1, 1]} : vector<2x96xf32> to vector<2x32xf32>
    %342 = arith.addf %340, %341 : vector<2x32xf32>
    %343 = arith.negf %342 : vector<2x32xf32>
    %344 = math.exp %343 : vector<2x32xf32>
    %cst_62 = arith.constant 1.000000e+00 : f32
    %345 = vector.broadcast %cst_62 : f32 to vector<2x32xf32>
    %346 = arith.addf %345, %344 : vector<2x32xf32>
    %347 = arith.divf %345, %346 : vector<2x32xf32>
    %348 = vector.extract_strided_slice %335 {offsets = [0, 32], sizes = [2, 32], strides = [1, 1]} : vector<2x96xf32> to vector<2x32xf32>
    %349 = vector.extract_strided_slice %339 {offsets = [0, 32], sizes = [2, 32], strides = [1, 1]} : vector<2x96xf32> to vector<2x32xf32>
    %350 = arith.addf %348, %349 : vector<2x32xf32>
    %351 = arith.negf %350 : vector<2x32xf32>
    %352 = math.exp %351 : vector<2x32xf32>
    %cst_63 = arith.constant 1.000000e+00 : f32
    %353 = vector.broadcast %cst_63 : f32 to vector<2x32xf32>
    %354 = arith.addf %353, %352 : vector<2x32xf32>
    %355 = arith.divf %353, %354 : vector<2x32xf32>
    %356 = vector.extract_strided_slice %335 {offsets = [0, 64], sizes = [2, 32], strides = [1, 1]} : vector<2x96xf32> to vector<2x32xf32>
    %357 = vector.extract_strided_slice %339 {offsets = [0, 64], sizes = [2, 32], strides = [1, 1]} : vector<2x96xf32> to vector<2x32xf32>
    %358 = arith.mulf %347, %357 : vector<2x32xf32>
    %359 = arith.addf %356, %358 : vector<2x32xf32>
    %360 = math.tanh %359 : vector<2x32xf32>
    %cst_64 = arith.constant 1.000000e+00 : f32
    %361 = vector.broadcast %cst_64 : f32 to vector<2x32xf32>
    %362 = arith.subf %361, %355 : vector<2x32xf32>
    %363 = arith.mulf %362, %360 : vector<2x32xf32>
    %364 = arith.mulf %355, %290 : vector<2x32xf32>
    %365 = arith.addf %363, %364 : vector<2x32xf32>
    %366 = arith.truncf %365 : vector<2x32xf32> to vector<2x32xbf16>
    %cst_65 = arith.constant dense<0.000000e+00> : vector<2x96xf32>
    %367 = tpu.matmul %366, %10, %cst_65 {dimension_numbers = #tpu.dot_dimension_numbers<[1], [0], [0], [1], [0, 0, 1, 1], [], []>} : vector<2x32xbf16>, vector<32x96xbf16>, vector<2x96xf32> -> vector<2x96xf32>
    %368 = vector.broadcast %11 : vector<1x96xf32> to vector<2x96xf32>
    %369 = arith.addf %367, %368 : vector<2x96xf32>
    %370 = arith.truncf %324 : vector<2x32xf32> to vector<2x32xbf16>
    %cst_66 = arith.constant dense<0.000000e+00> : vector<2x96xf32>
    %371 = tpu.matmul %370, %12, %cst_66 {dimension_numbers = #tpu.dot_dimension_numbers<[1], [0], [0], [1], [0, 0, 1, 1], [], []>} : vector<2x32xbf16>, vector<32x96xbf16>, vector<2x96xf32> -> vector<2x96xf32>
    %372 = vector.broadcast %13 : vector<1x96xf32> to vector<2x96xf32>
    %373 = arith.addf %371, %372 : vector<2x96xf32>
    %374 = vector.extract_strided_slice %369 {offsets = [0, 0], sizes = [2, 32], strides = [1, 1]} : vector<2x96xf32> to vector<2x32xf32>
    %375 = vector.extract_strided_slice %373 {offsets = [0, 0], sizes = [2, 32], strides = [1, 1]} : vector<2x96xf32> to vector<2x32xf32>
    %376 = arith.addf %374, %375 : vector<2x32xf32>
    %377 = arith.negf %376 : vector<2x32xf32>
    %378 = math.exp %377 : vector<2x32xf32>
    %cst_67 = arith.constant 1.000000e+00 : f32
    %379 = vector.broadcast %cst_67 : f32 to vector<2x32xf32>
    %380 = arith.addf %379, %378 : vector<2x32xf32>
    %381 = arith.divf %379, %380 : vector<2x32xf32>
    %382 = vector.extract_strided_slice %369 {offsets = [0, 32], sizes = [2, 32], strides = [1, 1]} : vector<2x96xf32> to vector<2x32xf32>
    %383 = vector.extract_strided_slice %373 {offsets = [0, 32], sizes = [2, 32], strides = [1, 1]} : vector<2x96xf32> to vector<2x32xf32>
    %384 = arith.addf %382, %383 : vector<2x32xf32>
    %385 = arith.negf %384 : vector<2x32xf32>
    %386 = math.exp %385 : vector<2x32xf32>
    %cst_68 = arith.constant 1.000000e+00 : f32
    %387 = vector.broadcast %cst_68 : f32 to vector<2x32xf32>
    %388 = arith.addf %387, %386 : vector<2x32xf32>
    %389 = arith.divf %387, %388 : vector<2x32xf32>
    %390 = vector.extract_strided_slice %369 {offsets = [0, 64], sizes = [2, 32], strides = [1, 1]} : vector<2x96xf32> to vector<2x32xf32>
    %391 = vector.extract_strided_slice %373 {offsets = [0, 64], sizes = [2, 32], strides = [1, 1]} : vector<2x96xf32> to vector<2x32xf32>
    %392 = arith.mulf %381, %391 : vector<2x32xf32>
    %393 = arith.addf %390, %392 : vector<2x32xf32>
    %394 = math.tanh %393 : vector<2x32xf32>
    %cst_69 = arith.constant 1.000000e+00 : f32
    %395 = vector.broadcast %cst_69 : f32 to vector<2x32xf32>
    %396 = arith.subf %395, %389 : vector<2x32xf32>
    %397 = arith.mulf %396, %394 : vector<2x32xf32>
    %398 = arith.mulf %389, %324 : vector<2x32xf32>
    %399 = arith.addf %397, %398 : vector<2x32xf32>
    %400 = vector.shape_cast %399 : vector<2x32xf32> to vector<2x1x32xf32>
    %401 = vector.shape_cast %400 : vector<2x1x32xf32> to vector<2x1x32xf32>
    %402 = vector.broadcast %401 : vector<2x1x32xf32> to vector<2x8x32xf32>
    %403 = vector.shape_cast %402 : vector<2x8x32xf32> to vector<16x32xf32>
    %c4_i32 = arith.constant 4 : i32
    %404 = vector.broadcast %c4_i32 : i32 to vector<16x1xi32>
    %405 = arith.cmpi eq, %33, %404 : vector<16x1xi32>
    %406 = vector.shape_cast %405 : vector<16x1xi1> to vector<16x1xi1>
    %407 = vector.broadcast %406 : vector<16x1xi1> to vector<16x32xi1>
    %408 = arith.select %407, %403, %333 : vector<16x32xi1>, vector<16x32xf32>
    %409 = vector.extract_strided_slice %7 {offsets = [0, 5, 0], sizes = [2, 1, 96], strides = [1, 1, 1]} : vector<2x8x96xf32> to vector<2x1x96xf32>
    %410 = vector.shape_cast %409 : vector<2x1x96xf32> to vector<2x96xf32>
    %411 = arith.truncf %365 : vector<2x32xf32> to vector<2x32xbf16>
    %cst_70 = arith.constant dense<0.000000e+00> : vector<2x96xf32>
    %412 = tpu.matmul %411, %8, %cst_70 {dimension_numbers = #tpu.dot_dimension_numbers<[1], [0], [0], [1], [0, 0, 1, 1], [], []>} : vector<2x32xbf16>, vector<32x96xbf16>, vector<2x96xf32> -> vector<2x96xf32>
    %413 = vector.broadcast %9 : vector<1x96xf32> to vector<2x96xf32>
    %414 = arith.addf %412, %413 : vector<2x96xf32>
    %415 = vector.extract_strided_slice %410 {offsets = [0, 0], sizes = [2, 32], strides = [1, 1]} : vector<2x96xf32> to vector<2x32xf32>
    %416 = vector.extract_strided_slice %414 {offsets = [0, 0], sizes = [2, 32], strides = [1, 1]} : vector<2x96xf32> to vector<2x32xf32>
    %417 = arith.addf %415, %416 : vector<2x32xf32>
    %418 = arith.negf %417 : vector<2x32xf32>
    %419 = math.exp %418 : vector<2x32xf32>
    %cst_71 = arith.constant 1.000000e+00 : f32
    %420 = vector.broadcast %cst_71 : f32 to vector<2x32xf32>
    %421 = arith.addf %420, %419 : vector<2x32xf32>
    %422 = arith.divf %420, %421 : vector<2x32xf32>
    %423 = vector.extract_strided_slice %410 {offsets = [0, 32], sizes = [2, 32], strides = [1, 1]} : vector<2x96xf32> to vector<2x32xf32>
    %424 = vector.extract_strided_slice %414 {offsets = [0, 32], sizes = [2, 32], strides = [1, 1]} : vector<2x96xf32> to vector<2x32xf32>
    %425 = arith.addf %423, %424 : vector<2x32xf32>
    %426 = arith.negf %425 : vector<2x32xf32>
    %427 = math.exp %426 : vector<2x32xf32>
    %cst_72 = arith.constant 1.000000e+00 : f32
    %428 = vector.broadcast %cst_72 : f32 to vector<2x32xf32>
    %429 = arith.addf %428, %427 : vector<2x32xf32>
    %430 = arith.divf %428, %429 : vector<2x32xf32>
    %431 = vector.extract_strided_slice %410 {offsets = [0, 64], sizes = [2, 32], strides = [1, 1]} : vector<2x96xf32> to vector<2x32xf32>
    %432 = vector.extract_strided_slice %414 {offsets = [0, 64], sizes = [2, 32], strides = [1, 1]} : vector<2x96xf32> to vector<2x32xf32>
    %433 = arith.mulf %422, %432 : vector<2x32xf32>
    %434 = arith.addf %431, %433 : vector<2x32xf32>
    %435 = math.tanh %434 : vector<2x32xf32>
    %cst_73 = arith.constant 1.000000e+00 : f32
    %436 = vector.broadcast %cst_73 : f32 to vector<2x32xf32>
    %437 = arith.subf %436, %430 : vector<2x32xf32>
    %438 = arith.mulf %437, %435 : vector<2x32xf32>
    %439 = arith.mulf %430, %365 : vector<2x32xf32>
    %440 = arith.addf %438, %439 : vector<2x32xf32>
    %441 = arith.truncf %440 : vector<2x32xf32> to vector<2x32xbf16>
    %cst_74 = arith.constant dense<0.000000e+00> : vector<2x96xf32>
    %442 = tpu.matmul %441, %10, %cst_74 {dimension_numbers = #tpu.dot_dimension_numbers<[1], [0], [0], [1], [0, 0, 1, 1], [], []>} : vector<2x32xbf16>, vector<32x96xbf16>, vector<2x96xf32> -> vector<2x96xf32>
    %443 = vector.broadcast %11 : vector<1x96xf32> to vector<2x96xf32>
    %444 = arith.addf %442, %443 : vector<2x96xf32>
    %445 = arith.truncf %399 : vector<2x32xf32> to vector<2x32xbf16>
    %cst_75 = arith.constant dense<0.000000e+00> : vector<2x96xf32>
    %446 = tpu.matmul %445, %12, %cst_75 {dimension_numbers = #tpu.dot_dimension_numbers<[1], [0], [0], [1], [0, 0, 1, 1], [], []>} : vector<2x32xbf16>, vector<32x96xbf16>, vector<2x96xf32> -> vector<2x96xf32>
    %447 = vector.broadcast %13 : vector<1x96xf32> to vector<2x96xf32>
    %448 = arith.addf %446, %447 : vector<2x96xf32>
    %449 = vector.extract_strided_slice %444 {offsets = [0, 0], sizes = [2, 32], strides = [1, 1]} : vector<2x96xf32> to vector<2x32xf32>
    %450 = vector.extract_strided_slice %448 {offsets = [0, 0], sizes = [2, 32], strides = [1, 1]} : vector<2x96xf32> to vector<2x32xf32>
    %451 = arith.addf %449, %450 : vector<2x32xf32>
    %452 = arith.negf %451 : vector<2x32xf32>
    %453 = math.exp %452 : vector<2x32xf32>
    %cst_76 = arith.constant 1.000000e+00 : f32
    %454 = vector.broadcast %cst_76 : f32 to vector<2x32xf32>
    %455 = arith.addf %454, %453 : vector<2x32xf32>
    %456 = arith.divf %454, %455 : vector<2x32xf32>
    %457 = vector.extract_strided_slice %444 {offsets = [0, 32], sizes = [2, 32], strides = [1, 1]} : vector<2x96xf32> to vector<2x32xf32>
    %458 = vector.extract_strided_slice %448 {offsets = [0, 32], sizes = [2, 32], strides = [1, 1]} : vector<2x96xf32> to vector<2x32xf32>
    %459 = arith.addf %457, %458 : vector<2x32xf32>
    %460 = arith.negf %459 : vector<2x32xf32>
    %461 = math.exp %460 : vector<2x32xf32>
    %cst_77 = arith.constant 1.000000e+00 : f32
    %462 = vector.broadcast %cst_77 : f32 to vector<2x32xf32>
    %463 = arith.addf %462, %461 : vector<2x32xf32>
    %464 = arith.divf %462, %463 : vector<2x32xf32>
    %465 = vector.extract_strided_slice %444 {offsets = [0, 64], sizes = [2, 32], strides = [1, 1]} : vector<2x96xf32> to vector<2x32xf32>
    %466 = vector.extract_strided_slice %448 {offsets = [0, 64], sizes = [2, 32], strides = [1, 1]} : vector<2x96xf32> to vector<2x32xf32>
    %467 = arith.mulf %456, %466 : vector<2x32xf32>
    %468 = arith.addf %465, %467 : vector<2x32xf32>
    %469 = math.tanh %468 : vector<2x32xf32>
    %cst_78 = arith.constant 1.000000e+00 : f32
    %470 = vector.broadcast %cst_78 : f32 to vector<2x32xf32>
    %471 = arith.subf %470, %464 : vector<2x32xf32>
    %472 = arith.mulf %471, %469 : vector<2x32xf32>
    %473 = arith.mulf %464, %399 : vector<2x32xf32>
    %474 = arith.addf %472, %473 : vector<2x32xf32>
    %475 = vector.shape_cast %474 : vector<2x32xf32> to vector<2x1x32xf32>
    %476 = vector.shape_cast %475 : vector<2x1x32xf32> to vector<2x1x32xf32>
    %477 = vector.broadcast %476 : vector<2x1x32xf32> to vector<2x8x32xf32>
    %478 = vector.shape_cast %477 : vector<2x8x32xf32> to vector<16x32xf32>
    %c5_i32 = arith.constant 5 : i32
    %479 = vector.broadcast %c5_i32 : i32 to vector<16x1xi32>
    %480 = arith.cmpi eq, %33, %479 : vector<16x1xi32>
    %481 = vector.shape_cast %480 : vector<16x1xi1> to vector<16x1xi1>
    %482 = vector.broadcast %481 : vector<16x1xi1> to vector<16x32xi1>
    %483 = arith.select %482, %478, %408 : vector<16x32xi1>, vector<16x32xf32>
    %484 = vector.extract_strided_slice %7 {offsets = [0, 6, 0], sizes = [2, 1, 96], strides = [1, 1, 1]} : vector<2x8x96xf32> to vector<2x1x96xf32>
    %485 = vector.shape_cast %484 : vector<2x1x96xf32> to vector<2x96xf32>
    %486 = arith.truncf %440 : vector<2x32xf32> to vector<2x32xbf16>
    %cst_79 = arith.constant dense<0.000000e+00> : vector<2x96xf32>
    %487 = tpu.matmul %486, %8, %cst_79 {dimension_numbers = #tpu.dot_dimension_numbers<[1], [0], [0], [1], [0, 0, 1, 1], [], []>} : vector<2x32xbf16>, vector<32x96xbf16>, vector<2x96xf32> -> vector<2x96xf32>
    %488 = vector.broadcast %9 : vector<1x96xf32> to vector<2x96xf32>
    %489 = arith.addf %487, %488 : vector<2x96xf32>
    %490 = vector.extract_strided_slice %485 {offsets = [0, 0], sizes = [2, 32], strides = [1, 1]} : vector<2x96xf32> to vector<2x32xf32>
    %491 = vector.extract_strided_slice %489 {offsets = [0, 0], sizes = [2, 32], strides = [1, 1]} : vector<2x96xf32> to vector<2x32xf32>
    %492 = arith.addf %490, %491 : vector<2x32xf32>
    %493 = arith.negf %492 : vector<2x32xf32>
    %494 = math.exp %493 : vector<2x32xf32>
    %cst_80 = arith.constant 1.000000e+00 : f32
    %495 = vector.broadcast %cst_80 : f32 to vector<2x32xf32>
    %496 = arith.addf %495, %494 : vector<2x32xf32>
    %497 = arith.divf %495, %496 : vector<2x32xf32>
    %498 = vector.extract_strided_slice %485 {offsets = [0, 32], sizes = [2, 32], strides = [1, 1]} : vector<2x96xf32> to vector<2x32xf32>
    %499 = vector.extract_strided_slice %489 {offsets = [0, 32], sizes = [2, 32], strides = [1, 1]} : vector<2x96xf32> to vector<2x32xf32>
    %500 = arith.addf %498, %499 : vector<2x32xf32>
    %501 = arith.negf %500 : vector<2x32xf32>
    %502 = math.exp %501 : vector<2x32xf32>
    %cst_81 = arith.constant 1.000000e+00 : f32
    %503 = vector.broadcast %cst_81 : f32 to vector<2x32xf32>
    %504 = arith.addf %503, %502 : vector<2x32xf32>
    %505 = arith.divf %503, %504 : vector<2x32xf32>
    %506 = vector.extract_strided_slice %485 {offsets = [0, 64], sizes = [2, 32], strides = [1, 1]} : vector<2x96xf32> to vector<2x32xf32>
    %507 = vector.extract_strided_slice %489 {offsets = [0, 64], sizes = [2, 32], strides = [1, 1]} : vector<2x96xf32> to vector<2x32xf32>
    %508 = arith.mulf %497, %507 : vector<2x32xf32>
    %509 = arith.addf %506, %508 : vector<2x32xf32>
    %510 = math.tanh %509 : vector<2x32xf32>
    %cst_82 = arith.constant 1.000000e+00 : f32
    %511 = vector.broadcast %cst_82 : f32 to vector<2x32xf32>
    %512 = arith.subf %511, %505 : vector<2x32xf32>
    %513 = arith.mulf %512, %510 : vector<2x32xf32>
    %514 = arith.mulf %505, %440 : vector<2x32xf32>
    %515 = arith.addf %513, %514 : vector<2x32xf32>
    %516 = arith.truncf %515 : vector<2x32xf32> to vector<2x32xbf16>
    %cst_83 = arith.constant dense<0.000000e+00> : vector<2x96xf32>
    %517 = tpu.matmul %516, %10, %cst_83 {dimension_numbers = #tpu.dot_dimension_numbers<[1], [0], [0], [1], [0, 0, 1, 1], [], []>} : vector<2x32xbf16>, vector<32x96xbf16>, vector<2x96xf32> -> vector<2x96xf32>
    %518 = vector.broadcast %11 : vector<1x96xf32> to vector<2x96xf32>
    %519 = arith.addf %517, %518 : vector<2x96xf32>
    %520 = arith.truncf %474 : vector<2x32xf32> to vector<2x32xbf16>
    %cst_84 = arith.constant dense<0.000000e+00> : vector<2x96xf32>
    %521 = tpu.matmul %520, %12, %cst_84 {dimension_numbers = #tpu.dot_dimension_numbers<[1], [0], [0], [1], [0, 0, 1, 1], [], []>} : vector<2x32xbf16>, vector<32x96xbf16>, vector<2x96xf32> -> vector<2x96xf32>
    %522 = vector.broadcast %13 : vector<1x96xf32> to vector<2x96xf32>
    %523 = arith.addf %521, %522 : vector<2x96xf32>
    %524 = vector.extract_strided_slice %519 {offsets = [0, 0], sizes = [2, 32], strides = [1, 1]} : vector<2x96xf32> to vector<2x32xf32>
    %525 = vector.extract_strided_slice %523 {offsets = [0, 0], sizes = [2, 32], strides = [1, 1]} : vector<2x96xf32> to vector<2x32xf32>
    %526 = arith.addf %524, %525 : vector<2x32xf32>
    %527 = arith.negf %526 : vector<2x32xf32>
    %528 = math.exp %527 : vector<2x32xf32>
    %cst_85 = arith.constant 1.000000e+00 : f32
    %529 = vector.broadcast %cst_85 : f32 to vector<2x32xf32>
    %530 = arith.addf %529, %528 : vector<2x32xf32>
    %531 = arith.divf %529, %530 : vector<2x32xf32>
    %532 = vector.extract_strided_slice %519 {offsets = [0, 32], sizes = [2, 32], strides = [1, 1]} : vector<2x96xf32> to vector<2x32xf32>
    %533 = vector.extract_strided_slice %523 {offsets = [0, 32], sizes = [2, 32], strides = [1, 1]} : vector<2x96xf32> to vector<2x32xf32>
    %534 = arith.addf %532, %533 : vector<2x32xf32>
    %535 = arith.negf %534 : vector<2x32xf32>
    %536 = math.exp %535 : vector<2x32xf32>
    %cst_86 = arith.constant 1.000000e+00 : f32
    %537 = vector.broadcast %cst_86 : f32 to vector<2x32xf32>
    %538 = arith.addf %537, %536 : vector<2x32xf32>
    %539 = arith.divf %537, %538 : vector<2x32xf32>
    %540 = vector.extract_strided_slice %519 {offsets = [0, 64], sizes = [2, 32], strides = [1, 1]} : vector<2x96xf32> to vector<2x32xf32>
    %541 = vector.extract_strided_slice %523 {offsets = [0, 64], sizes = [2, 32], strides = [1, 1]} : vector<2x96xf32> to vector<2x32xf32>
    %542 = arith.mulf %531, %541 : vector<2x32xf32>
    %543 = arith.addf %540, %542 : vector<2x32xf32>
    %544 = math.tanh %543 : vector<2x32xf32>
    %cst_87 = arith.constant 1.000000e+00 : f32
    %545 = vector.broadcast %cst_87 : f32 to vector<2x32xf32>
    %546 = arith.subf %545, %539 : vector<2x32xf32>
    %547 = arith.mulf %546, %544 : vector<2x32xf32>
    %548 = arith.mulf %539, %474 : vector<2x32xf32>
    %549 = arith.addf %547, %548 : vector<2x32xf32>
    %550 = vector.shape_cast %549 : vector<2x32xf32> to vector<2x1x32xf32>
    %551 = vector.shape_cast %550 : vector<2x1x32xf32> to vector<2x1x32xf32>
    %552 = vector.broadcast %551 : vector<2x1x32xf32> to vector<2x8x32xf32>
    %553 = vector.shape_cast %552 : vector<2x8x32xf32> to vector<16x32xf32>
    %c6_i32 = arith.constant 6 : i32
    %554 = vector.broadcast %c6_i32 : i32 to vector<16x1xi32>
    %555 = arith.cmpi eq, %33, %554 : vector<16x1xi32>
    %556 = vector.shape_cast %555 : vector<16x1xi1> to vector<16x1xi1>
    %557 = vector.broadcast %556 : vector<16x1xi1> to vector<16x32xi1>
    %558 = arith.select %557, %553, %483 : vector<16x32xi1>, vector<16x32xf32>
    %559 = vector.extract_strided_slice %7 {offsets = [0, 7, 0], sizes = [2, 1, 96], strides = [1, 1, 1]} : vector<2x8x96xf32> to vector<2x1x96xf32>
    %560 = vector.shape_cast %559 : vector<2x1x96xf32> to vector<2x96xf32>
    %561 = arith.truncf %515 : vector<2x32xf32> to vector<2x32xbf16>
    %cst_88 = arith.constant dense<0.000000e+00> : vector<2x96xf32>
    %562 = tpu.matmul %561, %8, %cst_88 {dimension_numbers = #tpu.dot_dimension_numbers<[1], [0], [0], [1], [0, 0, 1, 1], [], []>} : vector<2x32xbf16>, vector<32x96xbf16>, vector<2x96xf32> -> vector<2x96xf32>
    %563 = vector.broadcast %9 : vector<1x96xf32> to vector<2x96xf32>
    %564 = arith.addf %562, %563 : vector<2x96xf32>
    %565 = vector.extract_strided_slice %560 {offsets = [0, 0], sizes = [2, 32], strides = [1, 1]} : vector<2x96xf32> to vector<2x32xf32>
    %566 = vector.extract_strided_slice %564 {offsets = [0, 0], sizes = [2, 32], strides = [1, 1]} : vector<2x96xf32> to vector<2x32xf32>
    %567 = arith.addf %565, %566 : vector<2x32xf32>
    %568 = arith.negf %567 : vector<2x32xf32>
    %569 = math.exp %568 : vector<2x32xf32>
    %cst_89 = arith.constant 1.000000e+00 : f32
    %570 = vector.broadcast %cst_89 : f32 to vector<2x32xf32>
    %571 = arith.addf %570, %569 : vector<2x32xf32>
    %572 = arith.divf %570, %571 : vector<2x32xf32>
    %573 = vector.extract_strided_slice %560 {offsets = [0, 32], sizes = [2, 32], strides = [1, 1]} : vector<2x96xf32> to vector<2x32xf32>
    %574 = vector.extract_strided_slice %564 {offsets = [0, 32], sizes = [2, 32], strides = [1, 1]} : vector<2x96xf32> to vector<2x32xf32>
    %575 = arith.addf %573, %574 : vector<2x32xf32>
    %576 = arith.negf %575 : vector<2x32xf32>
    %577 = math.exp %576 : vector<2x32xf32>
    %cst_90 = arith.constant 1.000000e+00 : f32
    %578 = vector.broadcast %cst_90 : f32 to vector<2x32xf32>
    %579 = arith.addf %578, %577 : vector<2x32xf32>
    %580 = arith.divf %578, %579 : vector<2x32xf32>
    %581 = vector.extract_strided_slice %560 {offsets = [0, 64], sizes = [2, 32], strides = [1, 1]} : vector<2x96xf32> to vector<2x32xf32>
    %582 = vector.extract_strided_slice %564 {offsets = [0, 64], sizes = [2, 32], strides = [1, 1]} : vector<2x96xf32> to vector<2x32xf32>
    %583 = arith.mulf %572, %582 : vector<2x32xf32>
    %584 = arith.addf %581, %583 : vector<2x32xf32>
    %585 = math.tanh %584 : vector<2x32xf32>
    %cst_91 = arith.constant 1.000000e+00 : f32
    %586 = vector.broadcast %cst_91 : f32 to vector<2x32xf32>
    %587 = arith.subf %586, %580 : vector<2x32xf32>
    %588 = arith.mulf %587, %585 : vector<2x32xf32>
    %589 = arith.mulf %580, %515 : vector<2x32xf32>
    %590 = arith.addf %588, %589 : vector<2x32xf32>
    %591 = arith.truncf %590 : vector<2x32xf32> to vector<2x32xbf16>
    %cst_92 = arith.constant dense<0.000000e+00> : vector<2x96xf32>
    %592 = tpu.matmul %591, %10, %cst_92 {dimension_numbers = #tpu.dot_dimension_numbers<[1], [0], [0], [1], [0, 0, 1, 1], [], []>} : vector<2x32xbf16>, vector<32x96xbf16>, vector<2x96xf32> -> vector<2x96xf32>
    %593 = vector.broadcast %11 : vector<1x96xf32> to vector<2x96xf32>
    %594 = arith.addf %592, %593 : vector<2x96xf32>
    %595 = arith.truncf %549 : vector<2x32xf32> to vector<2x32xbf16>
    %cst_93 = arith.constant dense<0.000000e+00> : vector<2x96xf32>
    %596 = tpu.matmul %595, %12, %cst_93 {dimension_numbers = #tpu.dot_dimension_numbers<[1], [0], [0], [1], [0, 0, 1, 1], [], []>} : vector<2x32xbf16>, vector<32x96xbf16>, vector<2x96xf32> -> vector<2x96xf32>
    %597 = vector.broadcast %13 : vector<1x96xf32> to vector<2x96xf32>
    %598 = arith.addf %596, %597 : vector<2x96xf32>
    %599 = vector.extract_strided_slice %594 {offsets = [0, 0], sizes = [2, 32], strides = [1, 1]} : vector<2x96xf32> to vector<2x32xf32>
    %600 = vector.extract_strided_slice %598 {offsets = [0, 0], sizes = [2, 32], strides = [1, 1]} : vector<2x96xf32> to vector<2x32xf32>
    %601 = arith.addf %599, %600 : vector<2x32xf32>
    %602 = arith.negf %601 : vector<2x32xf32>
    %603 = math.exp %602 : vector<2x32xf32>
    %cst_94 = arith.constant 1.000000e+00 : f32
    %604 = vector.broadcast %cst_94 : f32 to vector<2x32xf32>
    %605 = arith.addf %604, %603 : vector<2x32xf32>
    %606 = arith.divf %604, %605 : vector<2x32xf32>
    %607 = vector.extract_strided_slice %594 {offsets = [0, 32], sizes = [2, 32], strides = [1, 1]} : vector<2x96xf32> to vector<2x32xf32>
    %608 = vector.extract_strided_slice %598 {offsets = [0, 32], sizes = [2, 32], strides = [1, 1]} : vector<2x96xf32> to vector<2x32xf32>
    %609 = arith.addf %607, %608 : vector<2x32xf32>
    %610 = arith.negf %609 : vector<2x32xf32>
    %611 = math.exp %610 : vector<2x32xf32>
    %cst_95 = arith.constant 1.000000e+00 : f32
    %612 = vector.broadcast %cst_95 : f32 to vector<2x32xf32>
    %613 = arith.addf %612, %611 : vector<2x32xf32>
    %614 = arith.divf %612, %613 : vector<2x32xf32>
    %615 = vector.extract_strided_slice %594 {offsets = [0, 64], sizes = [2, 32], strides = [1, 1]} : vector<2x96xf32> to vector<2x32xf32>
    %616 = vector.extract_strided_slice %598 {offsets = [0, 64], sizes = [2, 32], strides = [1, 1]} : vector<2x96xf32> to vector<2x32xf32>
    %617 = arith.mulf %606, %616 : vector<2x32xf32>
    %618 = arith.addf %615, %617 : vector<2x32xf32>
    %619 = math.tanh %618 : vector<2x32xf32>
    %cst_96 = arith.constant 1.000000e+00 : f32
    %620 = vector.broadcast %cst_96 : f32 to vector<2x32xf32>
    %621 = arith.subf %620, %614 : vector<2x32xf32>
    %622 = arith.mulf %621, %619 : vector<2x32xf32>
    %623 = arith.mulf %614, %549 : vector<2x32xf32>
    %624 = arith.addf %622, %623 : vector<2x32xf32>
    %625 = vector.shape_cast %624 : vector<2x32xf32> to vector<2x1x32xf32>
    %626 = vector.shape_cast %625 : vector<2x1x32xf32> to vector<2x1x32xf32>
    %627 = vector.broadcast %626 : vector<2x1x32xf32> to vector<2x8x32xf32>
    %628 = vector.shape_cast %627 : vector<2x8x32xf32> to vector<16x32xf32>
    %c7_i32 = arith.constant 7 : i32
    %629 = vector.broadcast %c7_i32 : i32 to vector<16x1xi32>
    %630 = arith.cmpi eq, %33, %629 : vector<16x1xi32>
    %631 = vector.shape_cast %630 : vector<16x1xi1> to vector<16x1xi1>
    %632 = vector.broadcast %631 : vector<16x1xi1> to vector<16x32xi1>
    %633 = arith.select %632, %628, %558 : vector<16x32xi1>, vector<16x32xf32>
    %c0_97 = arith.constant 0 : index
    %c0_98 = arith.constant 0 : index
    %634 = vector.load %arg2[%c0_97, %c0_98] : memref<16x32xf32, #tpu.memory_space<vmem>>, vector<16x32xf32>
    %635 = arith.addf %633, %634 : vector<16x32xf32>
    %636 = arith.truncf %635 : vector<16x32xf32> to vector<16x32xbf16>
    %c0_99 = arith.constant 0 : index
    %c0_100 = arith.constant 0 : index
    %c0_101 = arith.constant 0 : index
    %637 = vector.load %arg11[%c0_99, %c0_100, %c0_101] : memref<2x32x96xbf16, #tpu.memory_space<vmem>>, vector<1x32x96xbf16>
    %638 = vector.shape_cast %637 : vector<1x32x96xbf16> to vector<32x96xbf16>
    %cst_102 = arith.constant dense<0.000000e+00> : vector<16x96xf32>
    %639 = tpu.matmul %636, %638, %cst_102 {dimension_numbers = #tpu.dot_dimension_numbers<[1], [0], [0], [1], [0, 0, 1, 1], [], []>} : vector<16x32xbf16>, vector<32x96xbf16>, vector<16x96xf32> -> vector<16x96xf32>
    %c0_103 = arith.constant 0 : index
    %c0_104 = arith.constant 0 : index
    %c0_105 = arith.constant 0 : index
    %640 = vector.load %arg12[%c0_103, %c0_104, %c0_105] : memref<2x1x96xf32, #tpu.memory_space<vmem>>, vector<1x1x96xf32>
    %641 = vector.shape_cast %640 : vector<1x1x96xf32> to vector<1x96xf32>
    %642 = vector.broadcast %641 : vector<1x96xf32> to vector<16x96xf32>
    %643 = arith.addf %639, %642 : vector<16x96xf32>
    %644 = vector.extract_strided_slice %643 {offsets = [0, 0], sizes = [16, 32], strides = [1, 1]} : vector<16x96xf32> to vector<16x32xf32>
    %645 = vector.extract_strided_slice %643 {offsets = [0, 32], sizes = [16, 32], strides = [1, 1]} : vector<16x96xf32> to vector<16x32xf32>
    %646 = vector.extract_strided_slice %643 {offsets = [0, 64], sizes = [16, 32], strides = [1, 1]} : vector<16x96xf32> to vector<16x32xf32>
    %647 = vector.extract_strided_slice %644 {offsets = [0, 0], sizes = [16, 8], strides = [1, 1]} : vector<16x32xf32> to vector<16x8xf32>
    %648 = vector.shape_cast %647 : vector<16x8xf32> to vector<2x8x8xf32>
    %649 = vector.extract_strided_slice %644 {offsets = [0, 8], sizes = [16, 8], strides = [1, 1]} : vector<16x32xf32> to vector<16x8xf32>
    %650 = vector.shape_cast %649 : vector<16x8xf32> to vector<2x8x8xf32>
    %651 = vector.extract_strided_slice %644 {offsets = [0, 16], sizes = [16, 8], strides = [1, 1]} : vector<16x32xf32> to vector<16x8xf32>
    %652 = vector.shape_cast %651 : vector<16x8xf32> to vector<2x8x8xf32>
    %653 = vector.extract_strided_slice %644 {offsets = [0, 24], sizes = [16, 8], strides = [1, 1]} : vector<16x32xf32> to vector<16x8xf32>
    %654 = vector.shape_cast %653 : vector<16x8xf32> to vector<2x8x8xf32>
    %655 = tpu.concatenate %648, %650, %652, %654 in 0 : vector<2x8x8xf32>, vector<2x8x8xf32>, vector<2x8x8xf32>, vector<2x8x8xf32> -> vector<8x8x8xf32>
    %656 = arith.truncf %655 : vector<8x8x8xf32> to vector<8x8x8xbf16>
    %657 = vector.extract_strided_slice %645 {offsets = [0, 0], sizes = [16, 8], strides = [1, 1]} : vector<16x32xf32> to vector<16x8xf32>
    %658 = vector.shape_cast %657 : vector<16x8xf32> to vector<2x8x8xf32>
    %659 = vector.extract_strided_slice %645 {offsets = [0, 8], sizes = [16, 8], strides = [1, 1]} : vector<16x32xf32> to vector<16x8xf32>
    %660 = vector.shape_cast %659 : vector<16x8xf32> to vector<2x8x8xf32>
    %661 = vector.extract_strided_slice %645 {offsets = [0, 16], sizes = [16, 8], strides = [1, 1]} : vector<16x32xf32> to vector<16x8xf32>
    %662 = vector.shape_cast %661 : vector<16x8xf32> to vector<2x8x8xf32>
    %663 = vector.extract_strided_slice %645 {offsets = [0, 24], sizes = [16, 8], strides = [1, 1]} : vector<16x32xf32> to vector<16x8xf32>
    %664 = vector.shape_cast %663 : vector<16x8xf32> to vector<2x8x8xf32>
    %665 = tpu.concatenate %658, %660, %662, %664 in 0 : vector<2x8x8xf32>, vector<2x8x8xf32>, vector<2x8x8xf32>, vector<2x8x8xf32> -> vector<8x8x8xf32>
    %666 = arith.truncf %665 : vector<8x8x8xf32> to vector<8x8x8xbf16>
    %667 = vector.extract_strided_slice %646 {offsets = [0, 0], sizes = [16, 8], strides = [1, 1]} : vector<16x32xf32> to vector<16x8xf32>
    %668 = vector.shape_cast %667 : vector<16x8xf32> to vector<2x8x8xf32>
    %669 = vector.extract_strided_slice %646 {offsets = [0, 8], sizes = [16, 8], strides = [1, 1]} : vector<16x32xf32> to vector<16x8xf32>
    %670 = vector.shape_cast %669 : vector<16x8xf32> to vector<2x8x8xf32>
    %671 = vector.extract_strided_slice %646 {offsets = [0, 16], sizes = [16, 8], strides = [1, 1]} : vector<16x32xf32> to vector<16x8xf32>
    %672 = vector.shape_cast %671 : vector<16x8xf32> to vector<2x8x8xf32>
    %673 = vector.extract_strided_slice %646 {offsets = [0, 24], sizes = [16, 8], strides = [1, 1]} : vector<16x32xf32> to vector<16x8xf32>
    %674 = vector.shape_cast %673 : vector<16x8xf32> to vector<2x8x8xf32>
    %675 = tpu.concatenate %668, %670, %672, %674 in 0 : vector<2x8x8xf32>, vector<2x8x8xf32>, vector<2x8x8xf32>, vector<2x8x8xf32> -> vector<8x8x8xf32>
    %676 = arith.truncf %675 : vector<8x8x8xf32> to vector<8x8x8xbf16>
    "tpu.trace_start"() <{level = 10 : i32, message = "bqd,bkd->bqk"}> : () -> ()
    %cst_106 = arith.constant dense<0.000000e+00> : vector<8x8x8xf32>
    %677 = tpu.matmul %656, %666, %cst_106 {dimension_numbers = #tpu.dot_dimension_numbers<[2], [2], [1], [1], [0, 0, 0, 1, 1, 1], [0], [0]>} : vector<8x8x8xbf16>, vector<8x8x8xbf16>, vector<8x8x8xf32> -> vector<8x8x8xf32>
    "tpu.trace_stop"() : () -> ()
    %cst_107 = arith.constant 0.353553385 : f32
    %678 = vector.broadcast %cst_107 : f32 to vector<8x8x8xf32>
    %679 = arith.mulf %677, %678 : vector<8x8x8xf32>
    %cst_108 = arith.constant dense<0xFF800000> : vector<8x8xf32>
    %680 = vector.multi_reduction <maximumf>, %679, %cst_108 [2] : vector<8x8x8xf32> to vector<8x8xf32>
    %681 = vector.shape_cast %680 : vector<8x8xf32> to vector<8x8x1xf32>
    %682 = vector.broadcast %681 : vector<8x8x1xf32> to vector<8x8x8xf32>
    %683 = arith.subf %679, %682 : vector<8x8x8xf32>
    %684 = math.exp %683 : vector<8x8x8xf32>
    %cst_109 = arith.constant dense<0.000000e+00> : vector<8x8xf32>
    %685 = vector.multi_reduction <add>, %684, %cst_109 [2] : vector<8x8x8xf32> to vector<8x8xf32>
    %686 = vector.shape_cast %685 : vector<8x8xf32> to vector<8x8x1xf32>
    %687 = tpu.reciprocal %686 {approx = true} : vector<8x8x1xf32> -> vector<8x8x1xf32>
    %688 = vector.broadcast %687 : vector<8x8x1xf32> to vector<8x8x8xf32>
    %689 = arith.mulf %684, %688 : vector<8x8x8xf32>
    %690 = arith.truncf %689 : vector<8x8x8xf32> to vector<8x8x8xbf16>
    "tpu.trace_start"() <{level = 10 : i32, message = "bqk,bkd->bqd"}> : () -> ()
    %cst_110 = arith.constant dense<0.000000e+00> : vector<8x8x8xf32>
    %691 = tpu.matmul %690, %676, %cst_110 {dimension_numbers = #tpu.dot_dimension_numbers<[2], [1], [1], [2], [0, 0, 0, 1, 1, 2], [0], [0]>} : vector<8x8x8xbf16>, vector<8x8x8xbf16>, vector<8x8x8xf32> -> vector<8x8x8xf32>
    "tpu.trace_stop"() : () -> ()
    %692 = vector.extract_strided_slice %691 {offsets = [0, 0, 0], sizes = [2, 8, 8], strides = [1, 1, 1]} : vector<8x8x8xf32> to vector<2x8x8xf32>
    %693 = vector.shape_cast %692 : vector<2x8x8xf32> to vector<16x8xf32>
    %694 = vector.extract_strided_slice %691 {offsets = [2, 0, 0], sizes = [2, 8, 8], strides = [1, 1, 1]} : vector<8x8x8xf32> to vector<2x8x8xf32>
    %695 = vector.shape_cast %694 : vector<2x8x8xf32> to vector<16x8xf32>
    %696 = vector.extract_strided_slice %691 {offsets = [4, 0, 0], sizes = [2, 8, 8], strides = [1, 1, 1]} : vector<8x8x8xf32> to vector<2x8x8xf32>
    %697 = vector.shape_cast %696 : vector<2x8x8xf32> to vector<16x8xf32>
    %698 = vector.extract_strided_slice %691 {offsets = [6, 0, 0], sizes = [2, 8, 8], strides = [1, 1, 1]} : vector<8x8x8xf32> to vector<2x8x8xf32>
    %699 = vector.shape_cast %698 : vector<2x8x8xf32> to vector<16x8xf32>
    %700 = tpu.concatenate %693, %695, %697, %699 in 1 : vector<16x8xf32>, vector<16x8xf32>, vector<16x8xf32>, vector<16x8xf32> -> vector<16x32xf32>
    %701 = arith.truncf %700 : vector<16x32xf32> to vector<16x32xbf16>
    %c0_111 = arith.constant 0 : index
    %c0_112 = arith.constant 0 : index
    %c0_113 = arith.constant 0 : index
    %702 = vector.load %arg13[%c0_111, %c0_112, %c0_113] : memref<2x32x32xbf16, #tpu.memory_space<vmem>>, vector<1x32x32xbf16>
    %703 = vector.shape_cast %702 : vector<1x32x32xbf16> to vector<32x32xbf16>
    %cst_114 = arith.constant dense<0.000000e+00> : vector<16x32xf32>
    %704 = tpu.matmul %701, %703, %cst_114 {dimension_numbers = #tpu.dot_dimension_numbers<[1], [0], [0], [1], [0, 0, 1, 1], [], []>} : vector<16x32xbf16>, vector<32x32xbf16>, vector<16x32xf32> -> vector<16x32xf32>
    %c0_115 = arith.constant 0 : index
    %c0_116 = arith.constant 0 : index
    %c0_117 = arith.constant 0 : index
    %705 = vector.load %arg14[%c0_115, %c0_116, %c0_117] : memref<2x1x32xf32, #tpu.memory_space<vmem>>, vector<1x1x32xf32>
    %706 = vector.shape_cast %705 : vector<1x1x32xf32> to vector<1x32xf32>
    %707 = vector.broadcast %706 : vector<1x32xf32> to vector<16x32xf32>
    %708 = arith.addf %704, %707 : vector<16x32xf32>
    %709 = arith.addf %635, %708 : vector<16x32xf32>
    %c0_118 = arith.constant 0 : index
    %c0_119 = arith.constant 0 : index
    %c0_120 = arith.constant 0 : index
    %710 = vector.load %arg19[%c0_118, %c0_119, %c0_120] : memref<2x1x32xf32, #tpu.memory_space<vmem>>, vector<1x1x32xf32>
    %711 = vector.shape_cast %710 : vector<1x1x32xf32> to vector<1x32xf32>
    %c0_121 = arith.constant 0 : index
    %c0_122 = arith.constant 0 : index
    %c0_123 = arith.constant 0 : index
    %712 = vector.load %arg20[%c0_121, %c0_122, %c0_123] : memref<2x1x32xf32, #tpu.memory_space<vmem>>, vector<1x1x32xf32>
    %713 = vector.shape_cast %712 : vector<1x1x32xf32> to vector<1x32xf32>
    %cst_124 = arith.constant dense<0.000000e+00> : vector<16xf32>
    %714 = vector.multi_reduction <add>, %709, %cst_124 [1] : vector<16x32xf32> to vector<16xf32>
    %715 = vector.shape_cast %714 : vector<16xf32> to vector<16x1xf32>
    %cst_125 = arith.constant 3.200000e+01 : f32
    %716 = vector.broadcast %cst_125 : f32 to vector<16x1xf32>
    %717 = arith.divf %715, %716 : vector<16x1xf32>
    %718 = vector.broadcast %717 : vector<16x1xf32> to vector<16x32xf32>
    %719 = arith.subf %709, %718 : vector<16x32xf32>
    %720 = arith.mulf %719, %719 : vector<16x32xf32>
    %cst_126 = arith.constant dense<0.000000e+00> : vector<16xf32>
    %721 = vector.multi_reduction <add>, %720, %cst_126 [1] : vector<16x32xf32> to vector<16xf32>
    %722 = vector.shape_cast %721 : vector<16xf32> to vector<16x1xf32>
    %cst_127 = arith.constant 3.200000e+01 : f32
    %723 = vector.broadcast %cst_127 : f32 to vector<16x1xf32>
    %724 = arith.divf %722, %723 : vector<16x1xf32>
    %725 = vector.broadcast %717 : vector<16x1xf32> to vector<16x32xf32>
    %726 = arith.subf %709, %725 : vector<16x32xf32>
    %cst_128 = arith.constant 9.99999974E-6 : f32
    %727 = vector.broadcast %cst_128 : f32 to vector<16x1xf32>
    %728 = arith.addf %724, %727 : vector<16x1xf32>
    %729 = math.rsqrt %728 : vector<16x1xf32>
    %730 = vector.broadcast %729 : vector<16x1xf32> to vector<16x32xf32>
    %731 = arith.mulf %726, %730 : vector<16x32xf32>
    %732 = vector.broadcast %711 : vector<1x32xf32> to vector<16x32xf32>
    %733 = arith.mulf %731, %732 : vector<16x32xf32>
    %734 = vector.broadcast %713 : vector<1x32xf32> to vector<16x32xf32>
    %735 = arith.addf %733, %734 : vector<16x32xf32>
    %736 = arith.truncf %735 : vector<16x32xf32> to vector<16x32xbf16>
    %c0_129 = arith.constant 0 : index
    %c0_130 = arith.constant 0 : index
    %c0_131 = arith.constant 0 : index
    %737 = vector.load %arg15[%c0_129, %c0_130, %c0_131] : memref<2x32x64xbf16, #tpu.memory_space<vmem>>, vector<1x32x64xbf16>
    %738 = vector.shape_cast %737 : vector<1x32x64xbf16> to vector<32x64xbf16>
    %cst_132 = arith.constant dense<0.000000e+00> : vector<16x64xf32>
    %739 = tpu.matmul %736, %738, %cst_132 {dimension_numbers = #tpu.dot_dimension_numbers<[1], [0], [0], [1], [0, 0, 1, 1], [], []>} : vector<16x32xbf16>, vector<32x64xbf16>, vector<16x64xf32> -> vector<16x64xf32>
    %c0_133 = arith.constant 0 : index
    %c0_134 = arith.constant 0 : index
    %c0_135 = arith.constant 0 : index
    %740 = vector.load %arg16[%c0_133, %c0_134, %c0_135] : memref<2x1x64xf32, #tpu.memory_space<vmem>>, vector<1x1x64xf32>
    %741 = vector.shape_cast %740 : vector<1x1x64xf32> to vector<1x64xf32>
    %742 = vector.broadcast %741 : vector<1x64xf32> to vector<16x64xf32>
    %743 = arith.addf %739, %742 : vector<16x64xf32>
    %cst_136 = arith.constant 0.000000e+00 : f32
    %744 = vector.broadcast %cst_136 : f32 to vector<16x64xf32>
    %745 = arith.maximumf %743, %744 : vector<16x64xf32>
    %746 = arith.truncf %745 : vector<16x64xf32> to vector<16x64xbf16>
    %c0_137 = arith.constant 0 : index
    %c0_138 = arith.constant 0 : index
    %c0_139 = arith.constant 0 : index
    %747 = vector.load %arg17[%c0_137, %c0_138, %c0_139] : memref<2x64x32xbf16, #tpu.memory_space<vmem>>, vector<1x64x32xbf16>
    %748 = vector.shape_cast %747 : vector<1x64x32xbf16> to vector<64x32xbf16>
    %cst_140 = arith.constant dense<0.000000e+00> : vector<16x32xf32>
    %749 = tpu.matmul %746, %748, %cst_140 {dimension_numbers = #tpu.dot_dimension_numbers<[1], [0], [0], [1], [0, 0, 1, 1], [], []>} : vector<16x64xbf16>, vector<64x32xbf16>, vector<16x32xf32> -> vector<16x32xf32>
    %c0_141 = arith.constant 0 : index
    %c0_142 = arith.constant 0 : index
    %c0_143 = arith.constant 0 : index
    %750 = vector.load %arg18[%c0_141, %c0_142, %c0_143] : memref<2x1x32xf32, #tpu.memory_space<vmem>>, vector<1x1x32xf32>
    %751 = vector.shape_cast %750 : vector<1x1x32xf32> to vector<1x32xf32>
    %752 = vector.broadcast %751 : vector<1x32xf32> to vector<16x32xf32>
    %753 = arith.addf %749, %752 : vector<16x32xf32>
    %754 = arith.addf %735, %753 : vector<16x32xf32>
    %c0_144 = arith.constant 0 : index
    %c0_145 = arith.constant 0 : index
    %c0_146 = arith.constant 0 : index
    %755 = vector.load %arg21[%c0_144, %c0_145, %c0_146] : memref<2x1x32xf32, #tpu.memory_space<vmem>>, vector<1x1x32xf32>
    %756 = vector.shape_cast %755 : vector<1x1x32xf32> to vector<1x32xf32>
    %c0_147 = arith.constant 0 : index
    %c0_148 = arith.constant 0 : index
    %c0_149 = arith.constant 0 : index
    %757 = vector.load %arg22[%c0_147, %c0_148, %c0_149] : memref<2x1x32xf32, #tpu.memory_space<vmem>>, vector<1x1x32xf32>
    %758 = vector.shape_cast %757 : vector<1x1x32xf32> to vector<1x32xf32>
    %cst_150 = arith.constant dense<0.000000e+00> : vector<16xf32>
    %759 = vector.multi_reduction <add>, %754, %cst_150 [1] : vector<16x32xf32> to vector<16xf32>
    %760 = vector.shape_cast %759 : vector<16xf32> to vector<16x1xf32>
    %cst_151 = arith.constant 3.200000e+01 : f32
    %761 = vector.broadcast %cst_151 : f32 to vector<16x1xf32>
    %762 = arith.divf %760, %761 : vector<16x1xf32>
    %763 = vector.broadcast %762 : vector<16x1xf32> to vector<16x32xf32>
    %764 = arith.subf %754, %763 : vector<16x32xf32>
    %765 = arith.mulf %764, %764 : vector<16x32xf32>
    %cst_152 = arith.constant dense<0.000000e+00> : vector<16xf32>
    %766 = vector.multi_reduction <add>, %765, %cst_152 [1] : vector<16x32xf32> to vector<16xf32>
    %767 = vector.shape_cast %766 : vector<16xf32> to vector<16x1xf32>
    %cst_153 = arith.constant 3.200000e+01 : f32
    %768 = vector.broadcast %cst_153 : f32 to vector<16x1xf32>
    %769 = arith.divf %767, %768 : vector<16x1xf32>
    %770 = vector.broadcast %762 : vector<16x1xf32> to vector<16x32xf32>
    %771 = arith.subf %754, %770 : vector<16x32xf32>
    %cst_154 = arith.constant 9.99999974E-6 : f32
    %772 = vector.broadcast %cst_154 : f32 to vector<16x1xf32>
    %773 = arith.addf %769, %772 : vector<16x1xf32>
    %774 = math.rsqrt %773 : vector<16x1xf32>
    %775 = vector.broadcast %774 : vector<16x1xf32> to vector<16x32xf32>
    %776 = arith.mulf %771, %775 : vector<16x32xf32>
    %777 = vector.broadcast %756 : vector<1x32xf32> to vector<16x32xf32>
    %778 = arith.mulf %776, %777 : vector<16x32xf32>
    %779 = vector.broadcast %758 : vector<1x32xf32> to vector<16x32xf32>
    %780 = arith.addf %778, %779 : vector<16x32xf32>
    %781 = arith.truncf %780 : vector<16x32xf32> to vector<16x32xbf16>
    %c1 = arith.constant 1 : index
    %c0_155 = arith.constant 0 : index
    %c0_156 = arith.constant 0 : index
    %782 = vector.load %arg11[%c1, %c0_155, %c0_156] : memref<2x32x96xbf16, #tpu.memory_space<vmem>>, vector<1x32x96xbf16>
    %783 = vector.shape_cast %782 : vector<1x32x96xbf16> to vector<32x96xbf16>
    %cst_157 = arith.constant dense<0.000000e+00> : vector<16x96xf32>
    %784 = tpu.matmul %781, %783, %cst_157 {dimension_numbers = #tpu.dot_dimension_numbers<[1], [0], [0], [1], [0, 0, 1, 1], [], []>} : vector<16x32xbf16>, vector<32x96xbf16>, vector<16x96xf32> -> vector<16x96xf32>
    %c1_158 = arith.constant 1 : index
    %c0_159 = arith.constant 0 : index
    %c0_160 = arith.constant 0 : index
    %785 = vector.load %arg12[%c1_158, %c0_159, %c0_160] : memref<2x1x96xf32, #tpu.memory_space<vmem>>, vector<1x1x96xf32>
    %786 = vector.shape_cast %785 : vector<1x1x96xf32> to vector<1x96xf32>
    %787 = vector.broadcast %786 : vector<1x96xf32> to vector<16x96xf32>
    %788 = arith.addf %784, %787 : vector<16x96xf32>
    %789 = vector.extract_strided_slice %788 {offsets = [0, 0], sizes = [16, 32], strides = [1, 1]} : vector<16x96xf32> to vector<16x32xf32>
    %790 = vector.extract_strided_slice %788 {offsets = [0, 32], sizes = [16, 32], strides = [1, 1]} : vector<16x96xf32> to vector<16x32xf32>
    %791 = vector.extract_strided_slice %788 {offsets = [0, 64], sizes = [16, 32], strides = [1, 1]} : vector<16x96xf32> to vector<16x32xf32>
    %792 = vector.extract_strided_slice %789 {offsets = [0, 0], sizes = [16, 8], strides = [1, 1]} : vector<16x32xf32> to vector<16x8xf32>
    %793 = vector.shape_cast %792 : vector<16x8xf32> to vector<2x8x8xf32>
    %794 = vector.extract_strided_slice %789 {offsets = [0, 8], sizes = [16, 8], strides = [1, 1]} : vector<16x32xf32> to vector<16x8xf32>
    %795 = vector.shape_cast %794 : vector<16x8xf32> to vector<2x8x8xf32>
    %796 = vector.extract_strided_slice %789 {offsets = [0, 16], sizes = [16, 8], strides = [1, 1]} : vector<16x32xf32> to vector<16x8xf32>
    %797 = vector.shape_cast %796 : vector<16x8xf32> to vector<2x8x8xf32>
    %798 = vector.extract_strided_slice %789 {offsets = [0, 24], sizes = [16, 8], strides = [1, 1]} : vector<16x32xf32> to vector<16x8xf32>
    %799 = vector.shape_cast %798 : vector<16x8xf32> to vector<2x8x8xf32>
    %800 = tpu.concatenate %793, %795, %797, %799 in 0 : vector<2x8x8xf32>, vector<2x8x8xf32>, vector<2x8x8xf32>, vector<2x8x8xf32> -> vector<8x8x8xf32>
    %801 = arith.truncf %800 : vector<8x8x8xf32> to vector<8x8x8xbf16>
    %802 = vector.extract_strided_slice %790 {offsets = [0, 0], sizes = [16, 8], strides = [1, 1]} : vector<16x32xf32> to vector<16x8xf32>
    %803 = vector.shape_cast %802 : vector<16x8xf32> to vector<2x8x8xf32>
    %804 = vector.extract_strided_slice %790 {offsets = [0, 8], sizes = [16, 8], strides = [1, 1]} : vector<16x32xf32> to vector<16x8xf32>
    %805 = vector.shape_cast %804 : vector<16x8xf32> to vector<2x8x8xf32>
    %806 = vector.extract_strided_slice %790 {offsets = [0, 16], sizes = [16, 8], strides = [1, 1]} : vector<16x32xf32> to vector<16x8xf32>
    %807 = vector.shape_cast %806 : vector<16x8xf32> to vector<2x8x8xf32>
    %808 = vector.extract_strided_slice %790 {offsets = [0, 24], sizes = [16, 8], strides = [1, 1]} : vector<16x32xf32> to vector<16x8xf32>
    %809 = vector.shape_cast %808 : vector<16x8xf32> to vector<2x8x8xf32>
    %810 = tpu.concatenate %803, %805, %807, %809 in 0 : vector<2x8x8xf32>, vector<2x8x8xf32>, vector<2x8x8xf32>, vector<2x8x8xf32> -> vector<8x8x8xf32>
    %811 = arith.truncf %810 : vector<8x8x8xf32> to vector<8x8x8xbf16>
    %812 = vector.extract_strided_slice %791 {offsets = [0, 0], sizes = [16, 8], strides = [1, 1]} : vector<16x32xf32> to vector<16x8xf32>
    %813 = vector.shape_cast %812 : vector<16x8xf32> to vector<2x8x8xf32>
    %814 = vector.extract_strided_slice %791 {offsets = [0, 8], sizes = [16, 8], strides = [1, 1]} : vector<16x32xf32> to vector<16x8xf32>
    %815 = vector.shape_cast %814 : vector<16x8xf32> to vector<2x8x8xf32>
    %816 = vector.extract_strided_slice %791 {offsets = [0, 16], sizes = [16, 8], strides = [1, 1]} : vector<16x32xf32> to vector<16x8xf32>
    %817 = vector.shape_cast %816 : vector<16x8xf32> to vector<2x8x8xf32>
    %818 = vector.extract_strided_slice %791 {offsets = [0, 24], sizes = [16, 8], strides = [1, 1]} : vector<16x32xf32> to vector<16x8xf32>
    %819 = vector.shape_cast %818 : vector<16x8xf32> to vector<2x8x8xf32>
    %820 = tpu.concatenate %813, %815, %817, %819 in 0 : vector<2x8x8xf32>, vector<2x8x8xf32>, vector<2x8x8xf32>, vector<2x8x8xf32> -> vector<8x8x8xf32>
    %821 = arith.truncf %820 : vector<8x8x8xf32> to vector<8x8x8xbf16>
    "tpu.trace_start"() <{level = 10 : i32, message = "bqd,bkd->bqk"}> : () -> ()
    %cst_161 = arith.constant dense<0.000000e+00> : vector<8x8x8xf32>
    %822 = tpu.matmul %801, %811, %cst_161 {dimension_numbers = #tpu.dot_dimension_numbers<[2], [2], [1], [1], [0, 0, 0, 1, 1, 1], [0], [0]>} : vector<8x8x8xbf16>, vector<8x8x8xbf16>, vector<8x8x8xf32> -> vector<8x8x8xf32>
    "tpu.trace_stop"() : () -> ()
    %cst_162 = arith.constant 0.353553385 : f32
    %823 = vector.broadcast %cst_162 : f32 to vector<8x8x8xf32>
    %824 = arith.mulf %822, %823 : vector<8x8x8xf32>
    %cst_163 = arith.constant dense<0xFF800000> : vector<8x8xf32>
    %825 = vector.multi_reduction <maximumf>, %824, %cst_163 [2] : vector<8x8x8xf32> to vector<8x8xf32>
    %826 = vector.shape_cast %825 : vector<8x8xf32> to vector<8x8x1xf32>
    %827 = vector.broadcast %826 : vector<8x8x1xf32> to vector<8x8x8xf32>
    %828 = arith.subf %824, %827 : vector<8x8x8xf32>
    %829 = math.exp %828 : vector<8x8x8xf32>
    %cst_164 = arith.constant dense<0.000000e+00> : vector<8x8xf32>
    %830 = vector.multi_reduction <add>, %829, %cst_164 [2] : vector<8x8x8xf32> to vector<8x8xf32>
    %831 = vector.shape_cast %830 : vector<8x8xf32> to vector<8x8x1xf32>
    %832 = tpu.reciprocal %831 {approx = true} : vector<8x8x1xf32> -> vector<8x8x1xf32>
    %833 = vector.broadcast %832 : vector<8x8x1xf32> to vector<8x8x8xf32>
    %834 = arith.mulf %829, %833 : vector<8x8x8xf32>
    %835 = arith.truncf %834 : vector<8x8x8xf32> to vector<8x8x8xbf16>
    "tpu.trace_start"() <{level = 10 : i32, message = "bqk,bkd->bqd"}> : () -> ()
    %cst_165 = arith.constant dense<0.000000e+00> : vector<8x8x8xf32>
    %836 = tpu.matmul %835, %821, %cst_165 {dimension_numbers = #tpu.dot_dimension_numbers<[2], [1], [1], [2], [0, 0, 0, 1, 1, 2], [0], [0]>} : vector<8x8x8xbf16>, vector<8x8x8xbf16>, vector<8x8x8xf32> -> vector<8x8x8xf32>
    "tpu.trace_stop"() : () -> ()
    %837 = vector.extract_strided_slice %836 {offsets = [0, 0, 0], sizes = [2, 8, 8], strides = [1, 1, 1]} : vector<8x8x8xf32> to vector<2x8x8xf32>
    %838 = vector.shape_cast %837 : vector<2x8x8xf32> to vector<16x8xf32>
    %839 = vector.extract_strided_slice %836 {offsets = [2, 0, 0], sizes = [2, 8, 8], strides = [1, 1, 1]} : vector<8x8x8xf32> to vector<2x8x8xf32>
    %840 = vector.shape_cast %839 : vector<2x8x8xf32> to vector<16x8xf32>
    %841 = vector.extract_strided_slice %836 {offsets = [4, 0, 0], sizes = [2, 8, 8], strides = [1, 1, 1]} : vector<8x8x8xf32> to vector<2x8x8xf32>
    %842 = vector.shape_cast %841 : vector<2x8x8xf32> to vector<16x8xf32>
    %843 = vector.extract_strided_slice %836 {offsets = [6, 0, 0], sizes = [2, 8, 8], strides = [1, 1, 1]} : vector<8x8x8xf32> to vector<2x8x8xf32>
    %844 = vector.shape_cast %843 : vector<2x8x8xf32> to vector<16x8xf32>
    %845 = tpu.concatenate %838, %840, %842, %844 in 1 : vector<16x8xf32>, vector<16x8xf32>, vector<16x8xf32>, vector<16x8xf32> -> vector<16x32xf32>
    %846 = arith.truncf %845 : vector<16x32xf32> to vector<16x32xbf16>
    %c1_166 = arith.constant 1 : index
    %c0_167 = arith.constant 0 : index
    %c0_168 = arith.constant 0 : index
    %847 = vector.load %arg13[%c1_166, %c0_167, %c0_168] : memref<2x32x32xbf16, #tpu.memory_space<vmem>>, vector<1x32x32xbf16>
    %848 = vector.shape_cast %847 : vector<1x32x32xbf16> to vector<32x32xbf16>
    %cst_169 = arith.constant dense<0.000000e+00> : vector<16x32xf32>
    %849 = tpu.matmul %846, %848, %cst_169 {dimension_numbers = #tpu.dot_dimension_numbers<[1], [0], [0], [1], [0, 0, 1, 1], [], []>} : vector<16x32xbf16>, vector<32x32xbf16>, vector<16x32xf32> -> vector<16x32xf32>
    %c1_170 = arith.constant 1 : index
    %c0_171 = arith.constant 0 : index
    %c0_172 = arith.constant 0 : index
    %850 = vector.load %arg14[%c1_170, %c0_171, %c0_172] : memref<2x1x32xf32, #tpu.memory_space<vmem>>, vector<1x1x32xf32>
    %851 = vector.shape_cast %850 : vector<1x1x32xf32> to vector<1x32xf32>
    %852 = vector.broadcast %851 : vector<1x32xf32> to vector<16x32xf32>
    %853 = arith.addf %849, %852 : vector<16x32xf32>
    %854 = arith.addf %780, %853 : vector<16x32xf32>
    %c1_173 = arith.constant 1 : index
    %c0_174 = arith.constant 0 : index
    %c0_175 = arith.constant 0 : index
    %855 = vector.load %arg19[%c1_173, %c0_174, %c0_175] : memref<2x1x32xf32, #tpu.memory_space<vmem>>, vector<1x1x32xf32>
    %856 = vector.shape_cast %855 : vector<1x1x32xf32> to vector<1x32xf32>
    %c1_176 = arith.constant 1 : index
    %c0_177 = arith.constant 0 : index
    %c0_178 = arith.constant 0 : index
    %857 = vector.load %arg20[%c1_176, %c0_177, %c0_178] : memref<2x1x32xf32, #tpu.memory_space<vmem>>, vector<1x1x32xf32>
    %858 = vector.shape_cast %857 : vector<1x1x32xf32> to vector<1x32xf32>
    %cst_179 = arith.constant dense<0.000000e+00> : vector<16xf32>
    %859 = vector.multi_reduction <add>, %854, %cst_179 [1] : vector<16x32xf32> to vector<16xf32>
    %860 = vector.shape_cast %859 : vector<16xf32> to vector<16x1xf32>
    %cst_180 = arith.constant 3.200000e+01 : f32
    %861 = vector.broadcast %cst_180 : f32 to vector<16x1xf32>
    %862 = arith.divf %860, %861 : vector<16x1xf32>
    %863 = vector.broadcast %862 : vector<16x1xf32> to vector<16x32xf32>
    %864 = arith.subf %854, %863 : vector<16x32xf32>
    %865 = arith.mulf %864, %864 : vector<16x32xf32>
    %cst_181 = arith.constant dense<0.000000e+00> : vector<16xf32>
    %866 = vector.multi_reduction <add>, %865, %cst_181 [1] : vector<16x32xf32> to vector<16xf32>
    %867 = vector.shape_cast %866 : vector<16xf32> to vector<16x1xf32>
    %cst_182 = arith.constant 3.200000e+01 : f32
    %868 = vector.broadcast %cst_182 : f32 to vector<16x1xf32>
    %869 = arith.divf %867, %868 : vector<16x1xf32>
    %870 = vector.broadcast %862 : vector<16x1xf32> to vector<16x32xf32>
    %871 = arith.subf %854, %870 : vector<16x32xf32>
    %cst_183 = arith.constant 9.99999974E-6 : f32
    %872 = vector.broadcast %cst_183 : f32 to vector<16x1xf32>
    %873 = arith.addf %869, %872 : vector<16x1xf32>
    %874 = math.rsqrt %873 : vector<16x1xf32>
    %875 = vector.broadcast %874 : vector<16x1xf32> to vector<16x32xf32>
    %876 = arith.mulf %871, %875 : vector<16x32xf32>
    %877 = vector.broadcast %856 : vector<1x32xf32> to vector<16x32xf32>
    %878 = arith.mulf %876, %877 : vector<16x32xf32>
    %879 = vector.broadcast %858 : vector<1x32xf32> to vector<16x32xf32>
    %880 = arith.addf %878, %879 : vector<16x32xf32>
    %881 = arith.truncf %880 : vector<16x32xf32> to vector<16x32xbf16>
    %c1_184 = arith.constant 1 : index
    %c0_185 = arith.constant 0 : index
    %c0_186 = arith.constant 0 : index
    %882 = vector.load %arg15[%c1_184, %c0_185, %c0_186] : memref<2x32x64xbf16, #tpu.memory_space<vmem>>, vector<1x32x64xbf16>
    %883 = vector.shape_cast %882 : vector<1x32x64xbf16> to vector<32x64xbf16>
    %cst_187 = arith.constant dense<0.000000e+00> : vector<16x64xf32>
    %884 = tpu.matmul %881, %883, %cst_187 {dimension_numbers = #tpu.dot_dimension_numbers<[1], [0], [0], [1], [0, 0, 1, 1], [], []>} : vector<16x32xbf16>, vector<32x64xbf16>, vector<16x64xf32> -> vector<16x64xf32>
    %c1_188 = arith.constant 1 : index
    %c0_189 = arith.constant 0 : index
    %c0_190 = arith.constant 0 : index
    %885 = vector.load %arg16[%c1_188, %c0_189, %c0_190] : memref<2x1x64xf32, #tpu.memory_space<vmem>>, vector<1x1x64xf32>
    %886 = vector.shape_cast %885 : vector<1x1x64xf32> to vector<1x64xf32>
    %887 = vector.broadcast %886 : vector<1x64xf32> to vector<16x64xf32>
    %888 = arith.addf %884, %887 : vector<16x64xf32>
    %cst_191 = arith.constant 0.000000e+00 : f32
    %889 = vector.broadcast %cst_191 : f32 to vector<16x64xf32>
    %890 = arith.maximumf %888, %889 : vector<16x64xf32>
    %891 = arith.truncf %890 : vector<16x64xf32> to vector<16x64xbf16>
    %c1_192 = arith.constant 1 : index
    %c0_193 = arith.constant 0 : index
    %c0_194 = arith.constant 0 : index
    %892 = vector.load %arg17[%c1_192, %c0_193, %c0_194] : memref<2x64x32xbf16, #tpu.memory_space<vmem>>, vector<1x64x32xbf16>
    %893 = vector.shape_cast %892 : vector<1x64x32xbf16> to vector<64x32xbf16>
    %cst_195 = arith.constant dense<0.000000e+00> : vector<16x32xf32>
    %894 = tpu.matmul %891, %893, %cst_195 {dimension_numbers = #tpu.dot_dimension_numbers<[1], [0], [0], [1], [0, 0, 1, 1], [], []>} : vector<16x64xbf16>, vector<64x32xbf16>, vector<16x32xf32> -> vector<16x32xf32>
    %c1_196 = arith.constant 1 : index
    %c0_197 = arith.constant 0 : index
    %c0_198 = arith.constant 0 : index
    %895 = vector.load %arg18[%c1_196, %c0_197, %c0_198] : memref<2x1x32xf32, #tpu.memory_space<vmem>>, vector<1x1x32xf32>
    %896 = vector.shape_cast %895 : vector<1x1x32xf32> to vector<1x32xf32>
    %897 = vector.broadcast %896 : vector<1x32xf32> to vector<16x32xf32>
    %898 = arith.addf %894, %897 : vector<16x32xf32>
    %899 = arith.addf %880, %898 : vector<16x32xf32>
    %c1_199 = arith.constant 1 : index
    %c0_200 = arith.constant 0 : index
    %c0_201 = arith.constant 0 : index
    %900 = vector.load %arg21[%c1_199, %c0_200, %c0_201] : memref<2x1x32xf32, #tpu.memory_space<vmem>>, vector<1x1x32xf32>
    %901 = vector.shape_cast %900 : vector<1x1x32xf32> to vector<1x32xf32>
    %c1_202 = arith.constant 1 : index
    %c0_203 = arith.constant 0 : index
    %c0_204 = arith.constant 0 : index
    %902 = vector.load %arg22[%c1_202, %c0_203, %c0_204] : memref<2x1x32xf32, #tpu.memory_space<vmem>>, vector<1x1x32xf32>
    %903 = vector.shape_cast %902 : vector<1x1x32xf32> to vector<1x32xf32>
    %cst_205 = arith.constant dense<0.000000e+00> : vector<16xf32>
    %904 = vector.multi_reduction <add>, %899, %cst_205 [1] : vector<16x32xf32> to vector<16xf32>
    %905 = vector.shape_cast %904 : vector<16xf32> to vector<16x1xf32>
    %cst_206 = arith.constant 3.200000e+01 : f32
    %906 = vector.broadcast %cst_206 : f32 to vector<16x1xf32>
    %907 = arith.divf %905, %906 : vector<16x1xf32>
    %908 = vector.broadcast %907 : vector<16x1xf32> to vector<16x32xf32>
    %909 = arith.subf %899, %908 : vector<16x32xf32>
    %910 = arith.mulf %909, %909 : vector<16x32xf32>
    %cst_207 = arith.constant dense<0.000000e+00> : vector<16xf32>
    %911 = vector.multi_reduction <add>, %910, %cst_207 [1] : vector<16x32xf32> to vector<16xf32>
    %912 = vector.shape_cast %911 : vector<16xf32> to vector<16x1xf32>
    %cst_208 = arith.constant 3.200000e+01 : f32
    %913 = vector.broadcast %cst_208 : f32 to vector<16x1xf32>
    %914 = arith.divf %912, %913 : vector<16x1xf32>
    %915 = vector.broadcast %907 : vector<16x1xf32> to vector<16x32xf32>
    %916 = arith.subf %899, %915 : vector<16x32xf32>
    %cst_209 = arith.constant 9.99999974E-6 : f32
    %917 = vector.broadcast %cst_209 : f32 to vector<16x1xf32>
    %918 = arith.addf %914, %917 : vector<16x1xf32>
    %919 = math.rsqrt %918 : vector<16x1xf32>
    %920 = vector.broadcast %919 : vector<16x1xf32> to vector<16x32xf32>
    %921 = arith.mulf %916, %920 : vector<16x32xf32>
    %922 = vector.broadcast %901 : vector<1x32xf32> to vector<16x32xf32>
    %923 = arith.mulf %921, %922 : vector<16x32xf32>
    %924 = vector.broadcast %903 : vector<1x32xf32> to vector<16x32xf32>
    %925 = arith.addf %923, %924 : vector<16x32xf32>
    %c0_210 = arith.constant 0 : index
    %c0_211 = arith.constant 0 : index
    %926 = vector.load %arg23[%c0_210, %c0_211] : memref<1x32xf32, #tpu.memory_space<vmem>>, vector<1x32xf32>
    %c0_212 = arith.constant 0 : index
    %c0_213 = arith.constant 0 : index
    %927 = vector.load %arg24[%c0_212, %c0_213] : memref<1x32xf32, #tpu.memory_space<vmem>>, vector<1x32xf32>
    %cst_214 = arith.constant dense<0.000000e+00> : vector<16xf32>
    %928 = vector.multi_reduction <add>, %925, %cst_214 [1] : vector<16x32xf32> to vector<16xf32>
    %929 = vector.shape_cast %928 : vector<16xf32> to vector<16x1xf32>
    %cst_215 = arith.constant 3.200000e+01 : f32
    %930 = vector.broadcast %cst_215 : f32 to vector<16x1xf32>
    %931 = arith.divf %929, %930 : vector<16x1xf32>
    %932 = vector.broadcast %931 : vector<16x1xf32> to vector<16x32xf32>
    %933 = arith.subf %925, %932 : vector<16x32xf32>
    %934 = arith.mulf %933, %933 : vector<16x32xf32>
    %cst_216 = arith.constant dense<0.000000e+00> : vector<16xf32>
    %935 = vector.multi_reduction <add>, %934, %cst_216 [1] : vector<16x32xf32> to vector<16xf32>
    %936 = vector.shape_cast %935 : vector<16xf32> to vector<16x1xf32>
    %cst_217 = arith.constant 3.200000e+01 : f32
    %937 = vector.broadcast %cst_217 : f32 to vector<16x1xf32>
    %938 = arith.divf %936, %937 : vector<16x1xf32>
    %939 = vector.broadcast %931 : vector<16x1xf32> to vector<16x32xf32>
    %940 = arith.subf %925, %939 : vector<16x32xf32>
    %cst_218 = arith.constant 9.99999974E-6 : f32
    %941 = vector.broadcast %cst_218 : f32 to vector<16x1xf32>
    %942 = arith.addf %938, %941 : vector<16x1xf32>
    %943 = math.rsqrt %942 : vector<16x1xf32>
    %944 = vector.broadcast %943 : vector<16x1xf32> to vector<16x32xf32>
    %945 = arith.mulf %940, %944 : vector<16x32xf32>
    %946 = vector.broadcast %926 : vector<1x32xf32> to vector<16x32xf32>
    %947 = arith.mulf %945, %946 : vector<16x32xf32>
    %948 = vector.broadcast %927 : vector<1x32xf32> to vector<16x32xf32>
    %949 = arith.addf %947, %948 : vector<16x32xf32>
    %950 = vector.shape_cast %949 : vector<16x32xf32> to vector<2x8x32xf32>
    %951 = vector.extract_strided_slice %950 {offsets = [0, 0, 0], sizes = [2, 1, 32], strides = [1, 1, 1]} : vector<2x8x32xf32> to vector<2x1x32xf32>
    %952 = vector.shape_cast %951 : vector<2x1x32xf32> to vector<2x32xf32>
    %953 = vector.extract_strided_slice %950 {offsets = [0, 1, 0], sizes = [2, 1, 32], strides = [1, 1, 1]} : vector<2x8x32xf32> to vector<2x1x32xf32>
    %954 = vector.shape_cast %953 : vector<2x1x32xf32> to vector<2x32xf32>
    %955 = vector.extract_strided_slice %950 {offsets = [0, 2, 0], sizes = [2, 1, 32], strides = [1, 1, 1]} : vector<2x8x32xf32> to vector<2x1x32xf32>
    %956 = vector.shape_cast %955 : vector<2x1x32xf32> to vector<2x32xf32>
    %957 = vector.extract_strided_slice %950 {offsets = [0, 3, 0], sizes = [2, 1, 32], strides = [1, 1, 1]} : vector<2x8x32xf32> to vector<2x1x32xf32>
    %958 = vector.shape_cast %957 : vector<2x1x32xf32> to vector<2x32xf32>
    %959 = vector.extract_strided_slice %950 {offsets = [0, 4, 0], sizes = [2, 1, 32], strides = [1, 1, 1]} : vector<2x8x32xf32> to vector<2x1x32xf32>
    %960 = vector.shape_cast %959 : vector<2x1x32xf32> to vector<2x32xf32>
    %961 = vector.extract_strided_slice %950 {offsets = [0, 5, 0], sizes = [2, 1, 32], strides = [1, 1, 1]} : vector<2x8x32xf32> to vector<2x1x32xf32>
    %962 = vector.shape_cast %961 : vector<2x1x32xf32> to vector<2x32xf32>
    %963 = vector.extract_strided_slice %950 {offsets = [0, 6, 0], sizes = [2, 1, 32], strides = [1, 1, 1]} : vector<2x8x32xf32> to vector<2x1x32xf32>
    %964 = vector.shape_cast %963 : vector<2x1x32xf32> to vector<2x32xf32>
    %965 = vector.extract_strided_slice %950 {offsets = [0, 7, 0], sizes = [2, 1, 32], strides = [1, 1, 1]} : vector<2x8x32xf32> to vector<2x1x32xf32>
    %966 = vector.shape_cast %965 : vector<2x1x32xf32> to vector<2x32xf32>
    %967 = tpu.concatenate %952, %954, %956, %958, %960, %962, %964, %966 in 1 : vector<2x32xf32>, vector<2x32xf32>, vector<2x32xf32>, vector<2x32xf32>, vector<2x32xf32>, vector<2x32xf32>, vector<2x32xf32>, vector<2x32xf32> -> vector<2x256xf32>
    %c0_219 = arith.constant 0 : index
    %c0_220 = arith.constant 0 : index
    %968 = vector.load %arg25[%c0_219, %c0_220] : memref<2x256xf32, #tpu.memory_space<vmem>>, vector<2x256xf32>
    tpu.vector_store %arg25[%c0_219, %c0_220], %967 {strides = array<i32>} : memref<2x256xf32, #tpu.memory_space<vmem>>, vector<2x256xf32>,
    return
  }
  func.func @transform_0(%arg0: i32) -> (i32, i32) {
    %c0_i32 = arith.constant 0 : i32
    %c0_i32_0 = arith.constant 0 : i32
    %c0_i32_1 = arith.constant 0 : i32
    return %c0_i32, %c0_i32_0 : i32, i32
  }
  func.func @transform_1(%arg0: i32) -> (i32, i32) {
    %c0_i32 = arith.constant 0 : i32
    %c0_i32_0 = arith.constant 0 : i32
    %c0_i32_1 = arith.constant 0 : i32
    return %c0_i32, %c0_i32_0 : i32, i32
  }
  func.func @transform_2(%arg0: i32) -> (i32, i32) {
    %c0_i32 = arith.constant 0 : i32
    %c0_i32_0 = arith.constant 0 : i32
    %c0_i32_1 = arith.constant 0 : i32
    return %c0_i32, %c0_i32_0 : i32, i32
  }
  func.func @transform_3(%arg0: i32) -> (i32, i32) {
    %c0_i32 = arith.constant 0 : i32
    %c0_i32_0 = arith.constant 0 : i32
    %c0_i32_1 = arith.constant 0 : i32
    return %c0_i32, %c0_i32_0 : i32, i32
  }
  func.func @transform_4(%arg0: i32) -> (i32, i32) {
    %c0_i32 = arith.constant 0 : i32
    %c0_i32_0 = arith.constant 0 : i32
    %c0_i32_1 = arith.constant 0 : i32
    return %c0_i32, %c0_i32_0 : i32, i32
  }
  func.func @transform_5(%arg0: i32) -> (i32, i32) {
    %c0_i32 = arith.constant 0 : i32
    %c0_i32_0 = arith.constant 0 : i32
    %c0_i32_1 = arith.constant 0 : i32
    return %c0_i32, %c0_i32_0 : i32, i32
  }
  func.func @transform_6(%arg0: i32) -> (i32, i32) {
    %c0_i32 = arith.constant 0 : i32
    %c0_i32_0 = arith.constant 0 : i32
    %c0_i32_1 = arith.constant 0 : i32
    return %c0_i32, %c0_i32_0 : i32, i32
  }
  func.func @transform_7(%arg0: i32) -> (i32, i32) {
    %c0_i32 = arith.constant 0 : i32
    %c0_i32_0 = arith.constant 0 : i32
    %c0_i32_1 = arith.constant 0 : i32
    return %c0_i32, %c0_i32_0 : i32, i32
  }
  func.func @transform_8(%arg0: i32) -> (i32, i32) {
    %c0_i32 = arith.constant 0 : i32
    %c0_i32_0 = arith.constant 0 : i32
    %c0_i32_1 = arith.constant 0 : i32
    return %c0_i32, %c0_i32_0 : i32, i32
  }
  func.func @transform_9(%arg0: i32) -> (i32, i32) {
    %c0_i32 = arith.constant 0 : i32
    %c0_i32_0 = arith.constant 0 : i32
    %c0_i32_1 = arith.constant 0 : i32
    return %c0_i32, %c0_i32_0 : i32, i32
  }
  func.func @transform_10(%arg0: i32) -> (i32, i32, i32) {
    %c0_i32 = arith.constant 0 : i32
    %c0_i32_0 = arith.constant 0 : i32
    %c0_i32_1 = arith.constant 0 : i32
    %c0_i32_2 = arith.constant 0 : i32
    return %c0_i32, %c0_i32_0, %c0_i32_1 : i32, i32, i32
  }
  func.func @transform_11(%arg0: i32) -> (i32, i32, i32) {
    %c0_i32 = arith.constant 0 : i32
    %c0_i32_0 = arith.constant 0 : i32
    %c0_i32_1 = arith.constant 0 : i32
    %c0_i32_2 = arith.constant 0 : i32
    return %c0_i32, %c0_i32_0, %c0_i32_1 : i32, i32, i32
  }
  func.func @transform_12(%arg0: i32) -> (i32, i32, i32) {
    %c0_i32 = arith.constant 0 : i32
    %c0_i32_0 = arith.constant 0 : i32
    %c0_i32_1 = arith.constant 0 : i32
    %c0_i32_2 = arith.constant 0 : i32
    return %c0_i32, %c0_i32_0, %c0_i32_1 : i32, i32, i32
  }
  func.func @transform_13(%arg0: i32) -> (i32, i32, i32) {
    %c0_i32 = arith.constant 0 : i32
    %c0_i32_0 = arith.constant 0 : i32
    %c0_i32_1 = arith.constant 0 : i32
    %c0_i32_2 = arith.constant 0 : i32
    return %c0_i32, %c0_i32_0, %c0_i32_1 : i32, i32, i32
  }
  func.func @transform_14(%arg0: i32) -> (i32, i32, i32) {
    %c0_i32 = arith.constant 0 : i32
    %c0_i32_0 = arith.constant 0 : i32
    %c0_i32_1 = arith.constant 0 : i32
    %c0_i32_2 = arith.constant 0 : i32
    return %c0_i32, %c0_i32_0, %c0_i32_1 : i32, i32, i32
  }
  func.func @transform_15(%arg0: i32) -> (i32, i32, i32) {
    %c0_i32 = arith.constant 0 : i32
    %c0_i32_0 = arith.constant 0 : i32
    %c0_i32_1 = arith.constant 0 : i32
    %c0_i32_2 = arith.constant 0 : i32
    return %c0_i32, %c0_i32_0, %c0_i32_1 : i32, i32, i32
  }
  func.func @transform_16(%arg0: i32) -> (i32, i32, i32) {
    %c0_i32 = arith.constant 0 : i32
    %c0_i32_0 = arith.constant 0 : i32
    %c0_i32_1 = arith.constant 0 : i32
    %c0_i32_2 = arith.constant 0 : i32
    return %c0_i32, %c0_i32_0, %c0_i32_1 : i32, i32, i32
  }
  func.func @transform_17(%arg0: i32) -> (i32, i32, i32) {
    %c0_i32 = arith.constant 0 : i32
    %c0_i32_0 = arith.constant 0 : i32
    %c0_i32_1 = arith.constant 0 : i32
    %c0_i32_2 = arith.constant 0 : i32
    return %c0_i32, %c0_i32_0, %c0_i32_1 : i32, i32, i32
  }
  func.func @transform_18(%arg0: i32) -> (i32, i32, i32) {
    %c0_i32 = arith.constant 0 : i32
    %c0_i32_0 = arith.constant 0 : i32
    %c0_i32_1 = arith.constant 0 : i32
    %c0_i32_2 = arith.constant 0 : i32
    return %c0_i32, %c0_i32_0, %c0_i32_1 : i32, i32, i32
  }
  func.func @transform_19(%arg0: i32) -> (i32, i32, i32) {
    %c0_i32 = arith.constant 0 : i32
    %c0_i32_0 = arith.constant 0 : i32
    %c0_i32_1 = arith.constant 0 : i32
    %c0_i32_2 = arith.constant 0 : i32
    return %c0_i32, %c0_i32_0, %c0_i32_1 : i32, i32, i32
  }
  func.func @transform_20(%arg0: i32) -> (i32, i32, i32) {
    %c0_i32 = arith.constant 0 : i32
    %c0_i32_0 = arith.constant 0 : i32
    %c0_i32_1 = arith.constant 0 : i32
    %c0_i32_2 = arith.constant 0 : i32
    return %c0_i32, %c0_i32_0, %c0_i32_1 : i32, i32, i32
  }
  func.func @transform_21(%arg0: i32) -> (i32, i32, i32) {
    %c0_i32 = arith.constant 0 : i32
    %c0_i32_0 = arith.constant 0 : i32
    %c0_i32_1 = arith.constant 0 : i32
    %c0_i32_2 = arith.constant 0 : i32
    return %c0_i32, %c0_i32_0, %c0_i32_1 : i32, i32, i32
  }
  func.func @transform_22(%arg0: i32) -> (i32, i32) {
    %c0_i32 = arith.constant 0 : i32
    %c0_i32_0 = arith.constant 0 : i32
    %c0_i32_1 = arith.constant 0 : i32
    return %c0_i32, %c0_i32_0 : i32, i32
  }
  func.func @transform_23(%arg0: i32) -> (i32, i32) {
    %c0_i32 = arith.constant 0 : i32
    %c0_i32_0 = arith.constant 0 : i32
    %c0_i32_1 = arith.constant 0 : i32
    return %c0_i32, %c0_i32_0 : i32, i32
  }
  func.func @transform_24(%arg0: i32) -> (i32, i32) {
    %c0_i32 = arith.constant 0 : i32
    %c0_i32_0 = arith.constant 0 : i32
    %c0_i32_1 = arith.constant 0 : i32
    return %c0_i32, %c0_i32_0 : i32, i32
  }
}

</mosaic_0001>

<bundles_post_ra>
// kernel: transformer_forward.1
= control target key start
LH: loop header
LB: loop body
LE: loop exit
PB: predicated region body
PF: predicated region fallthrough
CT: control target
= control target key end

     0   :  { %s8271_s0 = inlined_call_operand.vmem [shape: f32[16,4], index: 0, kind: input, shape index: {}]   ;;  %s8272_s1 = inlined_call_operand.vmem [shape: f32[16,32], index: 1, kind: input, shape index: {}]   ;;  %s8273_s2 = inlined_call_operand.vmem [shape: bf16[4,96], index: 2, kind: input, shape index: {}]   ;;  %s8274_s3 = inlined_call_operand.vmem [shape: f32[1,96], index: 3, kind: input, shape index: {}]   ;;  %s8275_s4 = inlined_call_operand.vmem [shape: bf16[32,96], index: 4, kind: input, shape index: {}]   ;;  %s8276_s5 = inlined_call_operand.hbm [shape: f32[1,96], index: 5, kind: input, shape index: {}]   ;;  %s8277_s6 = inlined_call_operand.vmem [shape: bf16[32,96], index: 6, kind: input, shape index: {}]   ;;  %s8278_s7 = inlined_call_operand.hbm [shape: f32[1,96], index: 7, kind: input, shape index: {}]   ;;  %s8279_s8 = inlined_call_operand.vmem [shape: bf16[32,96], index: 8, kind: input, shape index: {}]   ;;  %s8280_s9 = inlined_call_operand.hbm [shape: f32[1,96], index: 9, kind: input, shape index: {}]   ;;  %s8281_s10 = inlined_call_operand.vmem [shape: bf16[2,32,96], index: 10, kind: input, shape index: {}]   ;;  %s8282_s11 = inlined_call_operand.hbm [shape: f32[2,1,96], index: 11, kind: input, shape index: {}]   ;;  %s8283_s12 = inlined_call_operand.vmem [shape: bf16[2,32,32], index: 12, kind: input, shape index: {}]   ;;  %s8284_s13 = inlined_call_operand.hbm [shape: f32[2,1,32], index: 13, kind: input, shape index: {}]   ;;  %s8285_s14 = inlined_call_operand.vmem [shape: bf16[2,32,64], index: 14, kind: input, shape index: {}]   ;;  %s8286_s15 = inlined_call_operand.hbm [shape: f32[2,1,64], index: 15, kind: input, shape index: {}]   ;;  %s8287_s16 = inlined_call_operand.vmem [shape: bf16[2,64,32], index: 16, kind: input, shape index: {}]   ;;  %s8288_s17 = inlined_call_operand.hbm [shape: f32[2,1,32], index: 17, kind: input, shape index: {}]   ;;  %s8289_s18 = inlined_call_operand.hbm [shape: f32[2,1,32], index: 18, kind: input, shape index: {}]   ;;  %s8290_s19 = inlined_call_operand.hbm [shape: f32[2,1,32], index: 19, kind: input, shape index: {}]   ;;  %s8291_s20 = inlined_call_operand.hbm [shape: f32[2,1,32], index: 20, kind: input, shape index: {}]   ;;  %s8292_s21 = inlined_call_operand.hbm [shape: f32[2,1,32], index: 21, kind: input, shape index: {}]   ;;  %s8293_s22 = inlined_call_operand.hbm [shape: f32[1,32], index: 22, kind: input, shape index: {}]   ;;  %s8294_s23 = inlined_call_operand.hbm [shape: f32[1,32], index: 23, kind: input, shape index: {}]   ;;  %s8295_s24 = inlined_call_operand.vmem [shape: f32[2,256], index: 24, kind: output, shape index: {}]  }
   0x1   :  { %8301 = sst [smem:[#allocation29_spill]] %s8271_s0 }
   0x2   :  { %8302 = sst [smem:[#allocation30_spill]] %s8272_s1 }
   0x3   :  { %8303 = sst [smem:[#allocation31_spill]] %s8273_s2 }
   0x4   :  { %8304 = sst [smem:[#allocation32_spill]] %s8274_s3 }
   0x5   :  { %8305 = sst [smem:[#allocation33_spill]] %s8275_s4 }
   0x6   :  { %8306 = sst [smem:[#allocation34_spill]] %s8276_s5 }
   0x7   :  { %8307 = sst [smem:[#allocation35_spill]] %s8277_s6 }
   0x8   :  { %8308 = sst [smem:[#allocation36_spill]] %s8278_s7 }
   0x9   :  { %8309 = sst [smem:[#allocation37_spill]] %s8279_s8 }
   0xa   :  { %29 = vsyncpa [#allocation3], 0 }
   0xb   :  { %30 = vsyncpa [#allocation5], 0 }
   0xc   :  { %31 = vsyncpa [#allocation8], 0 }
   0xd   :  { %32 = vsyncpa [#allocation11], 0 }
   0xe   :  { %33 = vsyncpa [#allocation14], 0 }
   0xf   :  { %34 = vsyncpa [#allocation17], 0 }
  0x10   :  { %35 = vsyncpa [#allocation20], 0  ;;  %s6888_s5 = smov [#allocation4]   ;;  %s6889_s27 = smov [#allocation7]  }
  0x11   :  { %s64_s26 = sshll.u32 %s6888_s5, 4  ;;  %s87_s28 = sshll.u32 %s6889_s27, 4  ;;  %s65_s26 = int_to_ptr.vmem [resolvable:$true] %s64_s26  ;;  %s88_s28 = int_to_ptr.vmem [resolvable:$true] %s87_s28 }
  0x12   :  { %s6622_s6 = scalar_lea.vmem %s65_s26, 16  ;;  %s6626_s2 = scalar_lea.vmem %s65_s26, 32 }
  0x13   :  { %p6623_p0 = scmp.ne.s32.totalorder %s65_s26, %s6622_s6  ;;  %p6627_p1 = scmp.lt.s32.totalorder %s65_s26, %s65_s26 }
  0x14   :  { %p6628_p2 = scmp.lt.s32.totalorder %s6626_s2, %s6622_s6 }
  0x16   :  { %p6629_p3 = por %p6628_p2, %p6627_p1 }
  0x18   :  { %p6630_p4 = pnand %p6629_p3, %p6623_p0 }
  0x1a   :  { %6633 = shalt.err (!%p6630_p4)
}
  0x1b   :  { %s8310_s7 = sld [smem:[#allocation36_spill]]  ;;  %s6642_s30 = scalar_lea.vmem %s88_s28, 32 }
  0x1c   :  { %p6643_p5 = scmp.ne.s32.totalorder %s88_s28, %s6642_s30  ;;  %p6647_p6 = scmp.lt.s32.totalorder %s88_s28, %s88_s28 }
  0x1d   :  { %p6648_p7 = scmp.lt.s32.totalorder %s6642_s30, %s6642_s30 }
  0x1f   :  { %p6649_p8 = por %p6648_p7, %p6647_p6 }
  0x21   :  { %67 = dma.hbm_to_vmem [thread:$0]  %s8310_s7, 16, %s65_s26, [#allocation5]  }
  0x22   :  { %p6650_p9 = pnand %p6649_p8, %p6643_p5 }
  0x24   :  { %6653 = shalt.err (!%p6650_p9)
}
  0x25   :  { %s6890_s3 = smov 16   ;;  %s6891_s25 = smov 1  }
  0x26   :  { %93 = dma.hbm_to_vmem [thread:$0]  %s8282_s11, 32, %s88_s28, [#allocation8], %s6890_s3, %s6890_s3, %s6891_s25  }
  0x27   :  { %s6892_s1 = smov [#allocation10]   ;;  %s6893_s27 = smov [#allocation13]  }
  0x28   :  { %s115_s5 = sshll.u32 %s6892_s1, 4  ;;  %s141_s26 = sshll.u32 %s6893_s27, 4  ;;  %s116_s5 = int_to_ptr.vmem [resolvable:$true] %s115_s5  ;;  %s142_s26 = int_to_ptr.vmem [resolvable:$true] %s141_s26 }
  0x29   :  { %s6662_s6 = scalar_lea.vmem %s116_s5, 32  ;;  %p6667_p11 = scmp.lt.s32.totalorder %s116_s5, %s116_s5 }
  0x2a   :  { %p6663_p10 = scmp.ne.s32.totalorder %s116_s5, %s6662_s6  ;;  %p6668_p12 = scmp.lt.s32.totalorder %s6662_s6, %s6662_s6 }
  0x2c   :  { %p6669_p13 = por %p6668_p12, %p6667_p11 }
  0x2e   :  { %p6670_p0 = pnand %p6669_p13, %p6663_p10 }
  0x30   :  { %6673 = shalt.err (!%p6670_p0)
}
  0x31   :  { %121 = dma.hbm_to_vmem [thread:$0]  %s8286_s15, 32, %s116_s5, [#allocation11], %s6890_s3, %s6890_s3, %s6891_s25  }
  0x32   :  { %s6682_s11 = scalar_lea.vmem %s142_s26, 32  ;;  %p6687_p2 = scmp.lt.s32.totalorder %s142_s26, %s142_s26 }
  0x33   :  { %p6683_p1 = scmp.ne.s32.totalorder %s142_s26, %s6682_s11  ;;  %p6688_p3 = scmp.lt.s32.totalorder %s6682_s11, %s6682_s11 }
  0x35   :  { %p6689_p4 = por %p6688_p3, %p6687_p2 }
  0x37   :  { %p6690_p5 = pnand %p6689_p4, %p6683_p1 }
  0x39   :  { %6693 = shalt.err (!%p6690_p5)
}
  0x3a   :  { %147 = dma.hbm_to_vmem [thread:$0]  %s8289_s18, 32, %s142_s26, [#allocation14], %s6890_s3, %s6890_s3, %s6891_s25  }
  0x3b   :  { %s6894_s7 = smov [#allocation16]   ;;  %s6895_s8 = smov [#allocation19]  }
  0x3c   :  { %s165_s30 = sshll.u32 %s6894_s7, 4  ;;  %s190_s4 = sshll.u32 %s6895_s8, 4  ;;  %s166_s30 = int_to_ptr.vmem [resolvable:$true] %s165_s30  ;;  %s191_s4 = int_to_ptr.vmem [resolvable:$true] %s190_s4 }
  0x3d   :  { %s6702_s15 = scalar_lea.vmem %s166_s30, 32  ;;  %p6707_p7 = scmp.lt.s32.totalorder %s166_s30, %s166_s30 }
  0x3e   :  { %p6703_p6 = scmp.ne.s32.totalorder %s166_s30, %s6702_s15  ;;  %p6708_p8 = scmp.lt.s32.totalorder %s6702_s15, %s6702_s15 }
  0x40   :  { %p6709_p9 = por %p6708_p8, %p6707_p7 }
  0x42   :  { %p6710_p10 = pnand %p6709_p9, %p6703_p6 }
  0x44   :  { %6713 = shalt.err (!%p6710_p10)
}
  0x45   :  { %171 = dma.hbm_to_vmem [thread:$0]  %s8291_s20, 32, %s166_s30, [#allocation17], %s6890_s3, %s6890_s3, %s6891_s25  }
  0x46   :  { %s6722_s18 = scalar_lea.vmem %s191_s4, 16  ;;  %s6726_s27 = scalar_lea.vmem %s191_s4, 32 }
  0x47   :  { %p6723_p11 = scmp.ne.s32.totalorder %s191_s4, %s6722_s18  ;;  %p6727_p12 = scmp.lt.s32.totalorder %s191_s4, %s191_s4 }
  0x48   :  { %p6728_p13 = scmp.lt.s32.totalorder %s6726_s27, %s6722_s18 }
  0x4a   :  { %p6729_p0 = por %p6728_p13, %p6727_p12 }
  0x4c   :  { %p6730_p1 = pnand %p6729_p0, %p6723_p11 }
  0x4e   :  { %6733 = shalt.err (!%p6730_p1)
}
  0x4f   :  { %193 = dma.hbm_to_vmem [thread:$0]  %s8293_s22, 16, %s191_s4, [#allocation20]  }
  0x50   :  { %s6896_s2 = smov [#allocation2]   ;;  %s6897_s11 = smov [#allocation6]  }
  0x51   :  { %s52_s29 = sshll.u32 %s6896_s2, 4  ;;  %s76_s28 = sshll.u32 %s6897_s11, 4  ;;  %s53_s29 = int_to_ptr.vmem [resolvable:$true] %s52_s29  ;;  %s77_s28 = int_to_ptr.vmem [resolvable:$true] %s76_s28 }
  0x52   :  { %s6742_s0 = scalar_lea.vmem %s53_s29, 16  ;;  %s6746_s20 = scalar_lea.vmem %s53_s29, 32 }
  0x53   :  { %p6743_p2 = scmp.ne.s32.totalorder %s53_s29, %s6742_s0  ;;  %p6747_p3 = scmp.lt.s32.totalorder %s53_s29, %s53_s29 }
  0x54   :  { %p6748_p4 = scmp.lt.s32.totalorder %s6746_s20, %s6742_s0 }
  0x56   :  { %p6749_p5 = por %p6748_p4, %p6747_p3 }
  0x58   :  { %p6750_p6 = pnand %p6749_p5, %p6743_p2 }
  0x5a   :  { %6753 = shalt.err (!%p6750_p6)
}
  0x5b   :  { %s8311_s8 = sld [smem:[#allocation34_spill]]  ;;  %s6762_s15 = scalar_lea.vmem %s77_s28, 16 }
  0x5c   :  { %p6763_p7 = scmp.ne.s32.totalorder %s77_s28, %s6762_s15  ;;  %s6766_s22 = scalar_lea.vmem %s77_s28, 32 }
  0x5d   :  { %p6767_p8 = scmp.lt.s32.totalorder %s77_s28, %s77_s28  ;;  %p6768_p9 = scmp.lt.s32.totalorder %s6766_s22, %s6762_s15 }
  0x5f   :  { %p6769_p10 = por %p6768_p9, %p6767_p8 }
  0x61   :  { %55 = dma.hbm_to_vmem [thread:$0]  %s8311_s8, 16, %s53_s29, [#allocation3]  }
  0x62   :  { %p6770_p11 = pnand %p6769_p10, %p6763_p7 }
  0x64   :  { %6773 = shalt.err (!%p6770_p11)
}
  0x65   :  { %79 = dma.hbm_to_vmem [thread:$0]  %s8280_s9, 16, %s77_s28, [#allocation5]  }
  0x66   :  { %s6898_s5 = smov [#allocation9]   ;;  %s6899_s27 = smov [#allocation12]  }
  0x67   :  { %s101_s18 = sshll.u32 %s6898_s5, 4  ;;  %s129_s26 = sshll.u32 %s6899_s27, 4  ;;  %s102_s18 = int_to_ptr.vmem [resolvable:$true] %s101_s18  ;;  %s130_s26 = int_to_ptr.vmem [resolvable:$true] %s129_s26 }
  0x68   :  { %s6782_s6 = scalar_lea.vmem %s102_s18, 32  ;;  %p6787_p13 = scmp.lt.s32.totalorder %s102_s18, %s102_s18 }
  0x69   :  { %p6783_p12 = scmp.ne.s32.totalorder %s102_s18, %s6782_s6  ;;  %p6788_p0 = scmp.lt.s32.totalorder %s6782_s6, %s6782_s6 }
  0x6b   :  { %p6789_p1 = por %p6788_p0, %p6787_p13 }
  0x6d   :  { %p6790_p2 = pnand %p6789_p1, %p6783_p12 }
  0x6f   :  { %6793 = shalt.err (!%p6790_p2)
}
  0x70   :  { %107 = dma.hbm_to_vmem [thread:$0]  %s8284_s13, 32, %s102_s18, [#allocation8], %s6890_s3, %s6890_s3, %s6891_s25  }
  0x71   :  { %s6802_s9 = scalar_lea.vmem %s130_s26, 32  ;;  %p6807_p4 = scmp.lt.s32.totalorder %s130_s26, %s130_s26 }
  0x72   :  { %p6803_p3 = scmp.ne.s32.totalorder %s130_s26, %s6802_s9  ;;  %p6808_p5 = scmp.lt.s32.totalorder %s6802_s9, %s6802_s9 }
  0x74   :  { %p6809_p6 = por %p6808_p5, %p6807_p4 }
  0x76   :  { %p6810_p7 = pnand %p6809_p6, %p6803_p3 }
  0x78   :  { %6813 = shalt.err (!%p6810_p7)
}
  0x79   :  { %135 = dma.hbm_to_vmem [thread:$0]  %s8288_s17, 32, %s130_s26, [#allocation11], %s6890_s3, %s6890_s3, %s6891_s25  }
  0x7a   :  { %s6900_s0 = smov [#allocation15]   ;;  %s6901_s7 = smov [#allocation18]  }
  0x7b   :  { %s153_s20 = sshll.u32 %s6900_s0, 4  ;;  %s177_s30 = sshll.u32 %s6901_s7, 4  ;;  %s154_s20 = int_to_ptr.vmem [resolvable:$true] %s153_s20  ;;  %s178_s30 = int_to_ptr.vmem [resolvable:$true] %s177_s30 }
  0x7c   :  { %s6822_s13 = scalar_lea.vmem %s154_s20, 32  ;;  %p6827_p9 = scmp.lt.s32.totalorder %s154_s20, %s154_s20 }
  0x7d   :  { %p6823_p8 = scmp.ne.s32.totalorder %s154_s20, %s6822_s13  ;;  %p6828_p10 = scmp.lt.s32.totalorder %s6822_s13, %s6822_s13 }
  0x7f   :  { %p6829_p11 = por %p6828_p10, %p6827_p9 }
  0x81   :  { %p6830_p12 = pnand %p6829_p11, %p6823_p8 }
  0x83   :  { %6833 = shalt.err (!%p6830_p12)
}
  0x84   :  { %159 = dma.hbm_to_vmem [thread:$0]  %s8290_s19, 32, %s154_s20, [#allocation14], %s6890_s3, %s6890_s3, %s6891_s25  }
  0x85   :  { %s6842_s17 = scalar_lea.vmem %s178_s30, 32  ;;  %p6847_p0 = scmp.lt.s32.totalorder %s178_s30, %s178_s30 }
  0x86   :  { %p6843_p13 = scmp.ne.s32.totalorder %s178_s30, %s6842_s17  ;;  %p6848_p1 = scmp.lt.s32.totalorder %s6842_s17, %s6842_s17 }
  0x88   :  { %p6849_p2 = por %p6848_p1, %p6847_p0 }
  0x8a   :  { %p6850_p3 = pnand %p6849_p2, %p6843_p13 }
  0x8c   :  { %6853 = shalt.err (!%p6850_p3)
}
  0x8d   :  { %183 = dma.hbm_to_vmem [thread:$0]  %s8292_s21, 32, %s178_s30, [#allocation17], %s6890_s3, %s6890_s3, %s6891_s25  }
  0x8e   :  { %s6902_s1 = smov [#allocation21]  }
  0x8f   :  { %s200_s5 = sshll.u32 %s6902_s1, 4  ;;  %s201_s5 = int_to_ptr.vmem [resolvable:$true] %s200_s5 }
  0x90   :  { %s6862_s18 = scalar_lea.vmem %s201_s5, 16  ;;  %s6866_s19 = scalar_lea.vmem %s201_s5, 32 }
  0x91   :  { %p6863_p4 = scmp.ne.s32.totalorder %s201_s5, %s6862_s18  ;;  %p6867_p5 = scmp.lt.s32.totalorder %s201_s5, %s201_s5 }
  0x92   :  { %p6868_p6 = scmp.lt.s32.totalorder %s6866_s19, %s6862_s18 }
  0x94   :  { %p6869_p7 = por %p6868_p6, %p6867_p5 }
  0x96   :  { %p6870_p8 = pnand %p6869_p7, %p6863_p4 }
  0x98   :  { %6873 = shalt.err (!%p6870_p8)
}
  0x99   :  { %203 = dma.hbm_to_vmem [thread:$0]  %s8294_s23, 16, %s201_s5, [#allocation20]  }
  0x9a   :  { %6874 = dma.done.wait [#allocation3], 16  }
  0x9b   :  { %6875 = vsyncadd [#allocation3], 4294967280 }
  0x9c   :  { %6876 = dma.done.wait [#allocation5], 32  }
  0x9d   :  { %6877 = vsyncadd [#allocation5], 4294967264 }
  0x9e   :  { %6878 = dma.done.wait [#allocation8], 64  }
  0x9f   :  { %6879 = vsyncadd [#allocation8], 4294967232 }
  0xa0   :  { %6880 = dma.done.wait [#allocation11], 64  }
  0xa1   :  { %6881 = vsyncadd [#allocation11], 4294967232 }
  0xa2   :  { %6882 = dma.done.wait [#allocation14], 64  }
  0xa3   :  { %6883 = vsyncadd [#allocation14], 4294967232 }
  0xa4   :  { %6884 = dma.done.wait [#allocation17], 64  }
  0xa5   :  { %6885 = vsyncadd [#allocation17], 4294967232 }
  0xa6   :  { %6886 = dma.done.wait [#allocation20], 32  }
  0xa7   :  { %6887 = vsyncadd [#allocation20], 4294967264  ;;  %v6903_v0 = vmov 0.0   ;;  %vm6904_vm0 = vmmov 0   ;;  %vm259_vm1 = vcmask 1041408   ;;  %s8312_s25 = sld [smem:[#allocation31_spill]] }
  0xa8   :  { %5802 = vmatprep.subr.bf16.mxu0 %v6903_v0  ;;  %5804 = vmatprep.mubr.msk.bf16.mxu0 %vm6904_vm0, %v6903_v0  ;;  %s8313_s29 = sld [smem:[#allocation29_spill]]  ;;  %vm255_vm2 = vcmask 31744   ;;  %v6905_v8 = vmov 0   ;;  %v7137_v13 = vld [vmem:[#allocation2] ss:$0 sm:$0xff]  ;;  %s6906_s13 = smov 64  }
  0xa9   :  { %5824 = vmatprep.subr.bf16.mxu1 %v6903_v0  ;;  %5828 = vmatprep.mubr.msk.bf16.mxu1 %vm6904_vm0, %v6903_v0  ;;  %s8314_s20 = sld [smem:[#allocation33_spill]]  ;;  %s6907_s22 = smov 96   ;;  %vm475_vm3 = vcmask 1041409   ;;  %vm364_vm4 = vcmask 261120  }
  0xaa   :  { %s8315_s17 = sld [smem:[#allocation32_spill]]  ;;  %s6911_s6 = smov 120  }
  0xab   :  { %s8316_s5 = sld [smem:[#allocation35_spill]]  ;;  %s6912_s2 = smov 104  }
  0xac   :  { %s8317_s27 = sld [smem:[#allocation37_spill]] }
  0xad   :  { %v247_v1 = vld [vmem:[%s8312_s25] sm:$0x3]  ;;  %s8318_s1 = sld [smem:[#allocation30_spill]]  ;;  %s6910_s25 = smov 112  }
  0xae   :  { %v244_v2 = vld [vmem:[%s8313_s29] sm:$0xff]  ;;  %v245_v3 = vld [vmem:[%s8313_s29 + $0x8] sm:$0xff]  ;;  %v261_v4 = vsel %vm259_vm1, %v247_v1, 0  ;;  %s6913_s29 = smov 8  }
  0xaf   :  { %v246_v5 = vpack.c.bf16 %v245_v3, %v244_v2  ;;  %5803 = vmatpush3.bf16.msra.mxu0 %v261_v4  ;;  %v7121_v6 = vld [vmem:[%s8314_s20 + $0x8] sm:$0xff]   ;;  %v7127_v7 = vld [vmem:[%s8314_s20] sm:$0xff]  }
  0xb0   :  { %5808 = vmatprep.subr.bf16.mxu0 %v6903_v0  ;;  %v5480_v20 = vld [vmem:[%s8315_s17] ss:$0 sm:$0xff] }
  0xb1   :  { %v7159_v42 = vld [vmem:[%s8316_s5 + $0x8] sm:$0xff]   ;;  %v7171_v45 = vld [vmem:[%s8316_s5] sm:$0xff]  }
  0xb2   :  { %5805 = vmatmul.mubr.msk.bf16.vlgmr.msra.gmra.mxu0 %vm255_vm2, %v246_v5  ;;  %v7164_v43 = vld [vmem:[%s8317_s27 + $0x8] sm:$0xff]   ;;  %v7178_v46 = vld [vmem:[%s8317_s27] sm:$0xff]  }
  0xb3   :  { %5809 = vmatpush3.bf16.msra.mxu0 %v7121_v6  ;;  %5812 = vmatprep.mubr.msk.bf16.mxu0 %vm6904_vm0, %v6903_v0 }
  0xb4   :  { %5810 = vmatprep.subr.bf16.mxu0 %v6903_v0  ;;  %5825 = vmatpush3.bf16.msra.mxu1 %v7164_v43 }
  0xb5   :  { %5826 = vmatprep.subr.bf16.mxu1 %v6903_v0 }
  0xb7   :  { %5811 = vmatpush3.bf16.msra.mxu0 %v7127_v7 }
  0xb8   :  { %5816 = vmatprep.subr.bf16.mxu0 %v6903_v0  ;;  %5827 = vmatpush3.bf16.msra.mxu1 %v7178_v46 }
  0xb9   :  { %5840 = vmatprep.subr.bf16.mxu1 %v6903_v0 }
  0xba   :  { %5813 = vmatmul.mubr.bf16.vlgmr.msra.gmra.mxu0 %v6905_v8 }
  0xbb   :  { %5820 = vmatprep.mubr.msk.bf16.mxu0 %vm6904_vm0, %v6903_v0  ;;  %5817 = vmatpush3.bf16.msra.mxu0 %v7159_v42 }
  0xbc   :  { %5818 = vmatprep.subr.bf16.mxu0 %v6903_v0  ;;  %5829 = vmatmul.mubr.bf16.vlgmr.msra.gmra.mxu1 %v6905_v8 }
  0xbd   :  { %5841 = vmatpush3.bf16.msra.mxu1 %v7159_v42  ;;  %5844 = vmatprep.mubr.msk.bf16.mxu1 %vm6904_vm0, %v6903_v0 }
  0xbe   :  { %5842 = vmatprep.subr.bf16.mxu1 %v6903_v0 }
  0xbf   :  { %5819 = vmatpush3.bf16.msra.mxu0 %v7171_v45 }
  0xc0   :  { %5832 = vmatprep.subr.bf16.mxu0 %v6903_v0 }
  0xc1   :  { %5843 = vmatpush3.bf16.msra.mxu1 %v7171_v45 }
  0xc2   :  { %5856 = vmatprep.subr.bf16.mxu1 %v6903_v0 }
 0x172   :  { %v297_v9 = vpop.f32.mrf.mxu0 }
 0x173   :  { %v7148_v23 = vadd.f32 %v5480_v20, %v297_v9 }
 0x174   :  { %v5806_v10 = vpop.f32.mrf.mxu0 }
 0x176   :  { %v300_v11 = vpop.f32.mrf.mxu0 }
 0x177   :  { %v7145_v21 = vadd.f32 %v5480_v20, %v300_v11 }
 0x178   :  { %v5807_v12 = vpop.f32.mrf.mxu0 }
 0x17a   :  { %v402_v14 = vpop.f32.mrf.mxu0 }
 0x17b   :  { %v403_v15 = vadd.f32 %v7137_v13, %v402_v14 }
 0x17c   :  { %v5814_v16 = vpop.f32.mrf.mxu0  ;;  %v587_v2 = vpop.f32.mrf.mxu1 }
 0x17d   :  { %v409_v17 = vrot.slane %v403_v15, 1  ;;  %v412_v24 = vadd.f32 %v403_v15, %v7148_v23 }
 0x17e   :  { %v405_v18 = vpop.f32.mrf.mxu0  ;;  %v5830_v3 = vpop.f32.mrf.mxu1 }
 0x17f   :  { %428 = vrot.lane.b32.xlu0 %v409_v17, %s6906_s13  ;;  %v413_v22 = vadd.f32 %v409_v17, %v7145_v21  ;;  %v5485_v26 = vmul.f32 -1.442695, %v412_v24 }
 0x180   :  { %v5815_v19 = vpop.f32.mrf.mxu0  ;;  %v590_v4 = vpop.f32.mrf.mxu1 }
 0x181   :  { %v5486_v25 = vmul.f32 -1.442695, %v413_v22 }
 0x182   :  { %v5831_v5 = vpop.f32.mrf.mxu1 }
 0x183   :  { %426 = vrot.lane.b32.xlu0 %v403_v15, %s6906_s13  ;;  %6377 = vpow2.f32 %v5486_v25 }
 0x184   :  { %6379 = vpow2.f32 %v5485_v26 }
 0x190   :  { %v6378_v27 = vpop.eup %6377 }
 0x191   :  { %v421_v28 = vadd.f32 1.0, %v6378_v27  ;;  %v6380_v29 = vpop.eup %6379 }
 0x192   :  { %v420_v30 = vadd.f32 1.0, %v6380_v29 }
 0x193   :  { %6381 = vrcp.f32 %v421_v28 }
 0x194   :  { %6383 = vrcp.f32 %v420_v30 }
 0x1a0   :  { %v6382_v31 = vpop.eup %6381 }
 0x1a1   :  { %v6384_v34 = vpop.eup %6383  ;;  %v447_v47 = vsub.f32 1.0, %v6382_v31  ;;  %v459_v49 = vmul.f32 0.0, %v6382_v31 }
 0x1a2   :  { %v446_v52 = vsub.f32 1.0, %v6384_v34  ;;  %v458_v55 = vmul.f32 0.0, %v6384_v34 }
 0x1f1   :  { %v429_v32 = vpop.permute.xlu0 %428 }
 0x1f2   :  { %v433_v33 = vmul.f32 %v6382_v31, %v429_v32 }
 0x1f4   :  { %438 = vrot.lane.b32.xlu1 %v433_v33, %s6906_s13 }
 0x1f5   :  { %v427_v35 = vpop.permute.xlu0 %426 }
 0x1f6   :  { %v432_v36 = vmul.f32 %v6384_v34, %v427_v35  ;;  %v7221_v35 = vld [vmem:[#allocation6] ss:$0 sm:$0xff] }
 0x1f8   :  { %436 = vrot.lane.b32.xlu1 %v432_v36, %s6906_s13  ;;  %v588_v36 = vadd.f32 %v7221_v35, %v587_v2 }
 0x266   :  { %v439_v37 = vpop.permute.xlu1 %438 }
 0x267   :  { %v443_v38 = vadd.f32 %v439_v37, %v7145_v21  ;;  %v7226_v37 = vld [vmem:[#allocation4] ss:$0 sm:$0xff] }
 0x269   :  { %6385 = vtanh.f32 %v443_v38 }
 0x26a   :  { %v437_v39 = vpop.permute.xlu1 %436 }
 0x26b   :  { %v442_v40 = vadd.f32 %v437_v39, %v7148_v23 }
 0x26d   :  { %6387 = vtanh.f32 %v442_v40 }
 0x276   :  { %v6386_v41 = vpop.eup %6385 }
 0x277   :  { %452 = vrot.lane.b32.xlu0 %v6386_v41, %s6907_s22 }
 0x27a   :  { %v6388_v44 = vpop.eup %6387 }
 0x27b   :  { %450 = vrot.lane.b32.xlu1 %v6388_v44, %s6907_s22 }
 0x2e9   :  { %v453_v48 = vpop.permute.xlu0 %452 }
 0x2ea   :  { %v457_v50 = vmul.f32 %v453_v48, %v447_v47 }
 0x2ec   :  { %v7191_v51 = vadd.f32 %v459_v49, %v457_v50 }
 0x2ed   :  { %v451_v53 = vpop.permute.xlu1 %450 }
 0x2ee   :  { %v463_v54 = vpack.c.bf16 %v7191_v51, %v7191_v51  ;;  %v456_v56 = vmul.f32 %v451_v53, %v446_v52 }
 0x2f0   :  { %v473_v57 = vunpack.c.l.b16 %v463_v54  ;;  %v7195_v58 = vadd.f32 %v458_v55, %v456_v56 }
 0x2f2   :  { %v462_v59 = vpack.c.bf16 %v7195_v58, %v7195_v58  ;;  %v474_v60 = vrot.slane %v473_v57, 7  ;;  %v753_v57 = vrot.slane %v7191_v51, 7 }
 0x2f4   :  { %v472_v61 = vunpack.c.l.b16 %v462_v59 }
 0x2f6   :  { %v476_v62 = vsel %vm475_vm3, %v474_v60, %v472_v61  ;;  %v752_v61 = vrot.slane %v7195_v58, 7 }
 0x2f7   :  { %v477_v63 = vpack.c.b16 %v476_v62, %v476_v62 }
 0x2f9   :  { %478 = vrot.lane.b32.xlu0 %v477_v63, %s6907_s22 }
 0x36b   :  { %v479_v1 = vpop.permute.xlu0 %478 }
 0x36c   :  { %5821 = vmatmul.mubr.msk.bf16.vlgmr.msra.gmra.mxu0 %vm364_vm4, %v479_v1 }
 0x36d   :  { %5833 = vmatpush3.bf16.msra.mxu0 %v7121_v6  ;;  %5836 = vmatprep.mubr.msk.bf16.mxu0 %vm6904_vm0, %v6903_v0 }
 0x36e   :  { %5834 = vmatprep.subr.bf16.mxu0 %v6903_v0 }
 0x371   :  { %5835 = vmatpush3.bf16.msra.mxu0 %v7127_v7 }
 0x372   :  { %5848 = vmatprep.subr.bf16.mxu0 %v6903_v0 }
 0x374   :  { %5837 = vmatmul.mubr.msk.bf16.vlgmr.msra.gmra.mxu0 %vm364_vm4, %v479_v1 }
 0x375   :  { %5849 = vmatpush3.bf16.msra.mxu0 %v7164_v43  ;;  %5852 = vmatprep.mubr.msk.bf16.mxu0 %vm6904_vm0, %v6903_v0 }
 0x376   :  { %5850 = vmatprep.subr.bf16.mxu0 %v6903_v0 }
 0x379   :  { %5851 = vmatpush3.bf16.msra.mxu0 %v7178_v46 }
 0x37a   :  { %5864 = vmatprep.subr.bf16.mxu0 %v6903_v0 }
 0x42c   :  { %v529_v8 = vpop.f32.mrf.mxu0 }
 0x42d   :  { %v530_v38 = vadd.f32 %v7226_v37, %v529_v8 }
 0x42e   :  { %v5822_v9 = vpop.f32.mrf.mxu0 }
 0x42f   :  { %v593_v39 = vadd.f32 %v588_v36, %v530_v38 }
 0x430   :  { %v532_v10 = vpop.f32.mrf.mxu0 }
 0x431   :  { %v5494_v40 = vmul.f32 -1.442695, %v593_v39 }
 0x432   :  { %v5823_v11 = vpop.f32.mrf.mxu0 }
 0x434   :  { %v694_v12 = vpop.f32.mrf.mxu0 }
 0x435   :  { %v695_v14 = vadd.f32 %v7137_v13, %v694_v12 }
 0x436   :  { %v5838_v15 = vpop.f32.mrf.mxu0 }
 0x437   :  { %720 = vrot.lane.b32.xlu0 %v695_v14, %s6906_s13  ;;  %v701_v16 = vrot.slane %v695_v14, 7  ;;  %v705_v19 = vadd.f32 %v695_v14, %v7145_v21 }
 0x438   :  { %v697_v17 = vpop.f32.mrf.mxu0 }
 0x439   :  { %718 = vrot.lane.b32.xlu1 %v701_v16, %s6906_s13  ;;  %v704_v20 = vadd.f32 %v701_v16, %v7148_v23  ;;  %v5497_v22 = vmul.f32 -1.442695, %v705_v19 }
 0x43a   :  { %v5839_v18 = vpop.f32.mrf.mxu0 }
 0x43b   :  { %v5496_v24 = vmul.f32 -1.442695, %v704_v20  ;;  %6389 = vpow2.f32 %v5497_v22 }
 0x43d   :  { %6391 = vpow2.f32 %v5496_v24 }
 0x448   :  { %v6390_v25 = vpop.eup %6389 }
 0x449   :  { %v713_v27 = vadd.f32 1.0, %v6390_v25 }
 0x44a   :  { %v6392_v26 = vpop.eup %6391 }
 0x44b   :  { %v712_v28 = vadd.f32 1.0, %v6392_v26  ;;  %6393 = vrcp.f32 %v713_v27 }
 0x44d   :  { %6395 = vrcp.f32 %v712_v28 }
 0x44e   :  { %6397 = vpow2.f32 %v5494_v40 }
 0x458   :  { %v6394_v29 = vpop.eup %6393 }
 0x459   :  { %v739_v59 = vsub.f32 1.0, %v6394_v29  ;;  %v757_v62 = vmul.f32 %v6394_v29, %v753_v57 }
 0x45a   :  { %v6396_v32 = vpop.eup %6395 }
 0x45b   :  { %v6398_v41 = vpop.eup %6397  ;;  %v738_v1 = vsub.f32 1.0, %v6396_v32  ;;  %v756_v4 = vmul.f32 %v6396_v32, %v752_v61 }
 0x45c   :  { %v597_v49 = vadd.f32 1.0, %v6398_v41 }
 0x4a9   :  { %v721_v30 = vpop.permute.xlu0 %720 }
 0x4aa   :  { %v725_v31 = vmul.f32 %v6394_v29, %v721_v30 }
 0x4ab   :  { %v719_v33 = vpop.permute.xlu1 %718 }
 0x4ac   :  { %v724_v34 = vmul.f32 %v6396_v32, %v719_v33  ;;  %730 = vrot.lane.b32.xlu0 %v725_v31, %s6906_s13 }
 0x4ae   :  { %728 = vrot.lane.b32.xlu1 %v724_v34, %s6906_s13 }
 0x4b2   :  { %601 = vrot.lane.b32.xlu1 %v588_v36, %s6906_s13 }
 0x51e   :  { %v731_v44 = vpop.permute.xlu0 %730 }
 0x51f   :  { %v735_v47 = vadd.f32 %v731_v44, %v7145_v21 }
 0x520   :  { %v729_v48 = vpop.permute.xlu1 %728 }
 0x521   :  { %6399 = vtanh.f32 %v735_v47  ;;  %v734_v50 = vadd.f32 %v729_v48, %v7148_v23 }
 0x523   :  { %6401 = vtanh.f32 %v734_v50 }
 0x524   :  { %6403 = vrcp.f32 %v597_v49  ;;  %v602_v54 = vpop.permute.xlu1 %601 }
 0x52e   :  { %v6400_v52 = vpop.eup %6399 }
 0x52f   :  { %744 = vrot.lane.b32.xlu1 %v6400_v52, %s6907_s22 }
 0x530   :  { %v6402_v53 = vpop.eup %6401 }
 0x531   :  { %742 = vrot.lane.b32.xlu0 %v6402_v53, %s6907_s22  ;;  %v6404_v55 = vpop.eup %6403 }
 0x532   :  { %v604_v56 = vmul.f32 %v6404_v55, %v602_v54  ;;  %v611_v19 = vsub.f32 1.0, %v6404_v55  ;;  %v617_v22 = vmul.f32 0.0, %v6404_v55 }
 0x535   :  { %606 = vrot.lane.b32.xlu0 %v604_v56, %s6906_s13 }
 0x5a1   :  { %v745_v60 = vpop.permute.xlu1 %744 }
 0x5a2   :  { %v749_v63 = vmul.f32 %v745_v60, %v739_v59 }
 0x5a3   :  { %v743_v2 = vpop.permute.xlu0 %742 }
 0x5a4   :  { %v7236_v3 = vadd.f32 %v757_v62, %v749_v63  ;;  %v748_v5 = vmul.f32 %v743_v2, %v738_v1 }
 0x5a6   :  { %v7238_v8 = vadd.f32 %v756_v4, %v748_v5  ;;  %v761_v10 = vpack.c.bf16 %v7236_v3, %v7236_v3 }
 0x5a7   :  { %v607_v9 = vpop.permute.xlu0 %606 }
 0x5a8   :  { %v760_v51 = vpack.c.bf16 %v7238_v8, %v7238_v8  ;;  %v609_v11 = vadd.f32 %v607_v9, %v530_v38  ;;  %v765_v58 = vunpack.c.l.b16 %v761_v10 }
 0x5aa   :  { %v764_v12 = vunpack.c.l.b16 %v760_v51  ;;  %6405 = vtanh.f32 %v609_v11 }
 0x5ac   :  { %v766_v14 = vrot.slane %v764_v12, 1 }
 0x5ae   :  { %v767_v15 = vsel %vm475_vm3, %v765_v58, %v766_v14 }
 0x5af   :  { %v768_v16 = vpack.c.b16 %v767_v15, %v767_v15 }
 0x5b1   :  { %769 = vrot.lane.b32.xlu1 %v768_v16, %s6907_s22 }
 0x5b7   :  { %v6406_v17 = vpop.eup %6405 }
 0x5b8   :  { %613 = vrot.lane.b32.xlu0 %v6406_v17, %s6907_s22 }
 0x623   :  { %v770_v18 = vpop.permute.xlu1 %769 }
 0x624   :  { %5845 = vmatmul.mubr.msk.bf16.vlgmr.msra.gmra.mxu1 %vm364_vm4, %v770_v18 }
 0x625   :  { %5857 = vmatpush3.bf16.msra.mxu1 %v7121_v6  ;;  %5860 = vmatprep.mubr.msk.bf16.mxu1 %vm6904_vm0, %v6903_v0 }
 0x626   :  { %5858 = vmatprep.subr.bf16.mxu1 %v6903_v0 }
 0x629   :  { %5859 = vmatpush3.bf16.msra.mxu1 %v7127_v7 }
 0x62a   :  { %v614_v20 = vpop.permute.xlu0 %613  ;;  %5872 = vmatprep.subr.bf16.mxu1 %v6903_v0 }
 0x62b   :  { %v616_v24 = vmul.f32 %v614_v20, %v611_v19 }
 0x62c   :  { %5861 = vmatmul.mubr.msk.bf16.vlgmr.msra.gmra.mxu1 %vm364_vm4, %v770_v18 }
 0x62d   :  { %v7255_v25 = vadd.f32 %v617_v22, %v616_v24  ;;  %5873 = vmatpush3.bf16.msra.mxu1 %v7164_v43  ;;  %5876 = vmatprep.mubr.msk.bf16.mxu1 %vm6904_vm0, %v6903_v0  ;;  %v1021_v24 = vrot.slane %v7238_v8, 7 }
 0x62e   :  { %5874 = vmatprep.subr.bf16.mxu1 %v6903_v0 }
 0x62f   :  { %v814_v26 = vpack.c.bf16 %v7255_v25, %v7255_v25 }
 0x631   :  { %816 = vrot.lane.b32.xlu1 %v814_v26, %s6907_s22  ;;  %5875 = vmatpush3.bf16.msra.mxu1 %v7178_v46 }
 0x632   :  { %5888 = vmatprep.subr.bf16.mxu1 %v6903_v0 }
 0x6a3   :  { %v817_v27 = vpop.permute.xlu1 %816 }
 0x6a4   :  { %5853 = vmatmul.mubr.msk.bf16.vlgmr.msra.gmra.mxu0 %vm364_vm4, %v817_v27  ;;  %v1022_v27 = vrot.slane %v7236_v3, 7 }
 0x6a5   :  { %5865 = vmatpush3.bf16.msra.mxu0 %v7159_v42  ;;  %5868 = vmatprep.mubr.msk.bf16.mxu0 %vm6904_vm0, %v6903_v0 }
 0x6a6   :  { %5866 = vmatprep.subr.bf16.mxu0 %v6903_v0 }
 0x6a9   :  { %5867 = vmatpush3.bf16.msra.mxu0 %v7171_v45 }
 0x6aa   :  { %5880 = vmatprep.subr.bf16.mxu0 %v6903_v0 }
 0x6e4   :  { %v808_v28 = vpop.f32.mrf.mxu1 }
 0x6e5   :  { %v809_v4 = vadd.f32 %v7226_v37, %v808_v28 }
 0x6e6   :  { %v5846_v29 = vpop.f32.mrf.mxu1 }
 0x6e8   :  { %v811_v30 = vpop.f32.mrf.mxu1 }
 0x6ea   :  { %v5847_v31 = vpop.f32.mrf.mxu1 }
 0x6ec   :  { %v962_v32 = vpop.f32.mrf.mxu1 }
 0x6ed   :  { %v963_v33 = vadd.f32 %v7137_v13, %v962_v32 }
 0x6ee   :  { %v5862_v34 = vpop.f32.mrf.mxu1 }
 0x6ef   :  { %v969_v36 = vrot.slane %v963_v33, 6  ;;  %v970_v38 = vrot.slane %v963_v33, 7 }
 0x6f0   :  { %v965_v39 = vpop.f32.mrf.mxu1 }
 0x6f1   :  { %989 = vrot.lane.b32.xlu1 %v970_v38, %s6906_s13  ;;  %987 = vrot.lane.b32.xlu0 %v969_v36, %s6906_s13  ;;  %v973_v41 = vadd.f32 %v969_v36, %v7148_v23  ;;  %v974_v44 = vadd.f32 %v970_v38, %v7145_v21 }
 0x6f2   :  { %v5863_v40 = vpop.f32.mrf.mxu1 }
 0x6f3   :  { %v5502_v47 = vmul.f32 -1.442695, %v973_v41  ;;  %v5503_v48 = vmul.f32 -1.442695, %v974_v44 }
 0x6f5   :  { %6407 = vpow2.f32 %v5502_v47 }
 0x6f6   :  { %6409 = vpow2.f32 %v5503_v48 }
 0x702   :  { %v6408_v49 = vpop.eup %6407 }
 0x703   :  { %v6410_v50 = vpop.eup %6409  ;;  %v981_v52 = vadd.f32 1.0, %v6408_v49 }
 0x704   :  { %v982_v53 = vadd.f32 1.0, %v6410_v50 }
 0x705   :  { %6411 = vrcp.f32 %v981_v52 }
 0x706   :  { %6413 = vrcp.f32 %v982_v53 }
 0x712   :  { %v6412_v54 = vpop.eup %6411 }
 0x713   :  { %v6414_v55 = vpop.eup %6413  ;;  %v1007_v26 = vsub.f32 1.0, %v6412_v54  ;;  %v1025_v30 = vmul.f32 %v6412_v54, %v1021_v24 }
 0x714   :  { %v1008_v29 = vsub.f32 1.0, %v6414_v55  ;;  %v1026_v33 = vmul.f32 %v6414_v55, %v1022_v27 }
 0x763   :  { %v988_v56 = vpop.permute.xlu0 %987  ;;  %v990_v57 = vpop.permute.xlu1 %989 }
 0x764   :  { %v993_v59 = vmul.f32 %v6412_v54, %v988_v56  ;;  %v994_v60 = vmul.f32 %v6414_v55, %v990_v57  ;;  %v855_v61 = vpop.f32.mrf.mxu0 }
 0x765   :  { %v856_v63 = vadd.f32 %v7221_v35, %v855_v61 }
 0x766   :  { %997 = vrot.lane.b32.xlu0 %v993_v59, %s6906_s13  ;;  %999 = vrot.lane.b32.xlu1 %v994_v60, %s6906_s13  ;;  %v5854_v62 = vpop.f32.mrf.mxu0 }
 0x767   :  { %v861_v5 = vadd.f32 %v856_v63, %v809_v4 }
 0x768   :  { %v858_v1 = vpop.f32.mrf.mxu0 }
 0x769   :  { %v5500_v9 = vmul.f32 -1.442695, %v861_v5 }
 0x76a   :  { %869 = vrot.lane.b32.xlu0 %v856_v63, %s6906_s13  ;;  %v5855_v2 = vpop.f32.mrf.mxu0 }
 0x76b   :  { %6415 = vpow2.f32 %v5500_v9 }
 0x778   :  { %v6416_v10 = vpop.eup %6415 }
 0x779   :  { %v865_v51 = vadd.f32 1.0, %v6416_v10 }
 0x77b   :  { %6417 = vrcp.f32 %v865_v51 }
 0x788   :  { %v6418_v15 = vpop.eup %6417 }
 0x789   :  { %v879_v50 = vsub.f32 1.0, %v6418_v15  ;;  %v885_v53 = vmul.f32 %v6418_v15, %v7255_v25 }
 0x7d8   :  { %v998_v11 = vpop.permute.xlu0 %997  ;;  %v1000_v12 = vpop.permute.xlu1 %999 }
 0x7d9   :  { %v1003_v58 = vadd.f32 %v998_v11, %v7148_v23  ;;  %v1004_v14 = vadd.f32 %v1000_v12, %v7145_v21 }
 0x7db   :  { %6419 = vtanh.f32 %v1003_v58 }
 0x7dc   :  { %6421 = vtanh.f32 %v1004_v14  ;;  %v870_v16 = vpop.permute.xlu0 %869 }
 0x7dd   :  { %v872_v17 = vmul.f32 %v6418_v15, %v870_v16 }
 0x7df   :  { %874 = vrot.lane.b32.xlu1 %v872_v17, %s6906_s13 }
 0x7e8   :  { %v6420_v18 = vpop.eup %6419 }
 0x7e9   :  { %v6422_v19 = vpop.eup %6421  ;;  %1011 = vrot.lane.b32.xlu0 %v6420_v18, %s6907_s22 }
 0x7ea   :  { %1013 = vrot.lane.b32.xlu1 %v6422_v19, %s6907_s22 }
 0x851   :  { %v875_v20 = vpop.permute.xlu1 %874 }
 0x852   :  { %v877_v22 = vadd.f32 %v875_v20, %v809_v4 }
 0x854   :  { %6423 = vtanh.f32 %v877_v22 }
 0x85b   :  { %v1012_v28 = vpop.permute.xlu0 %1011 }
 0x85c   :  { %v1017_v31 = vmul.f32 %v1012_v28, %v1007_v26  ;;  %v1014_v32 = vpop.permute.xlu1 %1013 }
 0x85d   :  { %v1018_v34 = vmul.f32 %v1014_v32, %v1008_v29 }
 0x85e   :  { %v7290_v36 = vadd.f32 %v1025_v30, %v1017_v31 }
 0x85f   :  { %v7292_v38 = vadd.f32 %v1026_v33, %v1018_v34 }
 0x860   :  { %v1029_v39 = vpack.c.bf16 %v7290_v36, %v7290_v36 }
 0x861   :  { %v6424_v40 = vpop.eup %6423  ;;  %v1030_v8 = vpack.c.bf16 %v7292_v38, %v7292_v38 }
 0x862   :  { %v1033_v41 = vunpack.c.l.b16 %v1029_v39  ;;  %881 = vrot.lane.b32.xlu0 %v6424_v40, %s6907_s22 }
 0x863   :  { %v1034_v3 = vunpack.c.l.b16 %v1030_v8 }
 0x864   :  { %v1035_v44 = vrot.slane %v1033_v41, 2 }
 0x865   :  { %v1036_v47 = vrot.slane %v1034_v3, 1 }
 0x867   :  { %v1037_v48 = vsel %vm475_vm3, %v1036_v47, %v1035_v44 }
 0x868   :  { %v1038_v49 = vpack.c.b16 %v1037_v48, %v1037_v48 }
 0x86a   :  { %1039 = vrot.lane.b32.xlu1 %v1038_v49, %s6907_s22 }
 0x8d4   :  { %v882_v52 = vpop.permute.xlu0 %881 }
 0x8d5   :  { %v884_v54 = vmul.f32 %v882_v52, %v879_v50 }
 0x8d7   :  { %v7302_v55 = vadd.f32 %v885_v53, %v884_v54 }
 0x8d9   :  { %v1084_v56 = vpack.c.bf16 %v7302_v55, %v7302_v55 }
 0x8db   :  { %1086 = vrot.lane.b32.xlu0 %v1084_v56, %s6907_s22 }
 0x8dc   :  { %v1040_v57 = vpop.permute.xlu1 %1039 }
 0x8dd   :  { %5869 = vmatmul.mubr.msk.bf16.vlgmr.msra.gmra.mxu0 %vm364_vm4, %v1040_v57 }
 0x8de   :  { %5881 = vmatpush3.bf16.msra.mxu0 %v7121_v6  ;;  %5884 = vmatprep.mubr.msk.bf16.mxu0 %vm6904_vm0, %v6903_v0 }
 0x8df   :  { %5882 = vmatprep.subr.bf16.mxu0 %v6903_v0 }
 0x8e2   :  { %5883 = vmatpush3.bf16.msra.mxu0 %v7127_v7 }
 0x8e3   :  { %5896 = vmatprep.subr.bf16.mxu0 %v6903_v0 }
 0x8e5   :  { %5885 = vmatmul.mubr.msk.bf16.vlgmr.msra.gmra.mxu0 %vm364_vm4, %v1040_v57 }
 0x8e6   :  { %5897 = vmatpush3.bf16.msra.mxu0 %v7164_v43  ;;  %5900 = vmatprep.mubr.msk.bf16.mxu0 %vm6904_vm0, %v6903_v0 }
 0x8e7   :  { %5898 = vmatprep.subr.bf16.mxu0 %v6903_v0 }
 0x8ea   :  { %5899 = vmatpush3.bf16.msra.mxu0 %v7178_v46 }
 0x8eb   :  { %5912 = vmatprep.subr.bf16.mxu0 %v6903_v0 }
 0x94d   :  { %v1087_v59 = vpop.permute.xlu0 %1086 }
 0x94e   :  { %5877 = vmatmul.mubr.msk.bf16.vlgmr.msra.gmra.mxu1 %vm364_vm4, %v1087_v59  ;;  %v1292_v59 = vrot.slane %v7292_v38, 7 }
 0x94f   :  { %5889 = vmatpush3.bf16.msra.mxu1 %v7159_v42  ;;  %5892 = vmatprep.mubr.msk.bf16.mxu1 %vm6904_vm0, %v6903_v0 }
 0x950   :  { %5890 = vmatprep.subr.bf16.mxu1 %v6903_v0 }
 0x953   :  { %5891 = vmatpush3.bf16.msra.mxu1 %v7171_v45 }
 0x954   :  { %5904 = vmatprep.subr.bf16.mxu1 %v6903_v0 }
 0x99d   :  { %v1078_v60 = vpop.f32.mrf.mxu0 }
 0x99e   :  { %v1079_v33 = vadd.f32 %v7226_v37, %v1078_v60 }
 0x99f   :  { %v5870_v61 = vpop.f32.mrf.mxu0 }
 0x9a0   :  { %v1291_v61 = vrot.slane %v7290_v36, 7 }
 0x9a1   :  { %v1081_v62 = vpop.f32.mrf.mxu0 }
 0x9a3   :  { %v5871_v63 = vpop.f32.mrf.mxu0 }
 0x9a5   :  { %v1232_v1 = vpop.f32.mrf.mxu0 }
 0x9a6   :  { %v1233_v2 = vadd.f32 %v7137_v13, %v1232_v1 }
 0x9a7   :  { %v5886_v4 = vpop.f32.mrf.mxu0 }
 0x9a8   :  { %v1239_v5 = vrot.slane %v1233_v2, 5  ;;  %v1240_v9 = vrot.slane %v1233_v2, 6 }
 0x9a9   :  { %v1235_v10 = vpop.f32.mrf.mxu0 }
 0x9aa   :  { %1259 = vrot.lane.b32.xlu0 %v1240_v9, %s6906_s13  ;;  %1257 = vrot.lane.b32.xlu1 %v1239_v5, %s6906_s13  ;;  %v1243_v11 = vadd.f32 %v1239_v5, %v7148_v23  ;;  %v1244_v12 = vadd.f32 %v1240_v9, %v7145_v21 }
 0x9ab   :  { %v5887_v51 = vpop.f32.mrf.mxu0 }
 0x9ac   :  { %v5508_v58 = vmul.f32 -1.442695, %v1243_v11  ;;  %v5509_v14 = vmul.f32 -1.442695, %v1244_v12 }
 0x9ae   :  { %6425 = vpow2.f32 %v5508_v58 }
 0x9af   :  { %6427 = vpow2.f32 %v5509_v14 }
 0x9bb   :  { %v6426_v15 = vpop.eup %6425 }
 0x9bc   :  { %v6428_v16 = vpop.eup %6427  ;;  %v1251_v17 = vadd.f32 1.0, %v6426_v15 }
 0x9bd   :  { %v1252_v18 = vadd.f32 1.0, %v6428_v16 }
 0x9be   :  { %6429 = vrcp.f32 %v1251_v17 }
 0x9bf   :  { %6431 = vrcp.f32 %v1252_v18 }
 0x9cb   :  { %v6430_v27 = vpop.eup %6429 }
 0x9cc   :  { %v6432_v28 = vpop.eup %6431  ;;  %v1277_v62 = vsub.f32 1.0, %v6430_v27  ;;  %v1295_v5 = vmul.f32 %v6430_v27, %v1291_v61 }
 0x9cd   :  { %v1278_v60 = vsub.f32 1.0, %v6432_v28  ;;  %v1296_v2 = vmul.f32 %v6432_v28, %v1292_v59 }
 0xa0e   :  { %v1125_v19 = vpop.f32.mrf.mxu1 }
 0xa0f   :  { %v1126_v20 = vadd.f32 %v7221_v35, %v1125_v19 }
 0xa10   :  { %v5878_v22 = vpop.f32.mrf.mxu1 }
 0xa11   :  { %1139 = vrot.lane.b32.xlu1 %v1126_v20, %s6906_s13  ;;  %v1131_v34 = vadd.f32 %v1126_v20, %v1079_v33 }
 0xa12   :  { %v1128_v24 = vpop.f32.mrf.mxu1 }
 0xa13   :  { %v5506_v39 = vmul.f32 -1.442695, %v1131_v34 }
 0xa14   :  { %v5879_v26 = vpop.f32.mrf.mxu1 }
 0xa15   :  { %6433 = vpow2.f32 %v5506_v39 }
 0xa1c   :  { %v1260_v29 = vpop.permute.xlu0 %1259  ;;  %v1258_v30 = vpop.permute.xlu1 %1257 }
 0xa1d   :  { %v1264_v31 = vmul.f32 %v6432_v28, %v1260_v29  ;;  %v1263_v32 = vmul.f32 %v6430_v27, %v1258_v30 }
 0xa1f   :  { %1269 = vrot.lane.b32.xlu1 %v1264_v31, %s6906_s13  ;;  %1267 = vrot.lane.b32.xlu0 %v1263_v32, %s6906_s13 }
 0xa22   :  { %v6434_v40 = vpop.eup %6433 }
 0xa23   :  { %v1135_v8 = vadd.f32 1.0, %v6434_v40 }
 0xa25   :  { %6435 = vrcp.f32 %v1135_v8 }
 0xa32   :  { %v6436_v41 = vpop.eup %6435 }
 0xa33   :  { %v1149_v17 = vsub.f32 1.0, %v6436_v41  ;;  %v1155_v19 = vmul.f32 %v6436_v41, %v7302_v55 }
 0xa83   :  { %v1140_v3 = vpop.permute.xlu1 %1139 }
 0xa84   :  { %v1142_v44 = vmul.f32 %v6436_v41, %v1140_v3 }
 0xa86   :  { %1144 = vrot.lane.b32.xlu0 %v1142_v44, %s6906_s13 }
 0xa91   :  { %v1270_v47 = vpop.permute.xlu1 %1269  ;;  %v1268_v48 = vpop.permute.xlu0 %1267 }
 0xa92   :  { %v1274_v49 = vadd.f32 %v1270_v47, %v7145_v21  ;;  %v1273_v50 = vadd.f32 %v1268_v48, %v7148_v23 }
 0xa94   :  { %6437 = vtanh.f32 %v1274_v49 }
 0xa95   :  { %6439 = vtanh.f32 %v1273_v50 }
 0xaa1   :  { %v6438_v52 = vpop.eup %6437 }
 0xaa2   :  { %v6440_v53 = vpop.eup %6439  ;;  %1283 = vrot.lane.b32.xlu0 %v6438_v52, %s6907_s22 }
 0xaa3   :  { %1281 = vrot.lane.b32.xlu1 %v6440_v53, %s6907_s22 }
 0xaf8   :  { %v1145_v54 = vpop.permute.xlu0 %1144 }
 0xaf9   :  { %v1147_v56 = vadd.f32 %v1145_v54, %v1079_v33 }
 0xafb   :  { %6441 = vtanh.f32 %v1147_v56 }
 0xb08   :  { %v6442_v57 = vpop.eup %6441 }
 0xb09   :  { %1151 = vrot.lane.b32.xlu1 %v6442_v57, %s6907_s22 }
 0xb14   :  { %v1284_v63 = vpop.permute.xlu0 %1283 }
 0xb15   :  { %v1282_v1 = vpop.permute.xlu1 %1281  ;;  %v1288_v4 = vmul.f32 %v1284_v63, %v1278_v60 }
 0xb16   :  { %v1287_v9 = vmul.f32 %v1282_v1, %v1277_v62 }
 0xb17   :  { %v7346_v10 = vadd.f32 %v1296_v2, %v1288_v4 }
 0xb18   :  { %v7348_v51 = vadd.f32 %v1295_v5, %v1287_v9 }
 0xb19   :  { %v1300_v11 = vpack.c.bf16 %v7346_v10, %v7346_v10 }
 0xb1a   :  { %v1299_v38 = vpack.c.bf16 %v7348_v51, %v7348_v51 }
 0xb1b   :  { %v1304_v12 = vunpack.c.l.b16 %v1300_v11 }
 0xb1c   :  { %v1303_v58 = vunpack.c.l.b16 %v1299_v38 }
 0xb1d   :  { %v1306_v36 = vrot.slane %v1304_v12, 2 }
 0xb1e   :  { %v1305_v14 = vrot.slane %v1303_v58, 3 }
 0xb20   :  { %v1307_v15 = vsel %vm475_vm3, %v1306_v36, %v1305_v14 }
 0xb21   :  { %v1308_v16 = vpack.c.b16 %v1307_v15, %v1307_v15 }
 0xb23   :  { %1309 = vrot.lane.b32.xlu0 %v1308_v16, %s6907_s22 }
 0xb7b   :  { %v1152_v18 = vpop.permute.xlu1 %1151 }
 0xb7c   :  { %v1154_v20 = vmul.f32 %v1152_v18, %v1149_v17 }
 0xb7e   :  { %v7357_v22 = vadd.f32 %v1155_v19, %v1154_v20 }
 0xb80   :  { %v1354_v24 = vpack.c.bf16 %v7357_v22, %v7357_v22 }
 0xb82   :  { %1356 = vrot.lane.b32.xlu1 %v1354_v24, %s6907_s22  ;;  %v1561_v24 = vrot.slane %v7348_v51, 7 }
 0xb95   :  { %v1310_v26 = vpop.permute.xlu0 %1309 }
 0xb96   :  { %5893 = vmatmul.mubr.msk.bf16.vlgmr.msra.gmra.mxu1 %vm364_vm4, %v1310_v26 }
 0xb97   :  { %5905 = vmatpush3.bf16.msra.mxu1 %v7121_v6  ;;  %5908 = vmatprep.mubr.msk.bf16.mxu1 %vm6904_vm0, %v6903_v0 }
 0xb98   :  { %5906 = vmatprep.subr.bf16.mxu1 %v6903_v0 }
 0xb9b   :  { %5907 = vmatpush3.bf16.msra.mxu1 %v7127_v7 }
 0xb9c   :  { %5920 = vmatprep.subr.bf16.mxu1 %v6903_v0 }
 0xb9e   :  { %5909 = vmatmul.mubr.msk.bf16.vlgmr.msra.gmra.mxu1 %vm364_vm4, %v1310_v26 }
 0xb9f   :  { %5921 = vmatpush3.bf16.msra.mxu1 %v7164_v43  ;;  %5924 = vmatprep.mubr.msk.bf16.mxu1 %vm6904_vm0, %v6903_v0 }
 0xba0   :  { %5922 = vmatprep.subr.bf16.mxu1 %v6903_v0 }
 0xba3   :  { %5923 = vmatpush3.bf16.msra.mxu1 %v7178_v46 }
 0xba4   :  { %5936 = vmatprep.subr.bf16.mxu1 %v6903_v0 }
 0xbf4   :  { %v1357_v6 = vpop.permute.xlu1 %1356 }
 0xbf5   :  { %5901 = vmatmul.mubr.msk.bf16.vlgmr.msra.gmra.mxu0 %vm364_vm4, %v1357_v6  ;;  %v1562_v6 = vrot.slane %v7346_v10, 7 }
 0xbf6   :  { %5913 = vmatpush3.bf16.msra.mxu0 %v7159_v42  ;;  %5916 = vmatprep.mubr.msk.bf16.mxu0 %vm6904_vm0, %v6903_v0 }
 0xbf7   :  { %5914 = vmatprep.subr.bf16.mxu0 %v6903_v0 }
 0xbfa   :  { %5915 = vmatpush3.bf16.msra.mxu0 %v7171_v45 }
 0xbfb   :  { %5928 = vmatprep.subr.bf16.mxu0 %v6903_v0 }
 0xc56   :  { %v1348_v7 = vpop.f32.mrf.mxu1 }
 0xc57   :  { %v1349_v1 = vadd.f32 %v7226_v37, %v1348_v7 }
 0xc58   :  { %v5894_v27 = vpop.f32.mrf.mxu1 }
 0xc5a   :  { %v1351_v28 = vpop.f32.mrf.mxu1 }
 0xc5c   :  { %v5895_v29 = vpop.f32.mrf.mxu1 }
 0xc5e   :  { %v1502_v30 = vpop.f32.mrf.mxu1 }
 0xc5f   :  { %v1503_v31 = vadd.f32 %v7137_v13, %v1502_v30 }
 0xc60   :  { %v5910_v32 = vpop.f32.mrf.mxu1 }
 0xc61   :  { %v1509_v33 = vrot.slane %v1503_v31, 4  ;;  %v1510_v34 = vrot.slane %v1503_v31, 5 }
 0xc62   :  { %v1505_v39 = vpop.f32.mrf.mxu1 }
 0xc63   :  { %1529 = vrot.lane.b32.xlu1 %v1510_v34, %s6906_s13  ;;  %1527 = vrot.lane.b32.xlu0 %v1509_v33, %s6906_s13  ;;  %v1513_v8 = vadd.f32 %v1509_v33, %v7148_v23  ;;  %v1514_v41 = vadd.f32 %v1510_v34, %v7145_v21 }
 0xc64   :  { %v5911_v40 = vpop.f32.mrf.mxu1 }
 0xc65   :  { %v5514_v3 = vmul.f32 -1.442695, %v1513_v8  ;;  %v5515_v44 = vmul.f32 -1.442695, %v1514_v41 }
 0xc67   :  { %6443 = vpow2.f32 %v5514_v3 }
 0xc68   :  { %6445 = vpow2.f32 %v5515_v44 }
 0xc74   :  { %v6444_v52 = vpop.eup %6443 }
 0xc75   :  { %v6446_v53 = vpop.eup %6445  ;;  %v1521_v54 = vadd.f32 1.0, %v6444_v52 }
 0xc76   :  { %v1522_v56 = vadd.f32 1.0, %v6446_v53 }
 0xc77   :  { %6447 = vrcp.f32 %v1521_v54  ;;  %v7421_v54 = vld [vmem:[%s8314_s20 + $0x8] sm:$0xff]  }
 0xc78   :  { %6449 = vrcp.f32 %v1522_v56  ;;  %v7430_v56 = vld [vmem:[%s8314_s20] sm:$0xff]   ;;  %s6914_s20 = smov 24  }
 0xc84   :  { %v6448_v57 = vpop.eup %6447 }
 0xc85   :  { %v6450_v59 = vpop.eup %6449  ;;  %v1547_v26 = vsub.f32 1.0, %v6448_v57  ;;  %v1565_v28 = vmul.f32 %v6448_v57, %v1561_v24 }
 0xc86   :  { %v1548_v27 = vsub.f32 1.0, %v6450_v59  ;;  %v1566_v31 = vmul.f32 %v6450_v59, %v1562_v6 }
 0xcb5   :  { %v1395_v47 = vpop.f32.mrf.mxu0 }
 0xcb6   :  { %v1396_v13 = vadd.f32 %v7221_v35, %v1395_v47 }
 0xcb7   :  { %v5902_v48 = vpop.f32.mrf.mxu0 }
 0xcb8   :  { %1409 = vrot.lane.b32.xlu0 %v1396_v13, %s6906_s13  ;;  %v1401_v2 = vadd.f32 %v1396_v13, %v1349_v1 }
 0xcb9   :  { %v1398_v49 = vpop.f32.mrf.mxu0 }
 0xcba   :  { %v5512_v4 = vmul.f32 -1.442695, %v1401_v2 }
 0xcbb   :  { %v5903_v50 = vpop.f32.mrf.mxu0 }
 0xcbc   :  { %6451 = vpow2.f32 %v5512_v4 }
 0xcc9   :  { %v6452_v5 = vpop.eup %6451 }
 0xcca   :  { %v1405_v9 = vadd.f32 1.0, %v6452_v5 }
 0xccc   :  { %6453 = vrcp.f32 %v1405_v9 }
 0xcd5   :  { %v1530_v60 = vpop.permute.xlu1 %1529  ;;  %v1528_v61 = vpop.permute.xlu0 %1527 }
 0xcd6   :  { %v1534_v62 = vmul.f32 %v6450_v59, %v1530_v60  ;;  %v1533_v63 = vmul.f32 %v6448_v57, %v1528_v61 }
 0xcd8   :  { %1537 = vrot.lane.b32.xlu1 %v1533_v63, %s6906_s13  ;;  %1539 = vrot.lane.b32.xlu0 %v1534_v62, %s6906_s13  ;;  %v7448_v62 = vld [vmem:[#allocation2] ss:$0 sm:$0xff] }
 0xcd9   :  { %v6454_v11 = vpop.eup %6453 }
 0xcda   :  { %v1419_v47 = vsub.f32 1.0, %v6454_v11  ;;  %v1425_v48 = vmul.f32 %v6454_v11, %v7357_v22 }
 0xd2a   :  { %v1410_v38 = vpop.permute.xlu0 %1409 }
 0xd2b   :  { %v1412_v12 = vmul.f32 %v6454_v11, %v1410_v38 }
 0xd2d   :  { %1414 = vrot.lane.b32.xlu1 %v1412_v12, %s6906_s13 }
 0xd4a   :  { %v1538_v58 = vpop.permute.xlu1 %1537  ;;  %v1540_v36 = vpop.permute.xlu0 %1539 }
 0xd4b   :  { %v1543_v14 = vadd.f32 %v1538_v58, %v7148_v23  ;;  %v1544_v15 = vadd.f32 %v1540_v36, %v7145_v21 }
 0xd4d   :  { %6455 = vtanh.f32 %v1543_v14 }
 0xd4e   :  { %6457 = vtanh.f32 %v1544_v15 }
 0xd5a   :  { %v6456_v16 = vpop.eup %6455 }
 0xd5b   :  { %v6458_v17 = vpop.eup %6457  ;;  %1551 = vrot.lane.b32.xlu0 %v6456_v16, %s6907_s22 }
 0xd5c   :  { %1553 = vrot.lane.b32.xlu1 %v6458_v17, %s6907_s22 }
 0xd9f   :  { %v1415_v18 = vpop.permute.xlu1 %1414 }
 0xda0   :  { %v1417_v19 = vadd.f32 %v1415_v18, %v1349_v1 }
 0xda2   :  { %6459 = vtanh.f32 %v1417_v19 }
 0xdaf   :  { %v6460_v20 = vpop.eup %6459 }
 0xdb0   :  { %1421 = vrot.lane.b32.xlu0 %v6460_v20, %s6907_s22 }
 0xdcd   :  { %v1552_v7 = vpop.permute.xlu0 %1551 }
 0xdce   :  { %v1557_v29 = vmul.f32 %v1552_v7, %v1547_v26  ;;  %v1554_v30 = vpop.permute.xlu1 %1553 }
 0xdcf   :  { %v1558_v32 = vmul.f32 %v1554_v30, %v1548_v27 }
 0xdd0   :  { %v7401_v33 = vadd.f32 %v1565_v28, %v1557_v29 }
 0xdd1   :  { %v7403_v34 = vadd.f32 %v1566_v31, %v1558_v32 }
 0xdd2   :  { %v1569_v39 = vpack.c.bf16 %v7401_v33, %v7401_v33 }
 0xdd3   :  { %v1570_v51 = vpack.c.bf16 %v7403_v34, %v7403_v34 }
 0xdd4   :  { %v1573_v40 = vunpack.c.l.b16 %v1569_v39 }
 0xdd5   :  { %v1574_v8 = vunpack.c.l.b16 %v1570_v51 }
 0xdd6   :  { %v1575_v10 = vrot.slane %v1573_v40, 4 }
 0xdd7   :  { %v1576_v41 = vrot.slane %v1574_v8, 3 }
 0xdd9   :  { %v1577_v3 = vsel %vm475_vm3, %v1576_v41, %v1575_v10 }
 0xdda   :  { %v1578_v44 = vpack.c.b16 %v1577_v3, %v1577_v3 }
 0xddc   :  { %1579 = vrot.lane.b32.xlu1 %v1578_v44, %s6907_s22 }
 0xe22   :  { %v1422_v13 = vpop.permute.xlu0 %1421 }
 0xe23   :  { %v1424_v49 = vmul.f32 %v1422_v13, %v1419_v47 }
 0xe25   :  { %v7412_v50 = vadd.f32 %v1425_v48, %v1424_v49  ;;  %v1832_v48 = vrot.slane %v7403_v34, 7 }
 0xe27   :  { %v1624_v52 = vpack.c.bf16 %v7412_v50, %v7412_v50 }
 0xe29   :  { %1626 = vrot.lane.b32.xlu0 %v1624_v52, %s6907_s22  ;;  %v1831_v52 = vrot.slane %v7401_v33, 7 }
 0xe4e   :  { %v1580_v53 = vpop.permute.xlu1 %1579 }
 0xe4f   :  { %5917 = vmatmul.mubr.msk.bf16.vlgmr.msra.gmra.mxu0 %vm364_vm4, %v1580_v53 }
 0xe50   :  { %5929 = vmatpush3.bf16.msra.mxu0 %v7421_v54  ;;  %5932 = vmatprep.mubr.msk.bf16.mxu0 %vm6904_vm0, %v6903_v0 }
 0xe51   :  { %5930 = vmatprep.subr.bf16.mxu0 %v6903_v0 }
 0xe54   :  { %5931 = vmatpush3.bf16.msra.mxu0 %v7430_v56 }
 0xe55   :  { %5944 = vmatprep.subr.bf16.mxu0 %v6903_v0 }
 0xe57   :  { %5933 = vmatmul.mubr.msk.bf16.vlgmr.msra.gmra.mxu0 %vm364_vm4, %v1580_v53 }
 0xe58   :  { %5945 = vmatpush3.bf16.msra.mxu0 %v7164_v43  ;;  %5948 = vmatprep.mubr.msk.bf16.mxu0 %vm6904_vm0, %v6903_v0 }
 0xe59   :  { %5946 = vmatprep.subr.bf16.mxu0 %v6903_v0 }
 0xe5c   :  { %5947 = vmatpush3.bf16.msra.mxu0 %v7178_v46 }
 0xe5d   :  { %5960 = vmatprep.subr.bf16.mxu0 %v6903_v0 }
 0xe9b   :  { %v1627_v57 = vpop.permute.xlu0 %1626 }
 0xe9c   :  { %5925 = vmatmul.mubr.msk.bf16.vlgmr.msra.gmra.mxu1 %vm364_vm4, %v1627_v57 }
 0xe9d   :  { %5937 = vmatpush3.bf16.msra.mxu1 %v7159_v42  ;;  %5940 = vmatprep.mubr.msk.bf16.mxu1 %vm6904_vm0, %v6903_v0 }
 0xe9e   :  { %5938 = vmatprep.subr.bf16.mxu1 %v6903_v0 }
 0xea1   :  { %5939 = vmatpush3.bf16.msra.mxu1 %v7171_v45 }
 0xea2   :  { %5952 = vmatprep.subr.bf16.mxu1 %v6903_v0 }
 0xf0f   :  { %v1618_v43 = vpop.f32.mrf.mxu0 }
 0xf10   :  { %v1619_v27 = vadd.f32 %v7226_v37, %v1618_v43 }
 0xf11   :  { %v5918_v59 = vpop.f32.mrf.mxu0 }
 0xf13   :  { %v1621_v60 = vpop.f32.mrf.mxu0 }
 0xf15   :  { %v5919_v46 = vpop.f32.mrf.mxu0 }
 0xf17   :  { %v1772_v61 = vpop.f32.mrf.mxu0 }
 0xf18   :  { %v1773_v63 = vadd.f32 %v7448_v62, %v1772_v61 }
 0xf19   :  { %v5934_v1 = vpop.f32.mrf.mxu0 }
 0xf1a   :  { %v1779_v42 = vrot.slane %v1773_v63, 3  ;;  %v1780_v2 = vrot.slane %v1773_v63, 4 }
 0xf1b   :  { %v1775_v4 = vpop.f32.mrf.mxu0 }
 0xf1c   :  { %1799 = vrot.lane.b32.xlu0 %v1780_v2, %s6906_s13  ;;  %1797 = vrot.lane.b32.xlu1 %v1779_v42, %s6906_s13  ;;  %v1783_v58 = vadd.f32 %v1779_v42, %v7148_v23  ;;  %v1784_v36 = vadd.f32 %v1780_v2, %v7145_v21 }
 0xf1d   :  { %v5935_v45 = vpop.f32.mrf.mxu0 }
 0xf1e   :  { %v5520_v14 = vmul.f32 -1.442695, %v1783_v58  ;;  %v5521_v15 = vmul.f32 -1.442695, %v1784_v36 }
 0xf20   :  { %6461 = vpow2.f32 %v5520_v14 }
 0xf21   :  { %6463 = vpow2.f32 %v5521_v15 }
 0xf2d   :  { %v6462_v16 = vpop.eup %6461 }
 0xf2e   :  { %v6464_v17 = vpop.eup %6463  ;;  %v1791_v18 = vadd.f32 1.0, %v6462_v16  ;;  %v7495_v16 = vld [vmem:[%s8317_s27 + $0x8] sm:$0xff]  }
 0xf2f   :  { %v1792_v19 = vadd.f32 1.0, %v6464_v17  ;;  %v7504_v17 = vld [vmem:[%s8317_s27] sm:$0xff]  }
 0xf30   :  { %6465 = vrcp.f32 %v1791_v18 }
 0xf31   :  { %6467 = vrcp.f32 %v1792_v19  ;;  %v7512_v19 = vld [vmem:[%s8316_s5 + $0x8] sm:$0xff]  }
 0xf5c   :  { %v1665_v5 = vpop.f32.mrf.mxu1 }
 0xf5d   :  { %v1666_v9 = vadd.f32 %v7221_v35, %v1665_v5  ;;  %v6466_v35 = vpop.eup %6465 }
 0xf5e   :  { %v5926_v11 = vpop.f32.mrf.mxu1  ;;  %v6468_v20 = vpop.eup %6467  ;;  %v1817_v53 = vsub.f32 1.0, %v6466_v35  ;;  %v1835_v46 = vmul.f32 %v6466_v35, %v1831_v52  ;;  %v7534_v52 = vld [vmem:[#allocation4] ss:$0 sm:$0xff] }
 0xf5f   :  { %1679 = vrot.lane.b32.xlu1 %v1666_v9, %s6906_s13  ;;  %v1671_v28 = vadd.f32 %v1666_v9, %v1619_v27  ;;  %v1818_v49 = vsub.f32 1.0, %v6468_v20  ;;  %v1836_v59 = vmul.f32 %v6468_v20, %v1832_v48 }
 0xf60   :  { %v1668_v38 = vpop.f32.mrf.mxu1 }
 0xf61   :  { %v5518_v29 = vmul.f32 -1.442695, %v1671_v28 }
 0xf62   :  { %v5927_v12 = vpop.f32.mrf.mxu1 }
 0xf63   :  { %6469 = vpow2.f32 %v5518_v29 }
 0xf70   :  { %v6470_v30 = vpop.eup %6469 }
 0xf71   :  { %v1675_v31 = vadd.f32 1.0, %v6470_v30 }
 0xf73   :  { %6471 = vrcp.f32 %v1675_v31 }
 0xf80   :  { %v6472_v32 = vpop.eup %6471 }
 0xf81   :  { %v1689_v11 = vsub.f32 1.0, %v6472_v32  ;;  %v1695_v12 = vmul.f32 %v6472_v32, %v7412_v50 }
 0xf8e   :  { %v1800_v24 = vpop.permute.xlu0 %1799  ;;  %v1798_v26 = vpop.permute.xlu1 %1797 }
 0xf8f   :  { %v1804_v6 = vmul.f32 %v6468_v20, %v1800_v24  ;;  %v1803_v7 = vmul.f32 %v6466_v35, %v1798_v26  ;;  %v7521_v35 = vld [vmem:[%s8316_s5] sm:$0xff]   ;;  %s6908_s5 = smov 32  }
 0xf91   :  { %1809 = vrot.lane.b32.xlu1 %v1804_v6, %s6906_s13  ;;  %1807 = vrot.lane.b32.xlu0 %v1803_v7, %s6906_s13 }
 0xfd1   :  { %v1680_v39 = vpop.permute.xlu1 %1679 }
 0xfd2   :  { %v1682_v51 = vmul.f32 %v6472_v32, %v1680_v39  ;;  %v7527_v39 = vld [vmem:[#allocation6] ss:$0 sm:$0xff] }
 0xfd4   :  { %1684 = vrot.lane.b32.xlu0 %v1682_v51, %s6906_s13 }
0x1003   :  { %v1810_v40 = vpop.permute.xlu1 %1809  ;;  %v1808_v8 = vpop.permute.xlu0 %1807 }
0x1004   :  { %v1814_v10 = vadd.f32 %v1810_v40, %v7145_v21  ;;  %v1813_v41 = vadd.f32 %v1808_v8, %v7148_v23 }
0x1006   :  { %6473 = vtanh.f32 %v1814_v10 }
0x1007   :  { %6475 = vtanh.f32 %v1813_v41 }
0x1013   :  { %v6474_v37 = vpop.eup %6473 }
0x1014   :  { %v6476_v3 = vpop.eup %6475  ;;  %1823 = vrot.lane.b32.xlu0 %v6474_v37, %s6907_s22 }
0x1015   :  { %1821 = vrot.lane.b32.xlu1 %v6476_v3, %s6907_s22 }
0x1046   :  { %v1685_v44 = vpop.permute.xlu0 %1684 }
0x1047   :  { %v1687_v47 = vadd.f32 %v1685_v44, %v1619_v27 }
0x1049   :  { %6477 = vtanh.f32 %v1687_v47 }
0x1056   :  { %v6478_v13 = vpop.eup %6477 }
0x1057   :  { %1691 = vrot.lane.b32.xlu1 %v6478_v13, %s6907_s22 }
0x1086   :  { %v1824_v57 = vpop.permute.xlu0 %1823 }
0x1087   :  { %v1822_v43 = vpop.permute.xlu1 %1821  ;;  %v1828_v60 = vmul.f32 %v1824_v57, %v1818_v49 }
0x1088   :  { %v1827_v61 = vmul.f32 %v1822_v43, %v1817_v53 }
0x1089   :  { %v7468_v63 = vadd.f32 %v1836_v59, %v1828_v60 }
0x108a   :  { %v7470_v1 = vadd.f32 %v1835_v46, %v1827_v61 }
0x108b   :  { %v1840_v42 = vpack.c.bf16 %v7468_v63, %v7468_v63 }
0x108c   :  { %v1839_v34 = vpack.c.bf16 %v7470_v1, %v7470_v1 }
0x108d   :  { %v1844_v2 = vunpack.c.l.b16 %v1840_v42 }
0x108e   :  { %v1843_v4 = vunpack.c.l.b16 %v1839_v34 }
0x108f   :  { %v1846_v33 = vrot.slane %v1844_v2, 4 }
0x1090   :  { %v1845_v45 = vrot.slane %v1843_v4, 5 }
0x1092   :  { %v1847_v5 = vsel %vm475_vm3, %v1846_v33, %v1845_v45 }
0x1093   :  { %v1848_v9 = vpack.c.b16 %v1847_v5, %v1847_v5 }
0x1095   :  { %1849 = vrot.lane.b32.xlu0 %v1848_v9, %s6907_s22 }
0x10c9   :  { %v1692_v38 = vpop.permute.xlu1 %1691 }
0x10ca   :  { %v1694_v58 = vmul.f32 %v1692_v38, %v1689_v11 }
0x10cc   :  { %v7479_v36 = vadd.f32 %v1695_v12, %v1694_v58 }
0x10ce   :  { %v1894_v14 = vpack.c.bf16 %v7479_v36, %v7479_v36 }
0x10d0   :  { %1896 = vrot.lane.b32.xlu1 %v1894_v14, %s6907_s22 }
0x1107   :  { %v1850_v15 = vpop.permute.xlu0 %1849 }
0x1108   :  { %5941 = vmatmul.mubr.msk.bf16.vlgmr.msra.gmra.mxu1 %vm364_vm4, %v1850_v15 }
0x1109   :  { %5953 = vmatpush3.bf16.msra.mxu1 %v7421_v54  ;;  %5956 = vmatprep.mubr.msk.bf16.mxu1 %vm6904_vm0, %v6903_v0 }
0x110a   :  { %5954 = vmatprep.subr.bf16.mxu1 %v6903_v0 }
0x110d   :  { %5955 = vmatpush3.bf16.msra.mxu1 %v7430_v56 }
0x110e   :  { %5968 = vmatprep.subr.bf16.mxu1 %v6903_v0 }
0x1110   :  { %5957 = vmatmul.mubr.msk.bf16.vlgmr.msra.gmra.mxu1 %vm364_vm4, %v1850_v15 }
0x1111   :  { %5969 = vmatpush3.bf16.msra.mxu1 %v7495_v16  ;;  %5972 = vmatprep.mubr.msk.bf16.mxu1 %vm6904_vm0, %v6903_v0 }
0x1112   :  { %5970 = vmatprep.subr.bf16.mxu1 %v6903_v0 }
0x1115   :  { %5971 = vmatpush3.bf16.msra.mxu1 %v7504_v17 }
0x1116   :  { %5984 = vmatprep.subr.bf16.mxu1 %v6903_v0 }
0x1142   :  { %v1897_v18 = vpop.permute.xlu1 %1896 }
0x1143   :  { %5949 = vmatmul.mubr.msk.bf16.vlgmr.msra.gmra.mxu0 %vm364_vm4, %v1897_v18 }
0x1144   :  { %5961 = vmatpush3.bf16.msra.mxu0 %v7512_v19  ;;  %5964 = vmatprep.mubr.msk.bf16.mxu0 %vm6904_vm0, %v6903_v0 }
0x1145   :  { %5962 = vmatprep.subr.bf16.mxu0 %v6903_v0 }
0x1148   :  { %5963 = vmatpush3.bf16.msra.mxu0 %v7521_v35 }
0x1149   :  { %5976 = vmatprep.subr.bf16.mxu0 %v6903_v0 }
0x11c8   :  { %v1888_v20 = vpop.f32.mrf.mxu1 }
0x11c9   :  { %v1889_v53 = vadd.f32 %v7534_v52, %v1888_v20 }
0x11ca   :  { %v5942_v24 = vpop.f32.mrf.mxu1 }
0x11cc   :  { %v1891_v26 = vpop.f32.mrf.mxu1 }
0x11ce   :  { %v5943_v6 = vpop.f32.mrf.mxu1 }
0x11d0   :  { %v2042_v7 = vpop.f32.mrf.mxu1 }
0x11d1   :  { %v2043_v27 = vadd.f32 %v7448_v62, %v2042_v7  ;;  %v2101_v7 = vrot.slane %v7470_v1, 7 }
0x11d2   :  { %v5958_v28 = vpop.f32.mrf.mxu1 }
0x11d3   :  { %v2049_v29 = vrot.slane %v2043_v27, 2  ;;  %v2050_v10 = vrot.slane %v2043_v27, 3 }
0x11d4   :  { %v2045_v30 = vpop.f32.mrf.mxu1 }
0x11d5   :  { %2067 = vrot.lane.b32.xlu1 %v2049_v29, %s6906_s13  ;;  %v2053_v37 = vadd.f32 %v2049_v29, %v7148_v23  ;;  %v2054_v43 = vadd.f32 %v2050_v10, %v7145_v21 }
0x11d6   :  { %v5959_v31 = vpop.f32.mrf.mxu1 }
0x11d7   :  { %v5526_v3 = vmul.f32 -1.442695, %v2053_v37  ;;  %v5527_v60 = vmul.f32 -1.442695, %v2054_v43 }
0x11d9   :  { %6479 = vpow2.f32 %v5526_v3 }
0x11e6   :  { %v6480_v44 = vpop.eup %6479 }
0x11e7   :  { %v2061_v47 = vadd.f32 1.0, %v6480_v44 }
0x11e9   :  { %6481 = vrcp.f32 %v2061_v47 }
0x11f6   :  { %v6482_v13 = vpop.eup %6481 }
0x11f7   :  { %v2087_v6 = vsub.f32 1.0, %v6482_v13  ;;  %v2105_v28 = vmul.f32 %v6482_v13, %v2101_v7 }
0x1203   :  { %v1935_v32 = vpop.f32.mrf.mxu0 }
0x1204   :  { %v1936_v51 = vadd.f32 %v7527_v39, %v1935_v32 }
0x1205   :  { %v5950_v40 = vpop.f32.mrf.mxu0 }
0x1206   :  { %1949 = vrot.lane.b32.xlu0 %v1936_v51, %s6906_s13  ;;  %v1941_v57 = vadd.f32 %v1936_v51, %v1889_v53  ;;  %v2102_v40 = vrot.slane %v7468_v63, 7 }
0x1207   :  { %v1938_v8 = vpop.f32.mrf.mxu0 }
0x1208   :  { %v5524_v59 = vmul.f32 -1.442695, %v1941_v57 }
0x1209   :  { %v5951_v41 = vpop.f32.mrf.mxu0 }
0x120a   :  { %2069 = vrot.lane.b32.xlu0 %v2050_v10, %s6906_s13  ;;  %6483 = vpow2.f32 %v5524_v59 }
0x120b   :  { %6485 = vpow2.f32 %v5527_v60 }
0x1217   :  { %v6484_v46 = vpop.eup %6483 }
0x1218   :  { %v1945_v61 = vadd.f32 1.0, %v6484_v46  ;;  %v6486_v42 = vpop.eup %6485 }
0x1219   :  { %v2062_v34 = vadd.f32 1.0, %v6486_v42 }
0x121a   :  { %6487 = vrcp.f32 %v1945_v61 }
0x121b   :  { %6489 = vrcp.f32 %v2062_v34 }
0x1227   :  { %v6488_v2 = vpop.eup %6487 }
0x1228   :  { %v6490_v45 = vpop.eup %6489  ;;  %v1959_v29 = vsub.f32 1.0, %v6488_v2  ;;  %v1965_v32 = vmul.f32 %v6488_v2, %v7479_v36 }
0x1229   :  { %v2088_v10 = vsub.f32 1.0, %v6490_v45  ;;  %v2106_v3 = vmul.f32 %v6490_v45, %v2102_v40 }
0x1247   :  { %v2068_v48 = vpop.permute.xlu1 %2067 }
0x1248   :  { %v2073_v49 = vmul.f32 %v6482_v13, %v2068_v48 }
0x124a   :  { %2077 = vrot.lane.b32.xlu0 %v2073_v49, %s6906_s13 }
0x1278   :  { %v1950_v4 = vpop.permute.xlu0 %1949 }
0x1279   :  { %v1952_v33 = vmul.f32 %v6488_v2, %v1950_v4 }
0x127b   :  { %1954 = vrot.lane.b32.xlu1 %v1952_v33, %s6906_s13 }
0x127c   :  { %v2070_v5 = vpop.permute.xlu0 %2069 }
0x127d   :  { %v2074_v9 = vmul.f32 %v6490_v45, %v2070_v5 }
0x127f   :  { %2079 = vrot.lane.b32.xlu1 %v2074_v9, %s6906_s13 }
0x12bc   :  { %v2078_v11 = vpop.permute.xlu0 %2077 }
0x12bd   :  { %v2083_v38 = vadd.f32 %v2078_v11, %v7148_v23 }
0x12bf   :  { %6491 = vtanh.f32 %v2083_v38 }
0x12cc   :  { %v6492_v12 = vpop.eup %6491 }
0x12cd   :  { %2091 = vrot.lane.b32.xlu1 %v6492_v12, %s6907_s22 }
0x12ed   :  { %v1955_v58 = vpop.permute.xlu1 %1954 }
0x12ee   :  { %v1957_v14 = vadd.f32 %v1955_v58, %v1889_v53 }
0x12f0   :  { %6493 = vtanh.f32 %v1957_v14 }
0x12f1   :  { %v2080_v15 = vpop.permute.xlu1 %2079 }
0x12f2   :  { %v2084_v18 = vadd.f32 %v2080_v15, %v7145_v21 }
0x12f4   :  { %6495 = vtanh.f32 %v2084_v18 }
0x12fd   :  { %v6494_v20 = vpop.eup %6493 }
0x12fe   :  { %1961 = vrot.lane.b32.xlu0 %v6494_v20, %s6907_s22 }
0x1301   :  { %v6496_v24 = vpop.eup %6495 }
0x1302   :  { %2093 = vrot.lane.b32.xlu0 %v6496_v24, %s6907_s22 }
0x133f   :  { %v2092_v26 = vpop.permute.xlu1 %2091 }
0x1340   :  { %v2097_v27 = vmul.f32 %v2092_v26, %v2087_v6 }
0x1342   :  { %v7546_v31 = vadd.f32 %v2105_v28, %v2097_v27 }
0x1344   :  { %v2109_v37 = vpack.c.bf16 %v7546_v31, %v7546_v31 }
0x1346   :  { %v2113_v13 = vunpack.c.l.b16 %v2109_v37 }
0x1348   :  { %v2115_v49 = vrot.slane %v2113_v13, 6 }
0x1370   :  { %v1962_v30 = vpop.permute.xlu0 %1961 }
0x1371   :  { %v1964_v51 = vmul.f32 %v1962_v30, %v1959_v29 }
0x1373   :  { %v7550_v8 = vadd.f32 %v1965_v32, %v1964_v51 }
0x1374   :  { %v2094_v41 = vpop.permute.xlu0 %2093 }
0x1375   :  { %v2098_v1 = vmul.f32 %v2094_v41, %v2088_v10  ;;  %v2164_v44 = vpack.c.bf16 %v7550_v8, %v7550_v8 }
0x1377   :  { %v7556_v47 = vadd.f32 %v2106_v3, %v2098_v1  ;;  %2166 = vrot.lane.b32.xlu1 %v2164_v44, %s6907_s22 }
0x1379   :  { %v2110_v63 = vpack.c.bf16 %v7556_v47, %v7556_v47 }
0x137b   :  { %v2114_v48 = vunpack.c.l.b16 %v2110_v63 }
0x137d   :  { %v2116_v53 = vrot.slane %v2114_v48, 5 }
0x137f   :  { %v2117_v57 = vsel %vm475_vm3, %v2116_v53, %v2115_v49 }
0x1380   :  { %v2118_v43 = vpack.c.b16 %v2117_v57, %v2117_v57 }
0x1382   :  { %2119 = vrot.lane.b32.xlu0 %v2118_v43, %s6907_s22 }
0x13e9   :  { %v2167_v59 = vpop.permute.xlu1 %2166 }
0x13ea   :  { %5973 = vmatmul.mubr.msk.bf16.vlgmr.msra.gmra.mxu1 %vm364_vm4, %v2167_v59 }
0x13eb   :  { %5985 = vmatpush3.bf16.msra.mxu1 %v7512_v19  ;;  %5988 = vmatprep.mubr.msk.bf16.mxu1 %vm6904_vm0, %v6903_v0 }
0x13ec   :  { %5986 = vmatprep.subr.bf16.mxu1 %v6903_v0 }
0x13ef   :  { %5987 = vmatpush3.bf16.msra.mxu1 %v7521_v35 }
0x13f0   :  { %6000 = vmatprep.subr.bf16.mxu1 %v6903_v0 }
0x13f4   :  { %v2120_v60 = vpop.permute.xlu0 %2119 }
0x13f5   :  { %5965 = vmatmul.mubr.msk.bf16.vlgmr.msra.gmra.mxu0 %vm364_vm4, %v2120_v60 }
0x13f6   :  { %5977 = vmatpush3.bf16.msra.mxu0 %v7421_v54  ;;  %5980 = vmatprep.mubr.msk.bf16.mxu0 %vm6904_vm0, %v6903_v0 }
0x13f7   :  { %5978 = vmatprep.subr.bf16.mxu0 %v6903_v0 }
0x13fa   :  { %5979 = vmatpush3.bf16.msra.mxu0 %v7430_v56 }
0x13fb   :  { %5992 = vmatprep.subr.bf16.mxu0 %v6903_v0 }
0x13fd   :  { %5981 = vmatmul.mubr.msk.bf16.vlgmr.msra.gmra.mxu0 %vm364_vm4, %v2120_v60 }
0x13fe   :  { %5993 = vmatpush3.bf16.msra.mxu0 %v7495_v16  ;;  %5996 = vmatprep.mubr.msk.bf16.mxu0 %vm6904_vm0, %v6903_v0 }
0x13ff   :  { %5994 = vmatprep.subr.bf16.mxu0 %v6903_v0 }
0x1402   :  { %5995 = vmatpush3.bf16.msra.mxu0 %v7504_v17 }
0x1403   :  { %6008 = vmatprep.subr.bf16.mxu0 %v6903_v0 }
0x14aa   :  { %v2205_v54 = vpop.f32.mrf.mxu1 }
0x14ab   :  { %v2206_v19 = vadd.f32 %v7527_v39, %v2205_v54 }
0x14ac   :  { %v5974_v35 = vpop.f32.mrf.mxu1 }
0x14ad   :  { %2219 = vrot.lane.b32.xlu1 %v2206_v19, %s6906_s13  ;;  %v2371_v35 = vrot.slane %v7546_v31, 7 }
0x14ae   :  { %v2208_v56 = vpop.f32.mrf.mxu1 }
0x14b0   :  { %v5975_v46 = vpop.f32.mrf.mxu1 }
0x14b5   :  { %v2158_v61 = vpop.f32.mrf.mxu0 }
0x14b6   :  { %v2159_v11 = vadd.f32 %v7534_v52, %v2158_v61 }
0x14b7   :  { %v5966_v42 = vpop.f32.mrf.mxu0 }
0x14b8   :  { %v2211_v38 = vadd.f32 %v2206_v19, %v2159_v11 }
0x14b9   :  { %v2161_v16 = vpop.f32.mrf.mxu0 }
0x14ba   :  { %v5530_v12 = vmul.f32 -1.442695, %v2211_v38 }
0x14bb   :  { %v5967_v34 = vpop.f32.mrf.mxu0 }
0x14bc   :  { %6497 = vpow2.f32 %v5530_v12 }
0x14bd   :  { %v2312_v2 = vpop.f32.mrf.mxu0 }
0x14be   :  { %v2313_v4 = vadd.f32 %v7448_v62, %v2312_v2 }
0x14bf   :  { %v5982_v33 = vpop.f32.mrf.mxu0 }
0x14c0   :  { %v2319_v45 = vrot.slane %v2313_v4, 1  ;;  %v2320_v17 = vrot.slane %v2313_v4, 2 }
0x14c1   :  { %v2315_v5 = vpop.f32.mrf.mxu0 }
0x14c2   :  { %2339 = vrot.lane.b32.xlu1 %v2320_v17, %s6906_s13  ;;  %2337 = vrot.lane.b32.xlu0 %v2319_v45, %s6906_s13  ;;  %v2323_v58 = vadd.f32 %v2319_v45, %v7148_v23  ;;  %v2324_v15 = vadd.f32 %v2320_v17, %v7145_v21 }
0x14c3   :  { %v5983_v9 = vpop.f32.mrf.mxu0 }
0x14c4   :  { %v5532_v62 = vmul.f32 -1.442695, %v2323_v58  ;;  %v5533_v20 = vmul.f32 -1.442695, %v2324_v15 }
0x14c6   :  { %6499 = vpow2.f32 %v5532_v62 }
0x14c9   :  { %v6498_v14 = vpop.eup %6497 }
0x14ca   :  { %v2215_v18 = vadd.f32 1.0, %v6498_v14 }
0x14cc   :  { %6501 = vrcp.f32 %v2215_v18 }
0x14cd   :  { %6503 = vpow2.f32 %v5533_v20 }
0x14d3   :  { %v6500_v24 = vpop.eup %6499 }
0x14d4   :  { %v2331_v28 = vadd.f32 1.0, %v6500_v24 }
0x14d6   :  { %6505 = vrcp.f32 %v2331_v28 }
0x14d9   :  { %v6502_v26 = vpop.eup %6501 }
0x14da   :  { %v6504_v7 = vpop.eup %6503  ;;  %v2229_v57 = vsub.f32 1.0, %v6502_v26  ;;  %v2235_v59 = vmul.f32 %v6502_v26, %v7550_v8 }
0x14db   :  { %v2332_v29 = vadd.f32 1.0, %v6504_v7 }
0x14dd   :  { %6507 = vrcp.f32 %v2332_v29 }
0x14e3   :  { %v6506_v30 = vpop.eup %6505 }
0x14e4   :  { %v2357_v56 = vsub.f32 1.0, %v6506_v30  ;;  %v2375_v34 = vmul.f32 %v6506_v30, %v2371_v35 }
0x14ea   :  { %v6508_v32 = vpop.eup %6507 }
0x14eb   :  { %v2358_v19 = vsub.f32 1.0, %v6508_v32 }
0x151f   :  { %v2220_v6 = vpop.permute.xlu1 %2219 }
0x1520   :  { %v2222_v27 = vmul.f32 %v6502_v26, %v2220_v6 }
0x1522   :  { %2224 = vrot.lane.b32.xlu0 %v2222_v27, %s6906_s13 }
0x1534   :  { %v2340_v51 = vpop.permute.xlu1 %2339  ;;  %v2338_v40 = vpop.permute.xlu0 %2337 }
0x1535   :  { %v2344_v10 = vmul.f32 %v6508_v32, %v2340_v51  ;;  %v2343_v41 = vmul.f32 %v6506_v30, %v2338_v40 }
0x1537   :  { %2349 = vrot.lane.b32.xlu0 %v2344_v10, %s6906_s13  ;;  %2347 = vrot.lane.b32.xlu1 %v2343_v41, %s6906_s13  ;;  %v2548_v10 = vld [vmem:[%s8318_s1] sm:$0xff] }
0x1594   :  { %v2225_v37 = vpop.permute.xlu0 %2224 }
0x1595   :  { %v2227_v3 = vadd.f32 %v2225_v37, %v2159_v11 }
0x1597   :  { %6509 = vtanh.f32 %v2227_v3  ;;  %v2549_v3 = vld [vmem:[%s8318_s1 + $0x8] sm:$0xff] }
0x15a4   :  { %v6510_v1 = vpop.eup %6509 }
0x15a5   :  { %2231 = vrot.lane.b32.xlu1 %v6510_v1, %s6907_s22  ;;  %v6357_v1 = vld [vmem:[%s8281_s10 + $0x8] sm:$0xff]  }
0x15a9   :  { %v2350_v44 = vpop.permute.xlu0 %2349  ;;  %v2348_v13 = vpop.permute.xlu1 %2347 }
0x15aa   :  { %v2354_v63 = vadd.f32 %v2350_v44, %v7145_v21  ;;  %v2353_v48 = vadd.f32 %v2348_v13, %v7148_v23  ;;  %v2372_v23 = vrot.slane %v7556_v47, 7  ;;  %v6358_v44 = vld [vmem:[%s8281_s10] sm:$0xff]   ;;  %v319_v13 = vlaneseq }
0x15ac   :  { %6511 = vtanh.f32 %v2354_v63  ;;  %v2376_v42 = vmul.f32 %v6508_v32, %v2372_v23  ;;  %v6909_v63 = vmov 1966171168  }
0x15ad   :  { %6513 = vtanh.f32 %v2353_v48  ;;  %v621_v48 = vunpack.c.l.s4 %v6909_v63 }
0x15b9   :  { %v6512_v49 = vpop.eup %6511 }
0x15ba   :  { %v6514_v53 = vpop.eup %6513  ;;  %2363 = vrot.lane.b32.xlu1 %v6512_v49, %s6907_s22  ;;  %v320_v49 = vshrl.u32 %v319_v13, 7 }
0x15bb   :  { %2361 = vrot.lane.b32.xlu0 %v6514_v53, %s6907_s22  ;;  %v622_v53 = vunpack.c.0.s8 %v621_v48 }
0x1617   :  { %v2232_v43 = vpop.permute.xlu1 %2231 }
0x1618   :  { %v2234_v60 = vmul.f32 %v2232_v43, %v2229_v57  ;;  %v7640_v57 = vsub.s32 %v622_v53, %v320_v49 }
0x161a   :  { %v7601_v54 = vadd.f32 %v2235_v59, %v2234_v60  ;;  %v626_v43 = vrot.slane %v7255_v25, %v7640_v57  ;;  %v321_v60 = vadd.s32 8, %v320_v49  ;;  %v1164_v23 = vrot.slane %v7357_v22, %v7640_v57 }
0x161b   :  { %v1434_v25 = vrot.slane %v7412_v50, %v7640_v57 }
0x161c   :  { %v2434_v21 = vpack.c.bf16 %v7601_v54, %v7601_v54  ;;  %v627_v59 = vcombine.high %v626_v43, %v626_v43  ;;  %v634_v35 = vrot.slane %v626_v43, %v7640_v57  ;;  %v1172_v50 = vrot.slane %v1164_v23, %v7640_v57 }
0x161e   :  { %2436 = vrot.lane.b32.xlu0 %v2434_v21, %s6907_s22  ;;  %v894_v21 = vrot.slane %v7302_v55, %v7640_v57 }
0x1620   :  { %v902_v22 = vrot.slane %v894_v21, %v7640_v57 }
0x162c   :  { %v2364_v46 = vpop.permute.xlu1 %2363 }
0x162d   :  { %v2362_v61 = vpop.permute.xlu0 %2361  ;;  %v2368_v16 = vmul.f32 %v2364_v46, %v2358_v19  ;;  %v7648_v19 = vsub.s32 0, %v320_v49  ;;  %v7652_v46 = vand.u32 7, %v320_v49 }
0x162e   :  { %v2367_v2 = vmul.f32 %v2362_v61, %v2357_v56  ;;  %v641_v56 = vrot.slane %v627_v59, %v7640_v57  ;;  %v7654_v61 = vand.u32 7, %v321_v60 }
0x162f   :  { %v2378_v4 = vadd.f32 %v2376_v42, %v2368_v16  ;;  %v895_v42 = vcombine.high %v894_v21, %v894_v21  ;;  %v1165_v16 = vcombine.high %v1164_v23, %v1164_v23  ;;  %v645_v55 = vrot.slane %v634_v35, %v7648_v19 }
0x1630   :  { %v2377_v33 = vadd.f32 %v2375_v34, %v2367_v2  ;;  %v649_v34 = vrot.slane %v641_v56, %v7648_v19  ;;  %vm652_vm5 = vcmp.eq.s32.totalorder %v7652_v46, 0  ;;  %vm653_vm6 = vcmp.eq.s32.totalorder %v7654_v61, 0 }
0x1631   :  { %v2380_v45 = vpack.c.bf16 %v2378_v4, %v2378_v4  ;;  %v1435_v2 = vcombine.high %v1434_v25, %v1434_v25  ;;  %v909_v4 = vrot.slane %v895_v42, %v7640_v57  ;;  %vm920_vm7 = vcmp.eq.s32.totalorder %v7652_v46, 1 }
0x1632   :  { %v2379_v17 = vpack.c.bf16 %v2377_v33, %v2377_v33  ;;  %v1704_v33 = vrot.slane %v7479_v36, %v7640_v57  ;;  %vm921_vm8 = vcmp.eq.s32.totalorder %v7654_v61, 1  ;;  %vm1190_vm9 = vcmp.eq.s32.totalorder %v7652_v46, 2 }
0x1633   :  { %v2384_v5 = vunpack.c.l.b16 %v2380_v45  ;;  %v1179_v45 = vrot.slane %v1165_v16, %v7640_v57  ;;  %v917_v36 = vrot.slane %v909_v4, %v7648_v19  ;;  %vm1191_vm10 = vcmp.eq.s32.totalorder %v7654_v61, 2 }
0x1634   :  { %v2383_v9 = vunpack.c.l.b16 %v2379_v17  ;;  %v1974_v17 = vrot.slane %v7550_v8, %v7640_v57  ;;  %v1183_v8 = vrot.slane %v1172_v50, %v7648_v19  ;;  %vm1460_vm11 = vcmp.eq.s32.totalorder %v7652_v46, 3 }
0x1635   :  { %v2386_v11 = vrot.slane %v2384_v5, 6  ;;  %v658_v5 = vsel %vm652_vm5, %v645_v55, 0.0  ;;  %vm1461_vm12 = vcmp.eq.s32.totalorder %v7654_v61, 3  ;;  %vm1730_vm13 = vcmp.eq.s32.totalorder %v7652_v46, 4 }
0x1636   :  { %v2385_v38 = vrot.slane %v2383_v9, 7  ;;  %v659_v9 = vsel %vm653_vm6, %v649_v34, 0.0  ;;  %vm2000_vm14 = vcmp.eq.s32.totalorder %v7652_v46, 5  ;;  %vm1731_vm15 = vcmp.eq.s32.totalorder %v7654_v61, 4 }
0x1637   :  { %vm2270_vm1 = vcmp.eq.s32.totalorder %v7652_v46, 6  ;;  %vm2540_vm2 = vcmp.eq.s32.totalorder %v7652_v46, 7  ;;  %vm2001_vm5 = vcmp.eq.s32.totalorder %v7654_v61, 5  ;;  %vm2271_vm6 = vcmp.eq.s32.totalorder %v7654_v61, 6 }
0x1638   :  { %v2387_v47 = vsel %vm475_vm3, %v2386_v11, %v2385_v38  ;;  %v1442_v11 = vrot.slane %v1434_v25, %v7640_v57  ;;  %v2244_v38 = vrot.slane %v7601_v54, %v7640_v57 }
0x1639   :  { %v2388_v12 = vpack.c.b16 %v2387_v47, %v2387_v47  ;;  %v913_v47 = vrot.slane %v902_v22, %v7648_v19 }
0x163b   :  { %2389 = vrot.lane.b32.xlu1 %v2388_v12, %s6907_s22  ;;  %v1449_v12 = vrot.slane %v1435_v2, %v7640_v57 }
0x1690   :  { %v2437_v31 = vpop.permute.xlu0 %2436 }
0x1691   :  { %5997 = vmatmul.mubr.msk.bf16.vlgmr.msra.gmra.mxu0 %vm364_vm4, %v2437_v31  ;;  %v1705_v31 = vcombine.high %v1704_v33, %v1704_v33 }
0x1692   :  { %6010 = vmatprep.mubr.msk.bf16.mxu0 %vm6904_vm0, %v6903_v0 }
0x16ad   :  { %v2390_v58 = vpop.permute.xlu1 %2389 }
0x16ae   :  { %5989 = vmatmul.mubr.msk.bf16.vlgmr.msra.gmra.mxu1 %vm364_vm4, %v2390_v58  ;;  %v1187_v58 = vrot.slane %v1179_v45, %v7648_v19 }
0x16af   :  { %6004 = vmatprep.mubr.msk.bf16.mxu1 %vm6904_vm0, %v6903_v0  ;;  %6001 = vmatpush3.bf16.msra.mxu1 %v6357_v1 }
0x16b0   :  { %6002 = vmatprep.subr.bf16.mxu1 %v6903_v0 }
0x16b3   :  { %6003 = vmatpush3.bf16.msra.mxu1 %v6358_v44 }
0x16b4   :  { %6014 = vmatprep.subr.bf16.mxu1 %v6903_v0 }
0x1751   :  { %v2475_v14 = vpop.f32.mrf.mxu0 }
0x1752   :  { %v2476_v15 = vadd.f32 %v7527_v39, %v2475_v14  ;;  %v1975_v14 = vcombine.high %v1974_v17, %v1974_v17 }
0x1753   :  { %v5998_v62 = vpop.f32.mrf.mxu0 }
0x1754   :  { %2489 = vrot.lane.b32.xlu0 %v2476_v15, %s6906_s13  ;;  %v1453_v62 = vrot.slane %v1442_v11, %v7648_v19 }
0x1755   :  { %v2478_v18 = vpop.f32.mrf.mxu0 }
0x1756   :  { %v1712_v18 = vrot.slane %v1704_v33, %v7640_v57 }
0x1757   :  { %v5999_v20 = vpop.f32.mrf.mxu0 }
0x1758   :  { %v2245_v20 = vcombine.high %v2244_v38, %v2244_v38 }
0x176e   :  { %v2428_v24 = vpop.f32.mrf.mxu1 }
0x176f   :  { %v2429_v27 = vadd.f32 %v7534_v52, %v2428_v24 }
0x1770   :  { %v5990_v26 = vpop.f32.mrf.mxu1 }
0x1771   :  { %v2481_v28 = vadd.f32 %v2476_v15, %v2429_v27  ;;  %v1457_v26 = vrot.slane %v1449_v12, %v7648_v19 }
0x1772   :  { %v2431_v6 = vpop.f32.mrf.mxu1 }
0x1773   :  { %v5536_v29 = vmul.f32 -1.442695, %v2481_v28  ;;  %v1982_v6 = vrot.slane %v1974_v17, %v7640_v57  ;;  %v1719_v28 = vrot.slane %v1705_v31, %v7640_v57 }
0x1774   :  { %v5991_v7 = vpop.f32.mrf.mxu1 }
0x1775   :  { %6515 = vpow2.f32 %v5536_v29  ;;  %v2252_v29 = vrot.slane %v2244_v38, %v7640_v57  ;;  %v1727_v13 = vrot.slane %v1719_v28, %v7648_v19 }
0x1777   :  { %v2263_v44 = vrot.slane %v2252_v29, %v7648_v19 }
0x1782   :  { %v6516_v30 = vpop.eup %6515 }
0x1783   :  { %v2485_v32 = vadd.f32 1.0, %v6516_v30  ;;  %v926_v30 = vsel %vm920_vm7, %v913_v47, %v658_v5  ;;  %vm2541_vm7 = vcmp.eq.s32.totalorder %v7654_v61, 7 }
0x1785   :  { %6517 = vrcp.f32 %v2485_v32  ;;  %v1989_v32 = vrot.slane %v1975_v14, %v7640_v57 }
0x1787   :  { %v1997_v49 = vrot.slane %v1989_v32, %v7648_v19 }
0x1792   :  { %v7619_v51 = vpop.eup %6517 }
0x1793   :  { %v2499_v15 = vsub.f32 1.0, %v7619_v51  ;;  %v2505_v7 = vmul.f32 %v7619_v51, %v7601_v54  ;;  %v1723_v54 = vrot.slane %v1712_v18, %v7648_v19 }
0x17c6   :  { %v2490_v39 = vpop.permute.xlu0 %2489 }
0x17c7   :  { %v2492_v40 = vmul.f32 %v7619_v51, %v2490_v39 }
0x17c9   :  { %2494 = vrot.lane.b32.xlu1 %v2492_v40, %s6906_s13  ;;  %v1196_v40 = vsel %vm1190_vm9, %v1183_v8, %v926_v30  ;;  %vm3161_vm9 = vcmask 1043456  }
0x17ca   :  { %v1466_v51 = vsel %vm1460_vm11, %v1453_v62, %v1196_v40  ;;  %vm3570_vm11 = vcmask 195584  }
0x17cb   :  { %v1736_v53 = vsel %vm1730_vm13, %v1723_v54, %v1466_v51 }
0x17cd   :  { %2552 = vrot.lane.b32.xlu1 %v2548_v10, %s6908_s5  ;;  %v927_v10 = vsel %vm921_vm8, %v917_v36, %v659_v9  ;;  %vm2662_vm8 = vcmask 64512  }
0x183b   :  { %v2495_v52 = vpop.permute.xlu1 %2494 }
0x183c   :  { %v2497_v41 = vadd.f32 %v2495_v52, %v2429_v27  ;;  %v1197_v52 = vsel %vm1191_vm10, %v1187_v58, %v927_v10  ;;  %vm3567_vm10 = vcmask 130048  }
0x183d   :  { %v1467_v1 = vsel %vm1461_vm12, %v1457_v26, %v1197_v52  ;;  %vm3829_vm12 = vcmask 523264  }
0x183e   :  { %6519 = vtanh.f32 %v2497_v41  ;;  %v2259_v41 = vrot.slane %v2245_v20, %v7640_v57  ;;  %v1737_v35 = vsel %vm1731_vm15, %v1727_v13, %v1467_v1 }
0x183f   :  { %v2553_v25 = vpop.permute.xlu1 %2552  ;;  %v2007_v42 = vsel %vm2001_vm5, %v1997_v49, %v1737_v35 }
0x1840   :  { %v2267_v43 = vrot.slane %v2259_v41, %v7648_v19 }
0x1842   :  { %v2277_v55 = vsel %vm2271_vm6, %v2267_v43, %v2007_v42 }
0x184b   :  { %v6520_v37 = vpop.eup %6519 }
0x184c   :  { %2501 = vrot.lane.b32.xlu0 %v6520_v37, %s6907_s22 }
0x1850   :  { %2554 = vrot.lane.b32.xlu0 %v2549_v3, %s6908_s5  ;;  %v1993_v3 = vrot.slane %v1982_v6, %v7648_v19 }
0x1852   :  { %v2006_v59 = vsel %vm2000_vm14, %v1993_v3, %v1736_v53 }
0x1853   :  { %v2276_v23 = vsel %vm2270_vm1, %v2263_v44, %v2006_v59 }
0x18be   :  { %v2502_v24 = vpop.permute.xlu0 %2501 }
0x18bf   :  { %v2504_v27 = vmul.f32 %v2502_v24, %v2499_v15 }
0x18c1   :  { %v2506_v39 = vadd.f32 %v2505_v7, %v2504_v27 }
0x18c2   :  { %v2555_v16 = vpop.permute.xlu0 %2554 }
0x18c3   :  { %v2514_v37 = vrot.slane %v2506_v39, %v7640_v57 }
0x18c5   :  { %v2515_v63 = vcombine.high %v2514_v37, %v2514_v37  ;;  %v2522_v48 = vrot.slane %v2514_v37, %v7640_v57 }
0x18c7   :  { %v2533_v60 = vrot.slane %v2522_v48, %v7648_v19  ;;  %v2529_v21 = vrot.slane %v2515_v63, %v7640_v57 }
0x18c9   :  { %v2546_v56 = vsel %vm2540_vm2, %v2533_v60, %v2276_v23  ;;  %v2537_v46 = vrot.slane %v2529_v21, %v7648_v19  ;;  %v5537_v19 = vld [vmem:[#allocation7] ss:$0 sm:$0xff] }
0x18ca   :  { %v7722_v22 = vadd.f32 %v2553_v25, %v2546_v56 }
0x18cb   :  { %v2547_v34 = vsel %vm2541_vm7, %v2537_v46, %v2277_v55 }
0x18cc   :  { %v7724_v2 = vadd.f32 %v2555_v16, %v2547_v34 }
0x18ce   :  { %v2560_v4 = vpack.c.bf16 %v7724_v2, %v7722_v22 }
0x18d0   :  { %2573 = vrot.lane.b32.xlu1 %v2560_v4, %s6907_s22 }
0x1942   :  { %v2574_v57 = vpop.permute.xlu1 %2573 }
0x1943   :  { %6005 = vmatmul.mubr.msk.bf16.vlgmr.msra.gmra.mxu1 %vm364_vm4, %v2574_v57 }
0x1944   :  { %6016 = vmatprep.mubr.msk.bf16.mxu1 %vm6904_vm0, %v6903_v0 }
0x1a03   :  { %v2624_v61 = vpop.f32.mrf.mxu1 }
0x1a04   :  { %v2625_v45 = vadd.f32 %v5537_v19, %v2624_v61 }
0x1a05   :  { %v6006_v33 = vpop.f32.mrf.mxu1 }
0x1a06   :  { %v2651_v11 = vpack.c.bf16 %v2625_v45, %v2625_v45 }
0x1a07   :  { %v2627_v50 = vpop.f32.mrf.mxu1 }
0x1a08   :  { %v2628_v17 = vadd.f32 %v5537_v19, %v2627_v50 }
0x1a09   :  { %v6007_v5 = vpop.f32.mrf.mxu1 }
0x1a0a   :  { %v6296_v9 = vpack.i.bf16 %v2628_v17, %v2625_v45  ;;  %v2652_v38 = vpack.c.bf16 %v2628_v17, %v2628_v17 }
0x1a0c   :  { %6297 = vrot.lane.b32.xlu1 %v6296_v9, %s6910_s25  ;;  %6292 = vrot.lane.b32.xlu0 %v6296_v9, %s6911_s6 }
0x1a10   :  { %2660 = vrot.lane.b32.xlu1 %v2651_v11, %s6907_s22  ;;  %6302 = vrot.lane.b32.xlu0 %v6296_v9, %s6912_s2 }
0x1a14   :  { %2710 = vrot.lane.b32.xlu0 %v2652_v38, %s6907_s22 }
0x1a7e   :  { %v6298_v47 = vpop.permute.xlu1 %6297  ;;  %v6293_v12 = vpop.permute.xlu0 %6292 }
0x1a7f   :  { %v6295_v36 = vunpack.i.h.bf16 %v6293_v12  ;;  %v6294_v31 = vunpack.i.l.bf16 %v6293_v12  ;;  %v6300_v8 = vunpack.i.h.bf16 %v6298_v47  ;;  %v6299_v58 = vunpack.i.l.bf16 %v6298_v47 }
0x1a81   :  { %v7737_v14 = vpack.c.bf16 %v6294_v31, %v6294_v31  ;;  %v7739_v15 = vpack.c.bf16 %v6295_v36, %v6295_v36  ;;  %v7746_v24 = vpack.c.bf16 %v6300_v8, %v6300_v8  ;;  %v7748_v6 = vpack.c.bf16 %v6299_v58, %v6299_v58 }
0x1a82   :  { %v2661_v62 = vpop.permute.xlu1 %2660  ;;  %v6303_v18 = vpop.permute.xlu0 %6302 }
0x1a83   :  { %v2667_v20 = vsel %vm2662_vm8, %v2661_v62, 0  ;;  %2759 = vrot.lane.b32.xlu1 %v7737_v14, %s6907_s22  ;;  %2808 = vrot.lane.b32.xlu0 %v7739_v15, %s6907_s22  ;;  %v6304_v26 = vunpack.i.l.bf16 %v6303_v18  ;;  %v6305_v7 = vunpack.i.h.bf16 %v6303_v18 }
0x1a84   :  { %6009 = vmatpush3.bf16.xpose.msra.mxu0 %v2667_v20 }
0x1a85   :  { %6020 = vmatprep.subr.bf16.mxu0 %v6903_v0  ;;  %v7756_v29 = vpack.c.bf16 %v6304_v26, %v6304_v26  ;;  %v7759_v30 = vpack.c.bf16 %v6305_v7, %v6305_v7 }
0x1a86   :  { %v2711_v27 = vpop.permute.xlu0 %2710 }
0x1a87   :  { %v2716_v28 = vsel %vm2662_vm8, %v2711_v27, 0  ;;  %2857 = vrot.lane.b32.xlu1 %v7748_v6, %s6907_s22  ;;  %2906 = vrot.lane.b32.xlu0 %v7746_v24, %s6907_s22 }
0x1a88   :  { %6015 = vmatpush3.bf16.xpose.msra.mxu1 %v2716_v28 }
0x1a89   :  { %6026 = vmatprep.subr.bf16.mxu1 %v6903_v0 }
0x1a8b   :  { %6011 = vmatmul.mubr.msk.bf16.vlgmr.msra.gmra.mxu0 %vm2662_vm8, %v2651_v11  ;;  %2955 = vrot.lane.b32.xlu1 %v7756_v29, %s6907_s22 }
0x1a8c   :  { %3004 = vrot.lane.b32.xlu0 %v7759_v30, %s6907_s22  ;;  %6022 = vmatprep.mubr.msk.bf16.mxu0 %vm6904_vm0, %v6903_v0 }
0x1a8f   :  { %3205 = vrot.lane.b32.xlu1 %v2652_v38, %s6906_s13  ;;  %6017 = vmatmul.mubr.msk.bf16.vlgmr.msra.gmra.mxu1 %vm2662_vm8, %v2652_v38 }
0x1a90   :  { %3156 = vrot.lane.b32.xlu0 %v2651_v11, %s6906_s13  ;;  %6028 = vmatprep.mubr.msk.bf16.mxu1 %vm6904_vm0, %v6903_v0 }
0x1af5   :  { %v2760_v32 = vpop.permute.xlu1 %2759  ;;  %v2809_v39 = vpop.permute.xlu0 %2808 }
0x1af6   :  { %v2765_v40 = vsel %vm2662_vm8, %v2760_v32, 0  ;;  %v2814_v10 = vsel %vm2662_vm8, %v2809_v39, 0 }
0x1af7   :  { %6021 = vmatpush3.bf16.xpose.msra.mxu0 %v2765_v40  ;;  %6027 = vmatpush3.bf16.xpose.msra.mxu1 %v2814_v10 }
0x1af8   :  { %6032 = vmatprep.subr.bf16.mxu0 %v6903_v0  ;;  %6038 = vmatprep.subr.bf16.mxu1 %v6903_v0 }
0x1af9   :  { %v2858_v54 = vpop.permute.xlu1 %2857  ;;  %v2907_v51 = vpop.permute.xlu0 %2906 }
0x1afa   :  { %v2863_v52 = vsel %vm2662_vm8, %v2858_v54, 0  ;;  %v2912_v41 = vsel %vm2662_vm8, %v2907_v51, 0 }
0x1afd   :  { %v2956_v37 = vpop.permute.xlu1 %2955 }
0x1afe   :  { %6023 = vmatmul.mubr.msk.bf16.vlgmr.msra.gmra.mxu0 %vm2662_vm8, %v7737_v14  ;;  %6029 = vmatmul.mubr.msk.bf16.vlgmr.msra.gmra.mxu1 %vm2662_vm8, %v7739_v15  ;;  %v3005_v3 = vpop.permute.xlu0 %3004  ;;  %v2961_v1 = vsel %vm2662_vm8, %v2956_v37, 0 }
0x1aff   :  { %6033 = vmatpush3.bf16.xpose.msra.mxu0 %v2863_v52  ;;  %6039 = vmatpush3.bf16.xpose.msra.mxu1 %v2912_v41  ;;  %v3010_v44 = vsel %vm2662_vm8, %v3005_v3, 0 }
0x1b00   :  { %6034 = vmatprep.mubr.msk.bf16.mxu0 %vm6904_vm0, %v6903_v0  ;;  %6040 = vmatprep.mubr.msk.bf16.mxu1 %vm6904_vm0, %v6903_v0 }
0x1b01   :  { %6044 = vmatprep.subr.bf16.mxu0 %v6903_v0  ;;  %6050 = vmatprep.subr.bf16.mxu1 %v6903_v0  ;;  %v3206_v13 = vpop.permute.xlu1 %3205 }
0x1b02   :  { %v3157_v63 = vpop.permute.xlu0 %3156  ;;  %v3211_v48 = vsel %vm3161_vm9, %v3206_v13, 0 }
0x1b03   :  { %v3163_v49 = vsel %vm3161_vm9, %v3157_v63, 0 }
0x1b06   :  { %6035 = vmatmul.mubr.msk.bf16.vlgmr.msra.gmra.mxu0 %vm2662_vm8, %v7748_v6  ;;  %6041 = vmatmul.mubr.msk.bf16.vlgmr.msra.gmra.mxu1 %vm2662_vm8, %v7746_v24 }
0x1b07   :  { %6045 = vmatpush3.bf16.xpose.msra.mxu0 %v2961_v1  ;;  %6051 = vmatpush3.bf16.xpose.msra.mxu1 %v3010_v44 }
0x1b08   :  { %6046 = vmatprep.mubr.msk.bf16.mxu0 %vm6904_vm0, %v6903_v0  ;;  %6052 = vmatprep.mubr.msk.bf16.mxu1 %vm6904_vm0, %v6903_v0 }
0x1b09   :  { %6056 = vmatprep.subr.bf16.mxu0 %v6903_v0  ;;  %6062 = vmatprep.subr.bf16.mxu1 %v6903_v0 }
0x1b0e   :  { %6047 = vmatmul.mubr.msk.bf16.vlgmr.msra.gmra.mxu0 %vm2662_vm8, %v7756_v29  ;;  %6053 = vmatmul.mubr.msk.bf16.vlgmr.msra.gmra.mxu1 %vm2662_vm8, %v7759_v30 }
0x1b0f   :  { %6057 = vmatpush3.bf16.msra.mxu0 %v3163_v49  ;;  %6063 = vmatpush3.bf16.msra.mxu1 %v3211_v48 }
0x1b10   :  { %6058 = vmatprep.mubr.msk.bf16.mxu0 %vm6904_vm0, %v6903_v0  ;;  %6064 = vmatprep.mubr.msk.bf16.mxu1 %vm6904_vm0, %v6903_v0 }
0x1b11   :  { %6068 = vmatprep.subr.bf16.mxu0 %v6903_v0  ;;  %6074 = vmatprep.subr.bf16.mxu1 %v6903_v0 }
0x1b4b   :  { %v2703_v53 = vpop.f32.mrf.mxu0 }
0x1b4c   :  { %v3052_v43 = vmul.f32 0.35355338, %v2703_v53 }
0x1b4d   :  { %v6012_v59 = vpop.f32.mrf.mxu0 }
0x1b4e   :  { %v3060_v60 = vsel %vm2662_vm8, %v3052_v43, -inf }
0x1b4f   :  { %v2752_v21 = vpop.f32.mrf.mxu1  ;;  %3061 = vmax.xlane.f32.xlu1 %v3060_v60  ;;  %v2706_v23 = vpop.f32.mrf.mxu0 }
0x1b50   :  { %v3053_v35 = vmul.f32 0.35355338, %v2752_v21 }
0x1b51   :  { %v6013_v56 = vpop.f32.mrf.mxu0  ;;  %v6018_v25 = vpop.f32.mrf.mxu1 }
0x1b52   :  { %v3063_v42 = vsel %vm2662_vm8, %v3053_v35, -inf }
0x1b53   :  { %3064 = vmax.xlane.f32.xlu0 %v3063_v42  ;;  %v2755_v46 = vpop.f32.mrf.mxu1 }
0x1b55   :  { %v6019_v16 = vpop.f32.mrf.mxu1 }
0x1bbe   :  { %v2801_v55 = vpop.f32.mrf.mxu0  ;;  %v2850_v34 = vpop.f32.mrf.mxu1 }
0x1bbf   :  { %v3054_v4 = vmul.f32 0.35355338, %v2801_v55  ;;  %v3055_v57 = vmul.f32 0.35355338, %v2850_v34 }
0x1bc0   :  { %v6024_v61 = vpop.f32.mrf.mxu0  ;;  %v6030_v19 = vpop.f32.mrf.mxu1 }
0x1bc1   :  { %v3069_v33 = vsel %vm2662_vm8, %v3055_v57, -inf  ;;  %v3066_v50 = vsel %vm2662_vm8, %v3054_v4, -inf }
0x1bc2   :  { %v2853_v45 = vpop.f32.mrf.mxu1  ;;  %3070 = vmax.xlane.f32.xlu1 %v3069_v33  ;;  %3067 = vmax.xlane.f32.xlu0 %v3066_v50  ;;  %v2804_v17 = vpop.f32.mrf.mxu0 }
0x1bc4   :  { %v6025_v5 = vpop.f32.mrf.mxu0  ;;  %v6031_v9 = vpop.f32.mrf.mxu1 }
0x1bc6   :  { %v2899_v11 = vpop.f32.mrf.mxu0  ;;  %v2948_v38 = vpop.f32.mrf.mxu1 }
0x1bc7   :  { %v7817_v47 = vmul.f32 0.35355338, %v2899_v11  ;;  %v3057_v12 = vmul.f32 0.35355338, %v2948_v38 }
0x1bc8   :  { %v6036_v36 = vpop.f32.mrf.mxu0  ;;  %v6042_v31 = vpop.f32.mrf.mxu1 }
0x1bc9   :  { %v3075_v8 = vsel %vm2662_vm8, %v3057_v12, -inf  ;;  %v3072_v58 = vsel %vm2662_vm8, %v7817_v47, -inf }
0x1bca   :  { %v2951_v62 = vpop.f32.mrf.mxu1  ;;  %3076 = vmax.xlane.f32.xlu1 %v3075_v8  ;;  %3073 = vmax.xlane.f32.xlu0 %v3072_v58  ;;  %v2902_v18 = vpop.f32.mrf.mxu0 }
0x1bcc   :  { %v6037_v20 = vpop.f32.mrf.mxu0  ;;  %v6043_v26 = vpop.f32.mrf.mxu1 }
0x1bce   :  { %v2997_v7 = vpop.f32.mrf.mxu0  ;;  %v3046_v27 = vpop.f32.mrf.mxu1 }
0x1bcf   :  { %v7822_v28 = vmul.f32 0.35355338, %v2997_v7  ;;  %v3059_v32 = vmul.f32 0.35355338, %v3046_v27 }
0x1bd0   :  { %v6048_v39 = vpop.f32.mrf.mxu0  ;;  %v6054_v40 = vpop.f32.mrf.mxu1 }
0x1bd1   :  { %v3081_v10 = vsel %vm2662_vm8, %v3059_v32, -inf  ;;  %v3078_v54 = vsel %vm2662_vm8, %v7822_v28, -inf }
0x1bd2   :  { %v3049_v51 = vpop.f32.mrf.mxu1  ;;  %3082 = vmax.xlane.f32.xlu1 %v3081_v10  ;;  %3079 = vmax.xlane.f32.xlu0 %v3078_v54  ;;  %v3000_v52 = vpop.f32.mrf.mxu0 }
0x1bd4   :  { %v6049_v41 = vpop.f32.mrf.mxu0  ;;  %v6055_v37 = vpop.f32.mrf.mxu1 }
0x1bd8   :  { %v3062_v3 = vpop.xlane.xlu1 %3061 }
0x1bd9   :  { %v3084_v44 = vsub.f32 %v3052_v43, %v3062_v3 }
0x1bdb   :  { %v3092_v63 = vmul.f32 1.442695, %v3084_v44 }
0x1bdc   :  { %v3065_v1 = vpop.xlane.xlu0 %3064 }
0x1bdd   :  { %v3085_v13 = vsub.f32 %v3053_v35, %v3065_v1  ;;  %6521 = vpow2.f32 %v3092_v63 }
0x1bdf   :  { %v3094_v48 = vmul.f32 1.442695, %v3085_v13 }
0x1be1   :  { %6523 = vpow2.f32 %v3094_v48 }
0x1be3   :  { %3253 = vrot.lane.b32.xlu1 %v7737_v14, %s6906_s13 }
0x1be8   :  { %3301 = vrot.lane.b32.xlu0 %v7739_v15, %s6906_s13 }
0x1bea   :  { %v6522_v49 = vpop.eup %6521 }
0x1beb   :  { %v3108_v60 = vsel %vm2662_vm8, %v6522_v49, 0.0 }
0x1bee   :  { %v6524_v53 = vpop.eup %6523 }
0x1bef   :  { %v3111_v59 = vsel %vm2662_vm8, %v6524_v53, 0.0 }
0x1c07   :  { %3112 = vadd.xlane.f32.xlu1 %v3111_v59  ;;  %3109 = vadd.xlane.f32.xlu0 %v3108_v60 }
0x1c18   :  { %3349 = vrot.lane.b32.xlu1 %v7748_v6, %s6906_s13 }
0x1c4b   :  { %v3071_v14 = vpop.xlane.xlu1 %3070  ;;  %v3068_v15 = vpop.xlane.xlu0 %3067 }
0x1c4c   :  { %v3087_v21 = vsub.f32 %v3055_v57, %v3071_v14  ;;  %v3086_v43 = vsub.f32 %v3054_v4, %v3068_v15 }
0x1c4e   :  { %v3098_v23 = vmul.f32 1.442695, %v3087_v21  ;;  %v3096_v35 = vmul.f32 1.442695, %v3086_v43 }
0x1c50   :  { %6525 = vpow2.f32 %v3098_v23 }
0x1c51   :  { %6527 = vpow2.f32 %v3096_v35 }
0x1c53   :  { %v3077_v56 = vpop.xlane.xlu1 %3076  ;;  %v3074_v45 = vpop.xlane.xlu0 %3073 }
0x1c54   :  { %v3089_v25 = vsub.f32 %v3057_v12, %v3077_v56  ;;  %v3088_v17 = vsub.f32 %v7817_v47, %v3074_v45 }
0x1c56   :  { %v3102_v42 = vmul.f32 1.442695, %v3089_v25  ;;  %v3100_v9 = vmul.f32 1.442695, %v3088_v17 }
0x1c58   :  { %6529 = vpow2.f32 %v3102_v42 }
0x1c5b   :  { %v3083_v46 = vpop.xlane.xlu1 %3082  ;;  %v3080_v5 = vpop.xlane.xlu0 %3079 }
0x1c5c   :  { %v3091_v16 = vsub.f32 %v3059_v32, %v3083_v46  ;;  %v3090_v11 = vsub.f32 %v7822_v28, %v3080_v5 }
0x1c5d   :  { %v6526_v55 = vpop.eup %6525 }
0x1c5e   :  { %v7835_v34 = vpop.eup %6527  ;;  %v3106_v61 = vmul.f32 1.442695, %v3091_v16  ;;  %v3117_v6 = vsel %vm2662_vm8, %v6526_v55, 0.0  ;;  %v3104_v38 = vmul.f32 1.442695, %v3090_v11 }
0x1c5f   :  { %3118 = vadd.xlane.f32.xlu1 %v3117_v6  ;;  %v3114_v4 = vsel %vm2662_vm8, %v7835_v34, 0.0  ;;  %v3254_v12 = vpop.permute.xlu1 %3253  ;;  %v3302_v36 = vpop.permute.xlu0 %3301 }
0x1c60   :  { %6531 = vpow2.f32 %v3106_v61  ;;  %3115 = vadd.xlane.f32.xlu0 %v3114_v4  ;;  %v3307_v28 = vsel %vm3161_vm9, %v3302_v36, 0  ;;  %v3259_v32 = vsel %vm3161_vm9, %v3254_v12, 0 }
0x1c61   :  { %6533 = vpow2.f32 %v3100_v9 }
0x1c62   :  { %6535 = vpow2.f32 %v3104_v38 }
0x1c65   :  { %v7840_v57 = vpop.eup %6529 }
0x1c66   :  { %v3123_v19 = vsel %vm2662_vm8, %v7840_v57, 0.0 }
0x1c67   :  { %3124 = vadd.xlane.f32.xlu1 %v3123_v19 }
0x1c6d   :  { %v7844_v33 = vpop.eup %6531 }
0x1c6e   :  { %v3129_v50 = vsel %vm2662_vm8, %v7844_v33, 0.0  ;;  %v7854_v58 = vpop.eup %6533 }
0x1c6f   :  { %3130 = vadd.xlane.f32.xlu1 %v3129_v50  ;;  %v7858_v47 = vpop.eup %6535 }
0x1c76   :  { %3397 = vrot.lane.b32.xlu0 %v7746_v24, %s6906_s13  ;;  %v3120_v24 = vsel %vm2662_vm8, %v7854_v58, 0.0 }
0x1c80   :  { %3445 = vrot.lane.b32.xlu1 %v7756_v29, %s6906_s13  ;;  %v3126_v29 = vsel %vm2662_vm8, %v7858_v47, 0.0 }
0x1c90   :  { %v3113_v31 = vpop.xlane.xlu1 %3112  ;;  %v3110_v8 = vpop.xlane.xlu0 %3109 }
0x1c91   :  { %6537 = vrcp.f32 %v3113_v31 }
0x1c92   :  { %6539 = vrcp.f32 %v3110_v8 }
0x1c94   :  { %v3350_v39 = vpop.permute.xlu1 %3349 }
0x1c95   :  { %3121 = vadd.xlane.f32.xlu0 %v3120_v24 }
0x1c99   :  { %3127 = vadd.xlane.f32.xlu0 %v3126_v29 }
0x1c9e   :  { %v6538_v62 = vpop.eup %6537 }
0x1c9f   :  { %v6540_v18 = vpop.eup %6539  ;;  %v3141_v20 = vmul.f32 %v6538_v62, %v6524_v53  ;;  %v6359_v62 = vld [vmem:[%s8283_s12 + $0x8] sm:$0xff]  }
0x1ca0   :  { %v3140_v26 = vmul.f32 %v6540_v18, %v6522_v49 }
0x1ca1   :  { %v3149_v7 = vpack.c.bf16 %v3141_v20, %v3141_v20 }
0x1ca2   :  { %v3148_v27 = vpack.c.bf16 %v3140_v26, %v3140_v26 }
0x1ca3   :  { %6065 = vmatmul.mubr.msk.bf16.vlgmr.msra.gmra.mxu1 %vm2662_vm8, %v3149_v7 }
0x1ca4   :  { %6059 = vmatmul.mubr.msk.bf16.vlgmr.msra.gmra.mxu0 %vm2662_vm8, %v3148_v27  ;;  %6075 = vmatpush3.bf16.msra.mxu1 %v3307_v28 }
0x1ca5   :  { %6069 = vmatpush3.bf16.msra.mxu0 %v3259_v32  ;;  %6070 = vmatprep.mubr.msk.bf16.mxu0 %vm6904_vm0, %v6903_v0  ;;  %v6360_v32 = vld [vmem:[%s8283_s12] sm:$0xff]  }
0x1ca6   :  { %6076 = vmatprep.mubr.msk.bf16.mxu1 %vm6904_vm0, %v6903_v0  ;;  %6080 = vmatprep.subr.bf16.mxu0 %v6903_v0 }
0x1ca7   :  { %6086 = vmatprep.subr.bf16.mxu1 %v6903_v0 }
0x1caf   :  { %3493 = vrot.lane.b32.xlu0 %v7759_v30, %s6906_s13  ;;  %v3355_v30 = vsel %vm3161_vm9, %v3350_v39, 0 }
0x1ce8   :  { %v3119_v40 = vpop.xlane.xlu1 %3118 }
0x1ce9   :  { %6541 = vrcp.f32 %v3119_v40  ;;  %v3116_v10 = vpop.xlane.xlu0 %3115 }
0x1cea   :  { %6543 = vrcp.f32 %v3116_v10 }
0x1ced   :  { %v3398_v37 = vpop.permute.xlu0 %3397 }
0x1cee   :  { %v3403_v13 = vsel %vm3161_vm9, %v3398_v37, 0 }
0x1cf0   :  { %v3125_v54 = vpop.xlane.xlu1 %3124 }
0x1cf1   :  { %6545 = vrcp.f32 %v3125_v54 }
0x1cf6   :  { %v6542_v51 = vpop.eup %6541 }
0x1cf7   :  { %v6544_v52 = vpop.eup %6543  ;;  %v3143_v41 = vmul.f32 %v6542_v51, %v6526_v55 }
0x1cf8   :  { %v3142_v3 = vmul.f32 %v6544_v52, %v7835_v34  ;;  %v3131_v53 = vpop.xlane.xlu1 %3130 }
0x1cf9   :  { %v3151_v1 = vpack.c.bf16 %v3143_v41, %v3143_v41  ;;  %6547 = vrcp.f32 %v3131_v53 }
0x1cfa   :  { %v3150_v44 = vpack.c.bf16 %v3142_v3, %v3142_v3 }
0x1cfb   :  { %6077 = vmatmul.mubr.msk.bf16.vlgmr.msra.gmra.mxu1 %vm2662_vm8, %v3151_v1 }
0x1cfc   :  { %6071 = vmatmul.mubr.msk.bf16.vlgmr.msra.gmra.mxu0 %vm2662_vm8, %v3150_v44  ;;  %6087 = vmatpush3.bf16.msra.mxu1 %v3403_v13  ;;  %v3446_v25 = vpop.permute.xlu1 %3445 }
0x1cfd   :  { %6081 = vmatpush3.bf16.msra.mxu0 %v3355_v30  ;;  %6088 = vmatprep.mubr.msk.bf16.mxu1 %vm6904_vm0, %v6903_v0  ;;  %v3451_v16 = vsel %vm3161_vm9, %v3446_v25, 0 }
0x1cfe   :  { %v6546_v63 = vpop.eup %6545  ;;  %6098 = vmatprep.subr.bf16.mxu1 %v6903_v0  ;;  %6082 = vmatprep.mubr.msk.bf16.mxu0 %vm6904_vm0, %v6903_v0 }
0x1cff   :  { %v3145_v48 = vmul.f32 %v6546_v63, %v7840_v57  ;;  %6092 = vmatprep.subr.bf16.mxu0 %v6903_v0 }
0x1d01   :  { %v3153_v49 = vpack.c.bf16 %v3145_v48, %v3145_v48 }
0x1d03   :  { %6089 = vmatmul.mubr.msk.bf16.vlgmr.msra.gmra.mxu1 %vm2662_vm8, %v3153_v49 }
0x1d04   :  { %6100 = vmatprep.mubr.msk.bf16.mxu1 %vm6904_vm0, %v6903_v0 }
0x1d06   :  { %v6548_v60 = vpop.eup %6547 }
0x1d07   :  { %v3147_v15 = vmul.f32 %v6548_v60, %v7844_v33 }
0x1d09   :  { %v3155_v23 = vpack.c.bf16 %v3147_v15, %v3147_v15 }
0x1d1e   :  { %v3122_v59 = vpop.xlane.xlu0 %3121 }
0x1d1f   :  { %6549 = vrcp.f32 %v3122_v59 }
0x1d22   :  { %v3128_v14 = vpop.xlane.xlu0 %3127 }
0x1d23   :  { %6551 = vrcp.f32 %v3128_v14 }
0x1d26   :  { %v3494_v21 = vpop.permute.xlu0 %3493 }
0x1d27   :  { %v3499_v43 = vsel %vm3161_vm9, %v3494_v21, 0 }
0x1d28   :  { %6099 = vmatpush3.bf16.msra.mxu1 %v3499_v43 }
0x1d29   :  { %6112 = vmatprep.subr.bf16.mxu1 %v6903_v0 }
0x1d2b   :  { %6101 = vmatmul.mubr.msk.bf16.vlgmr.msra.gmra.mxu1 %vm2662_vm8, %v3155_v23 }
0x1d2c   :  { %v6550_v35 = vpop.eup %6549  ;;  %6116 = vmatprep.mubr.msk.bf16.mxu1 %vm6904_vm0, %v6903_v0 }
0x1d2d   :  { %v3144_v56 = vmul.f32 %v6550_v35, %v7854_v58  ;;  %v5557_v35 = vld [vmem:[#allocation9] ss:$0 sm:$0xff] }
0x1d2f   :  { %v3152_v42 = vpack.c.bf16 %v3144_v56, %v3144_v56 }
0x1d30   :  { %v6552_v46 = vpop.eup %6551 }
0x1d31   :  { %6083 = vmatmul.mubr.msk.bf16.vlgmr.msra.gmra.mxu0 %vm2662_vm8, %v3152_v42  ;;  %v3146_v55 = vmul.f32 %v6552_v46, %v7858_v47 }
0x1d32   :  { %6093 = vmatpush3.bf16.msra.mxu0 %v3451_v16  ;;  %6094 = vmatprep.mubr.msk.bf16.mxu0 %vm6904_vm0, %v6903_v0 }
0x1d33   :  { %6104 = vmatprep.subr.bf16.mxu0 %v6903_v0  ;;  %v3154_v34 = vpack.c.bf16 %v3146_v55, %v3146_v55 }
0x1d39   :  { %6095 = vmatmul.mubr.msk.bf16.vlgmr.msra.gmra.mxu0 %vm2662_vm8, %v3154_v34 }
0x1d3a   :  { %6108 = vmatprep.mubr.msk.bf16.mxu0 %vm6904_vm0, %v6903_v0  ;;  %6105 = vmatpush3.bf16.msra.mxu0 %v6359_v62 }
0x1d3b   :  { %6106 = vmatprep.subr.bf16.mxu0 %v6903_v0 }
0x1d3e   :  { %6107 = vmatpush3.bf16.msra.mxu0 %v6360_v32  ;;  %v6363_v32 = vld [vmem:[%s8287_s16 + $0x18] sm:$0xff]  }
0x1d3f   :  { %6120 = vmatprep.subr.bf16.mxu0 %v6903_v0 }
0x1d63   :  { %v3247_v61 = vpop.f32.mrf.mxu1 }
0x1d64   :  { %v3199_v6 = vpop.f32.mrf.mxu0 }
0x1d65   :  { %v6066_v4 = vpop.f32.mrf.mxu1 }
0x1d66   :  { %v6060_v57 = vpop.f32.mrf.mxu0 }
0x1d67   :  { %v3250_v19 = vpop.f32.mrf.mxu1 }
0x1d68   :  { %v3202_v33 = vpop.f32.mrf.mxu0 }
0x1d69   :  { %v6067_v50 = vpop.f32.mrf.mxu1 }
0x1d6a   :  { %v6061_v45 = vpop.f32.mrf.mxu0 }
0x1dbb   :  { %v3343_v17 = vpop.f32.mrf.mxu1 }
0x1dbc   :  { %v3295_v5 = vpop.f32.mrf.mxu0 }
0x1dbd   :  { %v6306_v9 = vpack.i.bf16 %v3343_v17, %v3295_v5  ;;  %v6078_v11 = vpop.f32.mrf.mxu1 }
0x1dbe   :  { %v6072_v38 = vpop.f32.mrf.mxu0 }
0x1dbf   :  { %6307 = vrot.lane.b32.xlu1 %v6306_v9, %s6913_s29  ;;  %v3346_v12 = vpop.f32.mrf.mxu1 }
0x1dc0   :  { %v3298_v36 = vpop.f32.mrf.mxu0 }
0x1dc1   :  { %v6079_v31 = vpop.f32.mrf.mxu1 }
0x1dc2   :  { %v6073_v8 = vpop.f32.mrf.mxu0 }
0x1dc3   :  { %v3439_v58 = vpop.f32.mrf.mxu1 }
0x1dc5   :  { %v6090_v24 = vpop.f32.mrf.mxu1 }
0x1dc6   :  { %v5561_v24 = vld [vmem:[#allocation13] ss:$0 sm:$0xff] }
0x1dc7   :  { %v3442_v47 = vpop.f32.mrf.mxu1 }
0x1dc8   :  { %v6361_v47 = vld [vmem:[%s8285_s14 + $0x8] sm:$0xff]  }
0x1dc9   :  { %v6091_v29 = vpop.f32.mrf.mxu1  ;;  %6113 = vmatpush3.bf16.msra.mxu1 %v6361_v47  ;;  %v6367_v47 = vld [vmem:[%s8281_s10 + $0x18] sm:$0xff]  }
0x1dca   :  { %v6362_v29 = vld [vmem:[%s8285_s14] sm:$0xff]   ;;  %6114 = vmatprep.subr.bf16.mxu1 %v6903_v0 }
0x1dcd   :  { %6115 = vmatpush3.bf16.msra.mxu1 %v6362_v29  ;;  %v6368_v29 = vld [vmem:[%s8281_s10 + $0x10] sm:$0xff]  }
0x1dce   :  { %6132 = vmatprep.subr.bf16.mxu1 %v6903_v0 }
0x1deb   :  { %v3535_v18 = vpop.f32.mrf.mxu1 }
0x1ded   :  { %v6102_v20 = vpop.f32.mrf.mxu1 }
0x1def   :  { %v3538_v26 = vpop.f32.mrf.mxu1 }
0x1df1   :  { %v3391_v7 = vpop.f32.mrf.mxu0  ;;  %v6103_v27 = vpop.f32.mrf.mxu1 }
0x1df2   :  { %v6311_v28 = vpack.i.bf16 %v3439_v58, %v3391_v7  ;;  %v5562_v58 = vld [vmem:[#allocation15] ss:$0 sm:$0xff] }
0x1df3   :  { %v6084_v39 = vpop.f32.mrf.mxu0 }
0x1df4   :  { %6312 = vrot.lane.b32.xlu0 %v6311_v28, %s6890_s3 }
0x1df5   :  { %v3394_v40 = vpop.f32.mrf.mxu0 }
0x1df7   :  { %v6085_v10 = vpop.f32.mrf.mxu0 }
0x1df9   :  { %v3487_v54 = vpop.f32.mrf.mxu0 }
0x1dfa   :  { %v6316_v51 = vpack.i.bf16 %v3535_v18, %v3487_v54 }
0x1dfb   :  { %v6096_v52 = vpop.f32.mrf.mxu0 }
0x1dfc   :  { %6317 = vrot.lane.b32.xlu1 %v6316_v51, %s6914_s20 }
0x1dfd   :  { %v3490_v41 = vpop.f32.mrf.mxu0 }
0x1dff   :  { %v6097_v37 = vpop.f32.mrf.mxu0 }
0x1e31   :  { %v6308_v3 = vpop.permute.xlu1 %6307 }
0x1e32   :  { %v6310_v44 = vunpack.i.h.bf16 %v6308_v3  ;;  %v6309_v13 = vunpack.i.l.bf16 %v6308_v3 }
0x1e34   :  { %v3566_v49 = vsel %vm2662_vm8, %v3247_v61, %v6310_v44  ;;  %v3565_v53 = vsel %vm2662_vm8, %v3199_v6, %v6309_v13  ;;  %v6364_v13 = vld [vmem:[%s8287_s16 + $0x10] sm:$0xff]  }
0x1e66   :  { %v6313_v1 = vpop.permute.xlu0 %6312 }
0x1e67   :  { %v6315_v30 = vunpack.i.h.bf16 %v6313_v1  ;;  %v6314_v63 = vunpack.i.l.bf16 %v6313_v1 }
0x1e69   :  { %v3569_v14 = vsel %vm3567_vm10, %v3566_v49, %v6315_v30  ;;  %v3568_v15 = vsel %vm3567_vm10, %v3565_v53, %v6314_v63  ;;  %v6365_v30 = vld [vmem:[%s8287_s16 + $0x8] sm:$0xff]   ;;  %v6366_v63 = vld [vmem:[%s8287_s16] sm:$0xff]  }
0x1e6e   :  { %v6318_v48 = vpop.permute.xlu1 %6317 }
0x1e6f   :  { %v6320_v59 = vunpack.i.h.bf16 %v6318_v48  ;;  %v6319_v60 = vunpack.i.l.bf16 %v6318_v48  ;;  %v5563_v48 = vld [vmem:[#allocation10] ss:$0 sm:$0xff] }
0x1e71   :  { %v3572_v21 = vsel %vm3570_vm11, %v3569_v14, %v6320_v59  ;;  %v3571_v43 = vsel %vm3570_vm11, %v3568_v15, %v6319_v60 }
0x1e72   :  { %v3573_v23 = vpack.c.bf16 %v3572_v21, %v3571_v43 }
0x1e74   :  { %6109 = vmatmul.mubr.msk.bf16.vlgmr.msra.gmra.mxu0 %vm364_vm4, %v3573_v23 }
0x1e75   :  { %6128 = vmatprep.mubr.msk.bf16.mxu0 %vm6904_vm0, %v6903_v0  ;;  %6121 = vmatpush3.bf16.msra.mxu0 %v6363_v32 }
0x1e76   :  { %6122 = vmatprep.subr.bf16.mxu0 %v6903_v0 }
0x1e79   :  { %6123 = vmatpush3.bf16.msra.mxu0 %v6364_v13  ;;  %v5579_v13 = vld [vmem:[#allocation7 + $0x1] ss:$0 sm:$0xff] }
0x1e7a   :  { %6124 = vmatprep.subr.bf16.mxu0 %v6903_v0 }
0x1e7d   :  { %6125 = vmatpush3.bf16.msra.mxu0 %v6365_v30 }
0x1e7e   :  { %6126 = vmatprep.subr.bf16.mxu0 %v6903_v0 }
0x1e81   :  { %6127 = vmatpush3.bf16.msra.mxu0 %v6366_v63 }
0x1e82   :  { %6146 = vmatprep.subr.bf16.mxu0 %v6903_v0 }
0x1f34   :  { %v3634_v56 = vpop.f32.mrf.mxu0 }
0x1f35   :  { %v3635_v25 = vadd.f32 %v5557_v35, %v3634_v56 }
0x1f36   :  { %v6110_v42 = vpop.f32.mrf.mxu0 }
0x1f37   :  { %3643 = vrot.lane.b32.xlu0 %v3635_v25, %s6908_s5 }
0x1f38   :  { %v3637_v46 = vpop.f32.mrf.mxu0 }
0x1f39   :  { %v3638_v16 = vadd.f32 %v5557_v35, %v3637_v46  ;;  %v5567_v35 = vld [vmem:[#allocation12] ss:$0 sm:$0xff] }
0x1f3a   :  { %v6111_v55 = vpop.f32.mrf.mxu0 }
0x1f3b   :  { %3645 = vrot.lane.b32.xlu1 %v3638_v16, %s6908_s5 }
0x1fa9   :  { %v3644_v34 = vpop.permute.xlu0 %3643 }
0x1faa   :  { %v3649_v61 = vadd.f32 %v3644_v34, %v7722_v22 }
0x1fac   :  { %3655 = vrot.lane.b32.xlu0 %v3649_v61, %s6907_s22 }
0x1fad   :  { %v3646_v6 = vpop.permute.xlu1 %3645 }
0x1fae   :  { %v3650_v4 = vadd.f32 %v3646_v6, %v7724_v2 }
0x1fb0   :  { %3657 = vrot.lane.b32.xlu1 %v3650_v4, %s6907_s22 }
0x201e   :  { %v3656_v57 = vpop.permute.xlu0 %3655 }
0x201f   :  { %v3661_v19 = vsel %vm364_vm4, %v3656_v57, 0.0 }
0x2020   :  { %3662 = vadd.xlane.f32.xlu0 %v3661_v19 }
0x2022   :  { %v3658_v33 = vpop.permute.xlu1 %3657 }
0x2023   :  { %v3664_v50 = vsel %vm364_vm4, %v3658_v33, 0.0 }
0x2024   :  { %3665 = vadd.xlane.f32.xlu1 %v3664_v50 }
0x20a9   :  { %v3663_v45 = vpop.xlane.xlu0 %3662 }
0x20aa   :  { %v3668_v17 = vmul.f32 0.03125, %v3663_v45 }
0x20ac   :  { %v3670_v5 = vsub.f32 %v3649_v61, %v3668_v17 }
0x20ad   :  { %v3666_v9 = vpop.xlane.xlu1 %3665 }
0x20ae   :  { %v3672_v22 = vmul.f32 %v3670_v5, %v3670_v5  ;;  %v3669_v11 = vmul.f32 0.03125, %v3666_v9 }
0x20b0   :  { %v3671_v38 = vsub.f32 %v3650_v4, %v3669_v11  ;;  %3676 = vrot.lane.b32.xlu0 %v3672_v22, %s6907_s22 }
0x20b2   :  { %v3673_v2 = vmul.f32 %v3671_v38, %v3671_v38 }
0x20b4   :  { %3678 = vrot.lane.b32.xlu1 %v3673_v2, %s6907_s22 }
0x2122   :  { %v3677_v12 = vpop.permute.xlu0 %3676 }
0x2123   :  { %v3682_v36 = vsel %vm364_vm4, %v3677_v12, 0.0 }
0x2124   :  { %3683 = vadd.xlane.f32.xlu0 %v3682_v36 }
0x2126   :  { %v3679_v31 = vpop.permute.xlu1 %3678 }
0x2127   :  { %v3685_v8 = vsel %vm364_vm4, %v3679_v31, 0.0 }
0x2128   :  { %3686 = vadd.xlane.f32.xlu1 %v3685_v8 }
0x2139   :  { %3711 = vrot.lane.b32.xlu1 %v5562_v58, %s6908_s5  ;;  %v5574_v58 = vld [vmem:[#allocation18] ss:$0 sm:$0xff] }
0x213a   :  { %3701 = vrot.lane.b32.xlu0 %v5561_v24, %s6908_s5  ;;  %v5573_v24 = vld [vmem:[#allocation16] ss:$0 sm:$0xff] }
0x21ad   :  { %v3684_v62 = vpop.xlane.xlu0 %3683 }
0x21ae   :  { %v3688_v18 = vmul.f32 0.03125, %v3684_v62 }
0x21b0   :  { %v3690_v20 = vadd.f32 1e-05, %v3688_v18 }
0x21b1   :  { %v3687_v26 = vpop.xlane.xlu1 %3686  ;;  %v3702_v40 = vpop.permute.xlu0 %3701 }
0x21b2   :  { %6553 = vrsqrt.f32 %v3690_v20  ;;  %v3689_v7 = vmul.f32 0.03125, %v3687_v26 }
0x21b4   :  { %v3691_v27 = vadd.f32 1e-05, %v3689_v7 }
0x21b5   :  { %v3712_v52 = vpop.permute.xlu1 %3711 }
0x21b6   :  { %6555 = vrsqrt.f32 %v3691_v27 }
0x21bf   :  { %v6554_v28 = vpop.eup %6553 }
0x21c0   :  { %v3694_v39 = vmul.f32 %v6554_v28, %v3670_v5 }
0x21c2   :  { %v3704_v51 = vmul.f32 %v3702_v40, %v3694_v39 }
0x21c3   :  { %v6556_v10 = vpop.eup %6555 }
0x21c4   :  { %v3695_v54 = vmul.f32 %v6556_v10, %v3671_v38  ;;  %v3714_v37 = vadd.f32 %v3712_v52, %v3704_v51 }
0x21c6   :  { %v3705_v41 = vmul.f32 %v3702_v40, %v3695_v54 }
0x21c8   :  { %v3715_v3 = vadd.f32 %v3712_v52, %v3705_v41 }
0x21ca   :  { %v3716_v1 = vpack.c.bf16 %v3715_v3, %v3714_v37 }
0x21cc   :  { %3729 = vrot.lane.b32.xlu0 %v3716_v1, %s6907_s22 }
0x223e   :  { %v3730_v44 = vpop.permute.xlu0 %3729 }
0x223f   :  { %6117 = vmatmul.mubr.msk.bf16.vlgmr.msra.gmra.mxu1 %vm364_vm4, %v3730_v44 }
0x2240   :  { %6136 = vmatprep.mubr.msk.bf16.mxu1 %vm6904_vm0, %v6903_v0  ;;  %6133 = vmatpush3.bf16.msra.mxu1 %v6367_v47 }
0x2241   :  { %6134 = vmatprep.subr.bf16.mxu1 %v6903_v0 }
0x2244   :  { %6135 = vmatpush3.bf16.msra.mxu1 %v6368_v29 }
0x2245   :  { %6140 = vmatprep.subr.bf16.mxu1 %v6903_v0 }
0x22ff   :  { %v3780_v49 = vpop.f32.mrf.mxu1 }
0x2300   :  { %v3781_v59 = vadd.f32 %v5563_v48, %v3780_v49 }
0x2301   :  { %v6118_v53 = vpop.f32.mrf.mxu1 }
0x2302   :  { %v3787_v21 = vmax.f32 %v3781_v59, 0.0 }
0x2303   :  { %v3783_v60 = vpop.f32.mrf.mxu1 }
0x2304   :  { %v3784_v14 = vadd.f32 %v5563_v48, %v3783_v60 }
0x2305   :  { %v6119_v15 = vpop.f32.mrf.mxu1 }
0x2306   :  { %v3788_v43 = vmax.f32 %v3784_v14, 0.0 }
0x2308   :  { %v3789_v23 = vpack.c.bf16 %v3788_v43, %v3787_v21 }
0x230a   :  { %6129 = vmatmul.mubr.msk.bf16.vlgmr.msra.gmra.mxu0 %vm3829_vm12, %v3789_v23 }
0x230b   :  { %6148 = vmatprep.mubr.msk.bf16.mxu0 %vm6904_vm0, %v6903_v0 }
0x23ca   :  { %v3867_v56 = vpop.f32.mrf.mxu0 }
0x23cb   :  { %v3868_v25 = vadd.f32 %v5567_v35, %v3867_v56 }
0x23cc   :  { %v6130_v42 = vpop.f32.mrf.mxu0 }
0x23cd   :  { %3876 = vrot.lane.b32.xlu1 %v3868_v25, %s6908_s5 }
0x23ce   :  { %v3870_v46 = vpop.f32.mrf.mxu0 }
0x23cf   :  { %v3871_v16 = vadd.f32 %v5567_v35, %v3870_v46 }
0x23d0   :  { %v6131_v55 = vpop.f32.mrf.mxu0 }
0x23d1   :  { %3878 = vrot.lane.b32.xlu0 %v3871_v16, %s6908_s5 }
0x243f   :  { %v3877_v34 = vpop.permute.xlu1 %3876 }
0x2440   :  { %v3882_v61 = vadd.f32 %v3877_v34, %v3714_v37 }
0x2442   :  { %3888 = vrot.lane.b32.xlu1 %v3882_v61, %s6907_s22 }
0x2443   :  { %v3879_v6 = vpop.permute.xlu0 %3878 }
0x2444   :  { %v3883_v4 = vadd.f32 %v3879_v6, %v3715_v3 }
0x2446   :  { %3890 = vrot.lane.b32.xlu0 %v3883_v4, %s6907_s22 }
0x24b4   :  { %v3889_v57 = vpop.permute.xlu1 %3888 }
0x24b5   :  { %v3894_v19 = vsel %vm364_vm4, %v3889_v57, 0.0 }
0x24b6   :  { %3895 = vadd.xlane.f32.xlu1 %v3894_v19 }
0x24b8   :  { %v3891_v33 = vpop.permute.xlu0 %3890 }
0x24b9   :  { %v3897_v50 = vsel %vm364_vm4, %v3891_v33, 0.0 }
0x24ba   :  { %3898 = vadd.xlane.f32.xlu0 %v3897_v50 }
0x253f   :  { %v3896_v45 = vpop.xlane.xlu1 %3895 }
0x2540   :  { %v3900_v17 = vmul.f32 0.03125, %v3896_v45 }
0x2542   :  { %v3902_v5 = vsub.f32 %v3882_v61, %v3900_v17 }
0x2543   :  { %v3899_v9 = vpop.xlane.xlu0 %3898 }
0x2544   :  { %v3904_v22 = vmul.f32 %v3902_v5, %v3902_v5  ;;  %v3901_v11 = vmul.f32 0.03125, %v3899_v9 }
0x2546   :  { %v3903_v38 = vsub.f32 %v3883_v4, %v3901_v11  ;;  %3908 = vrot.lane.b32.xlu0 %v3904_v22, %s6907_s22 }
0x2548   :  { %v3905_v2 = vmul.f32 %v3903_v38, %v3903_v38 }
0x254a   :  { %3910 = vrot.lane.b32.xlu1 %v3905_v2, %s6907_s22 }
0x25b8   :  { %v3909_v12 = vpop.permute.xlu0 %3908 }
0x25b9   :  { %v3914_v36 = vsel %vm364_vm4, %v3909_v12, 0.0 }
0x25ba   :  { %3915 = vadd.xlane.f32.xlu1 %v3914_v36 }
0x25bc   :  { %v3911_v31 = vpop.permute.xlu1 %3910 }
0x25bd   :  { %v3917_v8 = vsel %vm364_vm4, %v3911_v31, 0.0 }
0x25be   :  { %3918 = vadd.xlane.f32.xlu0 %v3917_v8 }
0x25cb   :  { %3943 = vrot.lane.b32.xlu1 %v5574_v58, %s6908_s5 }
0x25d4   :  { %3933 = vrot.lane.b32.xlu0 %v5573_v24, %s6908_s5 }
0x2643   :  { %v3916_v62 = vpop.xlane.xlu1 %3915 }
0x2644   :  { %v3920_v18 = vmul.f32 0.03125, %v3916_v62 }
0x2646   :  { %v3922_v20 = vadd.f32 1e-05, %v3920_v18 }
0x2647   :  { %v3919_v26 = vpop.xlane.xlu0 %3918  ;;  %v3944_v51 = vpop.permute.xlu1 %3943 }
0x2648   :  { %6557 = vrsqrt.f32 %v3922_v20  ;;  %v3921_v7 = vmul.f32 0.03125, %v3919_v26 }
0x264a   :  { %v3923_v27 = vadd.f32 1e-05, %v3921_v7 }
0x264b   :  { %v3934_v39 = vpop.permute.xlu0 %3933 }
0x264c   :  { %6559 = vrsqrt.f32 %v3923_v27 }
0x2655   :  { %v6558_v28 = vpop.eup %6557 }
0x2656   :  { %v3926_v32 = vmul.f32 %v6558_v28, %v3902_v5 }
0x2658   :  { %v3936_v54 = vmul.f32 %v3934_v39, %v3926_v32 }
0x2659   :  { %v6560_v40 = vpop.eup %6559 }
0x265a   :  { %v3927_v10 = vmul.f32 %v6560_v40, %v3903_v38  ;;  %v7990_v41 = vadd.f32 %v3944_v51, %v3936_v54 }
0x265c   :  { %v3937_v52 = vmul.f32 %v3934_v39, %v3927_v10 }
0x265e   :  { %v7992_v37 = vadd.f32 %v3944_v51, %v3937_v52 }
0x2660   :  { %v3948_v3 = vpack.c.bf16 %v7992_v37, %v7990_v41 }
0x2662   :  { %3963 = vrot.lane.b32.xlu1 %v3948_v3, %s6907_s22 }
0x26d4   :  { %v3964_v1 = vpop.permute.xlu1 %3963 }
0x26d5   :  { %6137 = vmatmul.mubr.msk.bf16.vlgmr.msra.gmra.mxu1 %vm364_vm4, %v3964_v1 }
0x26d6   :  { %6142 = vmatprep.mubr.msk.bf16.mxu1 %vm6904_vm0, %v6903_v0 }
0x2795   :  { %v4014_v44 = vpop.f32.mrf.mxu1 }
0x2796   :  { %v4015_v48 = vadd.f32 %v5579_v13, %v4014_v44 }
0x2797   :  { %v6138_v30 = vpop.f32.mrf.mxu1 }
0x2798   :  { %v4041_v60 = vpack.c.bf16 %v4015_v48, %v4015_v48 }
0x2799   :  { %v4017_v63 = vpop.f32.mrf.mxu1 }
0x279a   :  { %v4018_v49 = vadd.f32 %v5579_v13, %v4017_v63 }
0x279b   :  { %v6139_v53 = vpop.f32.mrf.mxu1 }
0x279c   :  { %v6326_v59 = vpack.i.bf16 %v4018_v49, %v4015_v48  ;;  %v4042_v14 = vpack.c.bf16 %v4018_v49, %v4018_v49 }
0x279e   :  { %6327 = vrot.lane.b32.xlu1 %v6326_v59, %s6910_s25  ;;  %6322 = vrot.lane.b32.xlu0 %v6326_v59, %s6911_s6 }
0x27a2   :  { %4050 = vrot.lane.b32.xlu1 %v4041_v60, %s6907_s22  ;;  %6332 = vrot.lane.b32.xlu0 %v6326_v59, %s6912_s2 }
0x27a6   :  { %4099 = vrot.lane.b32.xlu0 %v4042_v14, %s6907_s22 }
0x2810   :  { %v6328_v15 = vpop.permute.xlu1 %6327  ;;  %v6323_v21 = vpop.permute.xlu0 %6322 }
0x2811   :  { %v6325_v43 = vunpack.i.h.bf16 %v6323_v21  ;;  %v6324_v23 = vunpack.i.l.bf16 %v6323_v21  ;;  %v6330_v35 = vunpack.i.h.bf16 %v6328_v15  ;;  %v6329_v56 = vunpack.i.l.bf16 %v6328_v15 }
0x2813   :  { %v8005_v25 = vpack.c.bf16 %v6325_v43, %v6325_v43  ;;  %v8007_v42 = vpack.c.bf16 %v6324_v23, %v6324_v23  ;;  %v8014_v34 = vpack.c.bf16 %v6330_v35, %v6330_v35  ;;  %v8016_v61 = vpack.c.bf16 %v6329_v56, %v6329_v56 }
0x2814   :  { %v4051_v46 = vpop.permute.xlu1 %4050  ;;  %v6333_v16 = vpop.permute.xlu0 %6332 }
0x2815   :  { %v4056_v55 = vsel %vm2662_vm8, %v4051_v46, 0  ;;  %4148 = vrot.lane.b32.xlu1 %v8007_v42, %s6907_s22  ;;  %4197 = vrot.lane.b32.xlu0 %v8005_v25, %s6907_s22  ;;  %v6334_v6 = vunpack.i.l.bf16 %v6333_v16  ;;  %v6335_v4 = vunpack.i.h.bf16 %v6333_v16 }
0x2816   :  { %6141 = vmatpush3.bf16.xpose.msra.mxu1 %v4056_v55 }
0x2817   :  { %6152 = vmatprep.subr.bf16.mxu1 %v6903_v0  ;;  %v8024_v33 = vpack.c.bf16 %v6334_v6, %v6334_v6  ;;  %v8027_v50 = vpack.c.bf16 %v6335_v4, %v6335_v4 }
0x2818   :  { %v4100_v57 = vpop.permute.xlu0 %4099 }
0x2819   :  { %v4105_v19 = vsel %vm2662_vm8, %v4100_v57, 0  ;;  %4246 = vrot.lane.b32.xlu1 %v8016_v61, %s6907_s22  ;;  %4295 = vrot.lane.b32.xlu0 %v8014_v34, %s6907_s22 }
0x281a   :  { %6147 = vmatpush3.bf16.xpose.msra.mxu0 %v4105_v19 }
0x281b   :  { %6158 = vmatprep.subr.bf16.mxu0 %v6903_v0 }
0x281d   :  { %6143 = vmatmul.mubr.msk.bf16.vlgmr.msra.gmra.mxu1 %vm2662_vm8, %v4041_v60  ;;  %4344 = vrot.lane.b32.xlu1 %v8024_v33, %s6907_s22 }
0x281e   :  { %4393 = vrot.lane.b32.xlu0 %v8027_v50, %s6907_s22  ;;  %6154 = vmatprep.mubr.msk.bf16.mxu1 %vm6904_vm0, %v6903_v0 }
0x2821   :  { %4593 = vrot.lane.b32.xlu1 %v4042_v14, %s6906_s13  ;;  %6149 = vmatmul.mubr.msk.bf16.vlgmr.msra.gmra.mxu0 %vm2662_vm8, %v4042_v14 }
0x2822   :  { %4545 = vrot.lane.b32.xlu0 %v4041_v60, %s6906_s13  ;;  %6160 = vmatprep.mubr.msk.bf16.mxu0 %vm6904_vm0, %v6903_v0 }
0x2887   :  { %v4149_v45 = vpop.permute.xlu1 %4148  ;;  %v4198_v17 = vpop.permute.xlu0 %4197 }
0x2888   :  { %v4154_v5 = vsel %vm2662_vm8, %v4149_v45, 0  ;;  %v4203_v9 = vsel %vm2662_vm8, %v4198_v17, 0 }
0x2889   :  { %6153 = vmatpush3.bf16.xpose.msra.mxu1 %v4154_v5  ;;  %6159 = vmatpush3.bf16.xpose.msra.mxu0 %v4203_v9 }
0x288a   :  { %6164 = vmatprep.subr.bf16.mxu1 %v6903_v0  ;;  %6170 = vmatprep.subr.bf16.mxu0 %v6903_v0 }
0x288b   :  { %v4247_v22 = vpop.permute.xlu1 %4246  ;;  %v4296_v11 = vpop.permute.xlu0 %4295 }
0x288c   :  { %v4252_v38 = vsel %vm2662_vm8, %v4247_v22, 0  ;;  %v4301_v2 = vsel %vm2662_vm8, %v4296_v11, 0 }
0x288f   :  { %v4345_v12 = vpop.permute.xlu1 %4344 }
0x2890   :  { %6155 = vmatmul.mubr.msk.bf16.vlgmr.msra.gmra.mxu1 %vm2662_vm8, %v8007_v42  ;;  %6161 = vmatmul.mubr.msk.bf16.vlgmr.msra.gmra.mxu0 %vm2662_vm8, %v8005_v25  ;;  %v4394_v36 = vpop.permute.xlu0 %4393  ;;  %v4350_v31 = vsel %vm2662_vm8, %v4345_v12, 0 }
0x2891   :  { %6165 = vmatpush3.bf16.xpose.msra.mxu1 %v4252_v38  ;;  %6171 = vmatpush3.bf16.xpose.msra.mxu0 %v4301_v2  ;;  %v4399_v8 = vsel %vm2662_vm8, %v4394_v36, 0 }
0x2892   :  { %6166 = vmatprep.mubr.msk.bf16.mxu1 %vm6904_vm0, %v6903_v0  ;;  %6172 = vmatprep.mubr.msk.bf16.mxu0 %vm6904_vm0, %v6903_v0 }
0x2893   :  { %6176 = vmatprep.subr.bf16.mxu1 %v6903_v0  ;;  %6182 = vmatprep.subr.bf16.mxu0 %v6903_v0  ;;  %v4594_v58 = vpop.permute.xlu1 %4593 }
0x2894   :  { %v4546_v24 = vpop.permute.xlu0 %4545  ;;  %v4599_v47 = vsel %vm3161_vm9, %v4594_v58, 0 }
0x2895   :  { %v4551_v29 = vsel %vm3161_vm9, %v4546_v24, 0 }
0x2898   :  { %6167 = vmatmul.mubr.msk.bf16.vlgmr.msra.gmra.mxu1 %vm2662_vm8, %v8016_v61  ;;  %6173 = vmatmul.mubr.msk.bf16.vlgmr.msra.gmra.mxu0 %vm2662_vm8, %v8014_v34 }
0x2899   :  { %6177 = vmatpush3.bf16.xpose.msra.mxu1 %v4350_v31  ;;  %6183 = vmatpush3.bf16.xpose.msra.mxu0 %v4399_v8 }
0x289a   :  { %6178 = vmatprep.mubr.msk.bf16.mxu1 %vm6904_vm0, %v6903_v0  ;;  %6184 = vmatprep.mubr.msk.bf16.mxu0 %vm6904_vm0, %v6903_v0 }
0x289b   :  { %6188 = vmatprep.subr.bf16.mxu1 %v6903_v0  ;;  %6194 = vmatprep.subr.bf16.mxu0 %v6903_v0 }
0x28a0   :  { %6179 = vmatmul.mubr.msk.bf16.vlgmr.msra.gmra.mxu1 %vm2662_vm8, %v8024_v33  ;;  %6185 = vmatmul.mubr.msk.bf16.vlgmr.msra.gmra.mxu0 %vm2662_vm8, %v8027_v50 }
0x28a1   :  { %6189 = vmatpush3.bf16.msra.mxu1 %v4551_v29  ;;  %6195 = vmatpush3.bf16.msra.mxu0 %v4599_v47 }
0x28a2   :  { %6190 = vmatprep.mubr.msk.bf16.mxu1 %vm6904_vm0, %v6903_v0  ;;  %6196 = vmatprep.mubr.msk.bf16.mxu0 %vm6904_vm0, %v6903_v0 }
0x28a3   :  { %6200 = vmatprep.subr.bf16.mxu1 %v6903_v0  ;;  %6206 = vmatprep.subr.bf16.mxu0 %v6903_v0 }
0x28dd   :  { %v4092_v62 = vpop.f32.mrf.mxu1 }
0x28de   :  { %v4441_v18 = vmul.f32 0.35355338, %v4092_v62 }
0x28df   :  { %v6144_v20 = vpop.f32.mrf.mxu1 }
0x28e0   :  { %v4449_v26 = vsel %vm2662_vm8, %v4441_v18, -inf }
0x28e1   :  { %4450 = vmax.xlane.f32.xlu1 %v4449_v26  ;;  %v4095_v7 = vpop.f32.mrf.mxu1  ;;  %v4141_v27 = vpop.f32.mrf.mxu0 }
0x28e2   :  { %v4442_v28 = vmul.f32 0.35355338, %v4141_v27 }
0x28e3   :  { %v6145_v32 = vpop.f32.mrf.mxu1  ;;  %v6150_v39 = vpop.f32.mrf.mxu0 }
0x28e4   :  { %v4452_v40 = vsel %vm2662_vm8, %v4442_v28, -inf }
0x28e5   :  { %4453 = vmax.xlane.f32.xlu0 %v4452_v40  ;;  %v4144_v10 = vpop.f32.mrf.mxu0 }
0x28e7   :  { %v6151_v54 = vpop.f32.mrf.mxu0 }
0x2950   :  { %v4190_v51 = vpop.f32.mrf.mxu1  ;;  %v4239_v52 = vpop.f32.mrf.mxu0 }
0x2951   :  { %v4443_v3 = vmul.f32 0.35355338, %v4190_v51  ;;  %v4444_v1 = vmul.f32 0.35355338, %v4239_v52 }
0x2952   :  { %v6156_v44 = vpop.f32.mrf.mxu1  ;;  %v6162_v13 = vpop.f32.mrf.mxu0 }
0x2953   :  { %v4455_v30 = vsel %vm2662_vm8, %v4443_v3, -inf  ;;  %v4458_v63 = vsel %vm2662_vm8, %v4444_v1, -inf }
0x2954   :  { %v4193_v48 = vpop.f32.mrf.mxu1  ;;  %4456 = vmax.xlane.f32.xlu0 %v4455_v30  ;;  %4459 = vmax.xlane.f32.xlu1 %v4458_v63  ;;  %v4242_v49 = vpop.f32.mrf.mxu0 }
0x2956   :  { %v6157_v53 = vpop.f32.mrf.mxu1  ;;  %v6163_v59 = vpop.f32.mrf.mxu0 }
0x2958   :  { %v4288_v60 = vpop.f32.mrf.mxu1  ;;  %v4337_v14 = vpop.f32.mrf.mxu0 }
0x2959   :  { %v8085_v15 = vmul.f32 0.35355338, %v4288_v60  ;;  %v4446_v21 = vmul.f32 0.35355338, %v4337_v14 }
0x295a   :  { %v6168_v43 = vpop.f32.mrf.mxu1  ;;  %v6174_v23 = vpop.f32.mrf.mxu0 }
0x295b   :  { %v4461_v35 = vsel %vm2662_vm8, %v8085_v15, -inf  ;;  %v4464_v56 = vsel %vm2662_vm8, %v4446_v21, -inf }
0x295c   :  { %v4291_v46 = vpop.f32.mrf.mxu1  ;;  %4462 = vmax.xlane.f32.xlu0 %v4461_v35  ;;  %4465 = vmax.xlane.f32.xlu1 %v4464_v56  ;;  %v4340_v16 = vpop.f32.mrf.mxu0 }
0x295e   :  { %v6169_v55 = vpop.f32.mrf.mxu1  ;;  %v6175_v6 = vpop.f32.mrf.mxu0 }
0x2960   :  { %v4386_v4 = vpop.f32.mrf.mxu1  ;;  %v4435_v57 = vpop.f32.mrf.mxu0 }
0x2961   :  { %v8090_v19 = vmul.f32 0.35355338, %v4386_v4  ;;  %v4448_v45 = vmul.f32 0.35355338, %v4435_v57 }
0x2962   :  { %v6180_v17 = vpop.f32.mrf.mxu1  ;;  %v6186_v5 = vpop.f32.mrf.mxu0 }
0x2963   :  { %v4467_v9 = vsel %vm2662_vm8, %v8090_v19, -inf  ;;  %v4470_v22 = vsel %vm2662_vm8, %v4448_v45, -inf }
0x2964   :  { %v4389_v11 = vpop.f32.mrf.mxu1  ;;  %4468 = vmax.xlane.f32.xlu0 %v4467_v9  ;;  %4471 = vmax.xlane.f32.xlu1 %v4470_v22  ;;  %v4438_v38 = vpop.f32.mrf.mxu0 }
0x2966   :  { %v6181_v2 = vpop.f32.mrf.mxu1  ;;  %v6187_v12 = vpop.f32.mrf.mxu0 }
0x296a   :  { %v4451_v36 = vpop.xlane.xlu1 %4450 }
0x296b   :  { %v4473_v8 = vsub.f32 %v4441_v18, %v4451_v36 }
0x296d   :  { %v4481_v24 = vmul.f32 1.442695, %v4473_v8 }
0x296e   :  { %v4454_v31 = vpop.xlane.xlu0 %4453 }
0x296f   :  { %v4474_v58 = vsub.f32 %v4442_v28, %v4454_v31  ;;  %6561 = vpow2.f32 %v4481_v24 }
0x2971   :  { %v4483_v47 = vmul.f32 1.442695, %v4474_v58 }
0x2973   :  { %6563 = vpow2.f32 %v4483_v47 }
0x2975   :  { %4641 = vrot.lane.b32.xlu1 %v8007_v42, %s6906_s13 }
0x297a   :  { %4689 = vrot.lane.b32.xlu0 %v8005_v25, %s6906_s13 }
0x297c   :  { %v6562_v29 = vpop.eup %6561 }
0x297d   :  { %v4497_v20 = vsel %vm2662_vm8, %v6562_v29, 0.0 }
0x2980   :  { %v6564_v62 = vpop.eup %6563 }
0x2981   :  { %v4500_v26 = vsel %vm2662_vm8, %v6564_v62, 0.0 }
0x2999   :  { %4498 = vadd.xlane.f32.xlu0 %v4497_v20  ;;  %4501 = vadd.xlane.f32.xlu1 %v4500_v26 }
0x29aa   :  { %4737 = vrot.lane.b32.xlu1 %v8016_v61, %s6906_s13 }
0x29dd   :  { %v4457_v25 = vpop.xlane.xlu0 %4456  ;;  %v4460_v42 = vpop.xlane.xlu1 %4459 }
0x29de   :  { %v4475_v7 = vsub.f32 %v4443_v3, %v4457_v25  ;;  %v4476_v18 = vsub.f32 %v4444_v1, %v4460_v42 }
0x29e0   :  { %v4485_v27 = vmul.f32 1.442695, %v4475_v7  ;;  %v4487_v28 = vmul.f32 1.442695, %v4476_v18 }
0x29e2   :  { %6565 = vpow2.f32 %v4485_v27 }
0x29e3   :  { %6567 = vpow2.f32 %v4487_v28 }
0x29e5   :  { %v4466_v32 = vpop.xlane.xlu1 %4465  ;;  %v4463_v48 = vpop.xlane.xlu0 %4462 }
0x29e6   :  { %v4478_v39 = vsub.f32 %v4446_v21, %v4466_v32  ;;  %v4477_v49 = vsub.f32 %v8085_v15, %v4463_v48 }
0x29e8   :  { %v4491_v40 = vmul.f32 1.442695, %v4478_v39  ;;  %v4489_v59 = vmul.f32 1.442695, %v4477_v49 }
0x29ea   :  { %6569 = vpow2.f32 %v4491_v40 }
0x29ed   :  { %v4472_v10 = vpop.xlane.xlu1 %4471  ;;  %v4469_v53 = vpop.xlane.xlu0 %4468 }
0x29ee   :  { %v4480_v54 = vsub.f32 %v4448_v45, %v4472_v10  ;;  %v4479_v60 = vsub.f32 %v8090_v19, %v4469_v53 }
0x29ef   :  { %v6566_v51 = vpop.eup %6565 }
0x29f0   :  { %v6568_v52 = vpop.eup %6567  ;;  %v4495_v44 = vmul.f32 1.442695, %v4480_v54  ;;  %v4503_v13 = vsel %vm2662_vm8, %v6566_v51, 0.0  ;;  %v4493_v14 = vmul.f32 1.442695, %v4479_v60 }
0x29f1   :  { %4504 = vadd.xlane.f32.xlu0 %v4503_v13  ;;  %v4506_v61 = vsel %vm2662_vm8, %v6568_v52, 0.0  ;;  %v4690_v21 = vpop.permute.xlu0 %4689  ;;  %v4642_v43 = vpop.permute.xlu1 %4641 }
0x29f2   :  { %4507 = vadd.xlane.f32.xlu1 %v4506_v61  ;;  %6571 = vpow2.f32 %v4495_v44  ;;  %v4647_v19 = vsel %vm3161_vm9, %v4642_v43, 0  ;;  %v4695_v45 = vsel %vm3161_vm9, %v4690_v21, 0 }
0x29f3   :  { %6573 = vpow2.f32 %v4489_v59 }
0x29f4   :  { %6575 = vpow2.f32 %v4493_v14 }
0x29f7   :  { %v8105_v3 = vpop.eup %6569 }
0x29f8   :  { %v4512_v1 = vsel %vm2662_vm8, %v8105_v3, 0.0 }
0x29f9   :  { %4513 = vadd.xlane.f32.xlu1 %v4512_v1 }
0x29ff   :  { %v8109_v30 = vpop.eup %6571 }
0x2a00   :  { %v4518_v63 = vsel %vm2662_vm8, %v8109_v30, 0.0  ;;  %v8119_v23 = vpop.eup %6573 }
0x2a01   :  { %4519 = vadd.xlane.f32.xlu1 %v4518_v63  ;;  %v8123_v15 = vpop.eup %6575 }
0x2a07   :  { %4785 = vrot.lane.b32.xlu0 %v8014_v34, %s6906_s13  ;;  %v4509_v34 = vsel %vm2662_vm8, %v8119_v23, 0.0 }
0x2a12   :  { %4833 = vrot.lane.b32.xlu1 %v8024_v33, %s6906_s13  ;;  %v4515_v33 = vsel %vm2662_vm8, %v8123_v15, 0.0 }
0x2a22   :  { %v4499_v35 = vpop.xlane.xlu0 %4498  ;;  %v4502_v56 = vpop.xlane.xlu1 %4501 }
0x2a23   :  { %6577 = vrcp.f32 %v4499_v35 }
0x2a24   :  { %6579 = vrcp.f32 %v4502_v56 }
0x2a26   :  { %4510 = vadd.xlane.f32.xlu0 %v4509_v34  ;;  %v4738_v17 = vpop.permute.xlu1 %4737 }
0x2a27   :  { %v4743_v58 = vsel %vm3161_vm9, %v4738_v17, 0 }
0x2a2a   :  { %4516 = vadd.xlane.f32.xlu0 %v4515_v33 }
0x2a30   :  { %v6578_v46 = vpop.eup %6577 }
0x2a31   :  { %v6580_v16 = vpop.eup %6579  ;;  %v4529_v55 = vmul.f32 %v6578_v46, %v6562_v29  ;;  %v6369_v46 = vld [vmem:[%s8283_s12 + $0x18] sm:$0xff]  }
0x2a32   :  { %v4530_v6 = vmul.f32 %v6580_v16, %v6564_v62 }
0x2a33   :  { %v4537_v4 = vpack.c.bf16 %v4529_v55, %v4529_v55 }
0x2a34   :  { %v4538_v57 = vpack.c.bf16 %v4530_v6, %v4530_v6 }
0x2a35   :  { %6191 = vmatmul.mubr.msk.bf16.vlgmr.msra.gmra.mxu1 %vm2662_vm8, %v4537_v4 }
0x2a36   :  { %6197 = vmatmul.mubr.msk.bf16.vlgmr.msra.gmra.mxu0 %vm2662_vm8, %v4538_v57  ;;  %6201 = vmatpush3.bf16.msra.mxu1 %v4647_v19 }
0x2a37   :  { %6207 = vmatpush3.bf16.msra.mxu0 %v4695_v45  ;;  %6202 = vmatprep.mubr.msk.bf16.mxu1 %vm6904_vm0, %v6903_v0  ;;  %v6370_v45 = vld [vmem:[%s8283_s12 + $0x10] sm:$0xff]  }
0x2a38   :  { %6208 = vmatprep.mubr.msk.bf16.mxu0 %vm6904_vm0, %v6903_v0  ;;  %6212 = vmatprep.subr.bf16.mxu1 %v6903_v0 }
0x2a39   :  { %6218 = vmatprep.subr.bf16.mxu0 %v6903_v0 }
0x2a40   :  { %4881 = vrot.lane.b32.xlu0 %v8027_v50, %s6906_s13 }
0x2a7a   :  { %v4505_v5 = vpop.xlane.xlu0 %4504 }
0x2a7b   :  { %6581 = vrcp.f32 %v4505_v5  ;;  %v4508_v9 = vpop.xlane.xlu1 %4507 }
0x2a7c   :  { %6583 = vrcp.f32 %v4508_v9 }
0x2a7e   :  { %v4786_v36 = vpop.permute.xlu0 %4785 }
0x2a7f   :  { %v4791_v50 = vsel %vm3161_vm9, %v4786_v36, 0 }
0x2a82   :  { %v4514_v22 = vpop.xlane.xlu1 %4513 }
0x2a83   :  { %6585 = vrcp.f32 %v4514_v22 }
0x2a88   :  { %v6582_v11 = vpop.eup %6581 }
0x2a89   :  { %v6584_v38 = vpop.eup %6583  ;;  %v4531_v2 = vmul.f32 %v6582_v11, %v6566_v51 }
0x2a8a   :  { %v4532_v12 = vmul.f32 %v6584_v38, %v6568_v52  ;;  %v4520_v62 = vpop.xlane.xlu1 %4519 }
0x2a8b   :  { %v4539_v31 = vpack.c.bf16 %v4531_v2, %v4531_v2  ;;  %6587 = vrcp.f32 %v4520_v62 }
0x2a8c   :  { %v4540_v8 = vpack.c.bf16 %v4532_v12, %v4532_v12 }
0x2a8d   :  { %6203 = vmatmul.mubr.msk.bf16.vlgmr.msra.gmra.mxu1 %vm2662_vm8, %v4539_v31 }
0x2a8e   :  { %6209 = vmatmul.mubr.msk.bf16.vlgmr.msra.gmra.mxu0 %vm2662_vm8, %v4540_v8  ;;  %6213 = vmatpush3.bf16.msra.mxu1 %v4743_v58  ;;  %v4834_v39 = vpop.permute.xlu1 %4833 }
0x2a8f   :  { %6219 = vmatpush3.bf16.msra.mxu0 %v4791_v50  ;;  %6220 = vmatprep.mubr.msk.bf16.mxu0 %vm6904_vm0, %v6903_v0  ;;  %v4839_v54 = vsel %vm3161_vm9, %v4834_v39, 0 }
0x2a90   :  { %6230 = vmatprep.subr.bf16.mxu0 %v6903_v0  ;;  %6214 = vmatprep.mubr.msk.bf16.mxu1 %vm6904_vm0, %v6903_v0  ;;  %v6586_v24 = vpop.eup %6585 }
0x2a91   :  { %6224 = vmatprep.subr.bf16.mxu1 %v6903_v0  ;;  %v4534_v47 = vmul.f32 %v6586_v24, %v8105_v3 }
0x2a93   :  { %v4542_v29 = vpack.c.bf16 %v4534_v47, %v4534_v47 }
0x2a96   :  { %6221 = vmatmul.mubr.msk.bf16.vlgmr.msra.gmra.mxu0 %vm2662_vm8, %v4542_v29 }
0x2a97   :  { %6232 = vmatprep.mubr.msk.bf16.mxu0 %vm6904_vm0, %v6903_v0 }
0x2a98   :  { %v6588_v26 = vpop.eup %6587 }
0x2a99   :  { %v4536_v42 = vmul.f32 %v6588_v26, %v8109_v30 }
0x2a9b   :  { %v4544_v27 = vpack.c.bf16 %v4536_v42, %v4536_v42 }
0x2aaf   :  { %v4511_v20 = vpop.xlane.xlu0 %4510 }
0x2ab0   :  { %6589 = vrcp.f32 %v4511_v20 }
0x2ab3   :  { %v4517_v25 = vpop.xlane.xlu0 %4516 }
0x2ab4   :  { %6591 = vrcp.f32 %v4517_v25 }
0x2ab7   :  { %v4882_v7 = vpop.permute.xlu0 %4881 }
0x2ab8   :  { %v4887_v18 = vsel %vm3161_vm9, %v4882_v7, 0 }
0x2ab9   :  { %6231 = vmatpush3.bf16.msra.mxu0 %v4887_v18 }
0x2aba   :  { %6244 = vmatprep.subr.bf16.mxu0 %v6903_v0 }
0x2abc   :  { %6233 = vmatmul.mubr.msk.bf16.vlgmr.msra.gmra.mxu0 %vm2662_vm8, %v4544_v27 }
0x2abd   :  { %v6590_v28 = vpop.eup %6589  ;;  %6248 = vmatprep.mubr.msk.bf16.mxu0 %vm6904_vm0, %v6903_v0 }
0x2abe   :  { %v4533_v32 = vmul.f32 %v6590_v28, %v8119_v23  ;;  %v5603_v28 = vld [vmem:[#allocation9 + $0x1] ss:$0 sm:$0xff] }
0x2ac0   :  { %v4541_v40 = vpack.c.bf16 %v4533_v32, %v4533_v32 }
0x2ac1   :  { %v6592_v10 = vpop.eup %6591 }
0x2ac2   :  { %6215 = vmatmul.mubr.msk.bf16.vlgmr.msra.gmra.mxu1 %vm2662_vm8, %v4541_v40  ;;  %v4535_v51 = vmul.f32 %v6592_v10, %v8123_v15 }
0x2ac3   :  { %6225 = vmatpush3.bf16.msra.mxu1 %v4839_v54  ;;  %6226 = vmatprep.mubr.msk.bf16.mxu1 %vm6904_vm0, %v6903_v0 }
0x2ac4   :  { %6236 = vmatprep.subr.bf16.mxu1 %v6903_v0  ;;  %v4543_v52 = vpack.c.bf16 %v4535_v51, %v4535_v51 }
0x2aca   :  { %6227 = vmatmul.mubr.msk.bf16.vlgmr.msra.gmra.mxu1 %vm2662_vm8, %v4543_v52 }
0x2acb   :  { %6240 = vmatprep.mubr.msk.bf16.mxu1 %vm6904_vm0, %v6903_v0  ;;  %6237 = vmatpush3.bf16.msra.mxu1 %v6369_v46 }
0x2acc   :  { %6238 = vmatprep.subr.bf16.mxu1 %v6903_v0 }
0x2acf   :  { %6239 = vmatpush3.bf16.msra.mxu1 %v6370_v45  ;;  %v6373_v45 = vld [vmem:[%s8287_s16 + $0x38] sm:$0xff]  }
0x2ad0   :  { %6252 = vmatprep.subr.bf16.mxu1 %v6903_v0 }
0x2af5   :  { %v4587_v44 = vpop.f32.mrf.mxu1 }
0x2af6   :  { %v4635_v13 = vpop.f32.mrf.mxu0 }
0x2af7   :  { %v6192_v61 = vpop.f32.mrf.mxu1 }
0x2af8   :  { %v6198_v3 = vpop.f32.mrf.mxu0 }
0x2af9   :  { %v4590_v1 = vpop.f32.mrf.mxu1 }
0x2afa   :  { %v4638_v30 = vpop.f32.mrf.mxu0 }
0x2afb   :  { %v6193_v63 = vpop.f32.mrf.mxu1 }
0x2afc   :  { %v6199_v48 = vpop.f32.mrf.mxu0 }
0x2b4d   :  { %v4683_v49 = vpop.f32.mrf.mxu1 }
0x2b4e   :  { %v4731_v53 = vpop.f32.mrf.mxu0 }
0x2b4f   :  { %v6336_v59 = vpack.i.bf16 %v4731_v53, %v4683_v49  ;;  %v6204_v60 = vpop.f32.mrf.mxu1 }
0x2b50   :  { %v6210_v14 = vpop.f32.mrf.mxu0 }
0x2b51   :  { %6337 = vrot.lane.b32.xlu1 %v6336_v59, %s6913_s29  ;;  %v4686_v21 = vpop.f32.mrf.mxu1 }
0x2b52   :  { %v4734_v43 = vpop.f32.mrf.mxu0 }
0x2b53   :  { %v6205_v23 = vpop.f32.mrf.mxu1 }
0x2b54   :  { %v6211_v35 = vpop.f32.mrf.mxu0 }
0x2b56   :  { %v4827_v56 = vpop.f32.mrf.mxu0 }
0x2b58   :  { %v6222_v34 = vpop.f32.mrf.mxu0 }
0x2b59   :  { %v5607_v34 = vld [vmem:[#allocation13 + $0x1] ss:$0 sm:$0xff] }
0x2b5a   :  { %v4830_v15 = vpop.f32.mrf.mxu0 }
0x2b5b   :  { %v6371_v15 = vld [vmem:[%s8285_s14 + $0x18] sm:$0xff]  }
0x2b5c   :  { %v6223_v33 = vpop.f32.mrf.mxu0  ;;  %6245 = vmatpush3.bf16.msra.mxu0 %v6371_v15 }
0x2b5d   :  { %v6372_v33 = vld [vmem:[%s8285_s14 + $0x10] sm:$0xff]   ;;  %6246 = vmatprep.subr.bf16.mxu0 %v6903_v0 }
0x2b60   :  { %6247 = vmatpush3.bf16.msra.mxu0 %v6372_v33 }
0x2b7c   :  { %v4923_v16 = vpop.f32.mrf.mxu0 }
0x2b7e   :  { %v6234_v55 = vpop.f32.mrf.mxu0 }
0x2b80   :  { %v4926_v6 = vpop.f32.mrf.mxu0 }
0x2b82   :  { %v4779_v4 = vpop.f32.mrf.mxu1  ;;  %v6235_v57 = vpop.f32.mrf.mxu0 }
0x2b83   :  { %v6341_v19 = vpack.i.bf16 %v4827_v56, %v4779_v4  ;;  %v5608_v56 = vld [vmem:[#allocation15 + $0x1] ss:$0 sm:$0xff] }
0x2b84   :  { %v6216_v17 = vpop.f32.mrf.mxu1 }
0x2b85   :  { %6342 = vrot.lane.b32.xlu0 %v6341_v19, %s6890_s3 }
0x2b86   :  { %v4782_v5 = vpop.f32.mrf.mxu1 }
0x2b88   :  { %v6217_v9 = vpop.f32.mrf.mxu1 }
0x2b8a   :  { %v4875_v22 = vpop.f32.mrf.mxu1 }
0x2b8b   :  { %v6346_v11 = vpack.i.bf16 %v4923_v16, %v4875_v22 }
0x2b8c   :  { %v6228_v38 = vpop.f32.mrf.mxu1 }
0x2b8d   :  { %6347 = vrot.lane.b32.xlu1 %v6346_v11, %s6914_s20 }
0x2b8e   :  { %v4878_v2 = vpop.f32.mrf.mxu1 }
0x2b90   :  { %v6229_v12 = vpop.f32.mrf.mxu1 }
0x2bc3   :  { %v6338_v36 = vpop.permute.xlu1 %6337 }
0x2bc4   :  { %v6340_v8 = vunpack.i.h.bf16 %v6338_v36  ;;  %v6339_v58 = vunpack.i.l.bf16 %v6338_v36 }
0x2bc6   :  { %v4954_v29 = vsel %vm2662_vm8, %v4635_v13, %v6340_v8  ;;  %v4953_v62 = vsel %vm2662_vm8, %v4587_v44, %v6339_v58  ;;  %v6374_v58 = vld [vmem:[%s8287_s16 + $0x30] sm:$0xff]  }
0x2bf7   :  { %v6343_v31 = vpop.permute.xlu0 %6342 }
0x2bf8   :  { %v6345_v50 = vunpack.i.h.bf16 %v6343_v31  ;;  %v6344_v24 = vunpack.i.l.bf16 %v6343_v31 }
0x2bfa   :  { %v4956_v25 = vsel %vm3567_vm10, %v4954_v29, %v6345_v50  ;;  %v4955_v42 = vsel %vm3567_vm10, %v4953_v62, %v6344_v24  ;;  %v6375_v50 = vld [vmem:[%s8287_s16 + $0x28] sm:$0xff]   ;;  %v6376_v24 = vld [vmem:[%s8287_s16 + $0x20] sm:$0xff]  }
0x2bff   :  { %v6348_v47 = vpop.permute.xlu1 %6347 }
0x2c00   :  { %v6350_v20 = vunpack.i.h.bf16 %v6348_v47  ;;  %v6349_v26 = vunpack.i.l.bf16 %v6348_v47  ;;  %v5613_v47 = vld [vmem:[#allocation10 + $0x1] ss:$0 sm:$0xff] }
0x2c02   :  { %v4958_v7 = vsel %vm3570_vm11, %v4956_v25, %v6350_v20  ;;  %v4957_v18 = vsel %vm3570_vm11, %v4955_v42, %v6349_v26 }
0x2c03   :  { %v4959_v27 = vpack.c.bf16 %v4958_v7, %v4957_v18 }
0x2c05   :  { %6241 = vmatmul.mubr.msk.bf16.vlgmr.msra.gmra.mxu1 %vm364_vm4, %v4959_v27 }
0x2c06   :  { %6260 = vmatprep.mubr.msk.bf16.mxu1 %vm6904_vm0, %v6903_v0  ;;  %6253 = vmatpush3.bf16.msra.mxu1 %v6373_v45  ;;  %vm5452_vm0 = vcmask 785408  }
0x2c07   :  { %6254 = vmatprep.subr.bf16.mxu1 %v6903_v0 }
0x2c0a   :  { %6255 = vmatpush3.bf16.msra.mxu1 %v6374_v58 }
0x2c0b   :  { %6256 = vmatprep.subr.bf16.mxu1 %v6903_v0 }
0x2c0e   :  { %6257 = vmatpush3.bf16.msra.mxu1 %v6375_v50 }
0x2c0f   :  { %6258 = vmatprep.subr.bf16.mxu1 %v6903_v0 }
0x2c12   :  { %6259 = vmatpush3.bf16.msra.mxu1 %v6376_v24 }
0x2cc5   :  { %v5022_v32 = vpop.f32.mrf.mxu1 }
0x2cc6   :  { %v5023_v39 = vadd.f32 %v5603_v28, %v5022_v32 }
0x2cc7   :  { %v6242_v40 = vpop.f32.mrf.mxu1 }
0x2cc8   :  { %5031 = vrot.lane.b32.xlu0 %v5023_v39, %s6908_s5 }
0x2cc9   :  { %v5025_v10 = vpop.f32.mrf.mxu1 }
0x2cca   :  { %v5026_v54 = vadd.f32 %v5603_v28, %v5025_v10  ;;  %v5625_v28 = vld [vmem:[#allocation12 + $0x1] ss:$0 sm:$0xff] }
0x2ccb   :  { %v6243_v51 = vpop.f32.mrf.mxu1 }
0x2ccc   :  { %5033 = vrot.lane.b32.xlu1 %v5026_v54, %s6908_s5 }
0x2d3a   :  { %v5032_v52 = vpop.permute.xlu0 %5031 }
0x2d3b   :  { %v5037_v44 = vadd.f32 %v5032_v52, %v7990_v41 }
0x2d3d   :  { %5045 = vrot.lane.b32.xlu0 %v5037_v44, %s6907_s22 }
0x2d3e   :  { %v5034_v13 = vpop.permute.xlu1 %5033 }
0x2d3f   :  { %v5038_v61 = vadd.f32 %v5034_v13, %v7992_v37 }
0x2d41   :  { %5047 = vrot.lane.b32.xlu1 %v5038_v61, %s6907_s22 }
0x2daf   :  { %v5046_v3 = vpop.permute.xlu0 %5045 }
0x2db0   :  { %v5051_v1 = vsel %vm364_vm4, %v5046_v3, 0.0 }
0x2db1   :  { %5052 = vadd.xlane.f32.xlu0 %v5051_v1 }
0x2db3   :  { %v5048_v30 = vpop.permute.xlu1 %5047 }
0x2db4   :  { %v5054_v63 = vsel %vm364_vm4, %v5048_v30, 0.0 }
0x2db5   :  { %5055 = vadd.xlane.f32.xlu1 %v5054_v63 }
0x2e3a   :  { %v5053_v48 = vpop.xlane.xlu0 %5052 }
0x2e3b   :  { %v5057_v49 = vmul.f32 0.03125, %v5053_v48 }
0x2e3d   :  { %v5059_v53 = vsub.f32 %v5037_v44, %v5057_v49 }
0x2e3e   :  { %v5056_v59 = vpop.xlane.xlu1 %5055 }
0x2e3f   :  { %v5061_v41 = vmul.f32 %v5059_v53, %v5059_v53  ;;  %v5058_v60 = vmul.f32 0.03125, %v5056_v59 }
0x2e41   :  { %v5060_v14 = vsub.f32 %v5038_v61, %v5058_v60  ;;  %5065 = vrot.lane.b32.xlu0 %v5061_v41, %s6907_s22 }
0x2e43   :  { %v5062_v37 = vmul.f32 %v5060_v14, %v5060_v14 }
0x2e45   :  { %5067 = vrot.lane.b32.xlu1 %v5062_v37, %s6907_s22 }
0x2eb3   :  { %v5066_v21 = vpop.permute.xlu0 %5065 }
0x2eb4   :  { %v5071_v43 = vsel %vm364_vm4, %v5066_v21, 0.0 }
0x2eb5   :  { %5072 = vadd.xlane.f32.xlu0 %v5071_v43 }
0x2eb7   :  { %v5068_v23 = vpop.permute.xlu1 %5067 }
0x2eb8   :  { %v5074_v35 = vsel %vm364_vm4, %v5068_v23, 0.0 }
0x2eb9   :  { %5075 = vadd.xlane.f32.xlu1 %v5074_v35  ;;  %v5632_v35 = vld [vmem:[#allocation18 + $0x1] ss:$0 sm:$0xff] }
0x2eca   :  { %5100 = vrot.lane.b32.xlu1 %v5608_v56, %s6908_s5  ;;  %v5631_v56 = vld [vmem:[#allocation16 + $0x1] ss:$0 sm:$0xff] }
0x2ecb   :  { %5090 = vrot.lane.b32.xlu0 %v5607_v34, %s6908_s5 }
0x2f3e   :  { %v5073_v46 = vpop.xlane.xlu0 %5072 }
0x2f3f   :  { %v5077_v16 = vmul.f32 0.03125, %v5073_v46 }
0x2f41   :  { %v5079_v55 = vadd.f32 1e-05, %v5077_v16 }
0x2f42   :  { %v5076_v6 = vpop.xlane.xlu1 %5075  ;;  %v5091_v5 = vpop.permute.xlu0 %5090 }
0x2f43   :  { %6593 = vrsqrt.f32 %v5079_v55  ;;  %v5078_v4 = vmul.f32 0.03125, %v5076_v6 }
0x2f45   :  { %v5080_v57 = vadd.f32 1e-05, %v5078_v4 }
0x2f46   :  { %v5101_v38 = vpop.permute.xlu1 %5100 }
0x2f47   :  { %6595 = vrsqrt.f32 %v5080_v57 }
0x2f50   :  { %v6594_v19 = vpop.eup %6593 }
0x2f51   :  { %v5083_v17 = vmul.f32 %v6594_v19, %v5059_v53 }
0x2f53   :  { %v5093_v11 = vmul.f32 %v5091_v5, %v5083_v17 }
0x2f54   :  { %v6596_v9 = vpop.eup %6595 }
0x2f55   :  { %v5084_v22 = vmul.f32 %v6596_v9, %v5060_v14  ;;  %v5103_v12 = vadd.f32 %v5101_v38, %v5093_v11 }
0x2f57   :  { %v5094_v2 = vmul.f32 %v5091_v5, %v5084_v22 }
0x2f59   :  { %v5104_v36 = vadd.f32 %v5101_v38, %v5094_v2 }
0x2f5b   :  { %v5105_v31 = vpack.c.bf16 %v5104_v36, %v5103_v12 }
0x2f5d   :  { %5120 = vrot.lane.b32.xlu0 %v5105_v31, %s6907_s22 }
0x2fcf   :  { %v5121_v8 = vpop.permute.xlu0 %5120 }
0x2fd0   :  { %6249 = vmatmul.mubr.msk.bf16.vlgmr.msra.gmra.mxu0 %vm364_vm4, %v5121_v8 }
0x3090   :  { %v5171_v29 = vpop.f32.mrf.mxu0 }
0x3091   :  { %v5172_v20 = vadd.f32 %v5613_v47, %v5171_v29 }
0x3092   :  { %v6250_v62 = vpop.f32.mrf.mxu0 }
0x3093   :  { %v5178_v7 = vmax.f32 %v5172_v20, 0.0 }
0x3094   :  { %v5174_v26 = vpop.f32.mrf.mxu0 }
0x3095   :  { %v5175_v25 = vadd.f32 %v5613_v47, %v5174_v26 }
0x3096   :  { %v6251_v42 = vpop.f32.mrf.mxu0 }
0x3097   :  { %v5179_v18 = vmax.f32 %v5175_v25, 0.0 }
0x3099   :  { %v5180_v27 = vpack.c.bf16 %v5179_v18, %v5178_v7  ;;  %v5634_v7 = vld [vmem:[#allocation21] ss:$0 sm:$0xff]  ;;  %v5633_v18 = vld [vmem:[#allocation19] ss:$0 sm:$0xff] }
0x309b   :  { %6261 = vmatmul.mubr.msk.bf16.vlgmr.msra.gmra.mxu1 %vm3829_vm12, %v5180_v27 }
0x315b   :  { %v5259_v32 = vpop.f32.mrf.mxu1 }
0x315c   :  { %v5260_v0 = vadd.f32 %v5625_v28, %v5259_v32 }
0x315d   :  { %v6262_v39 = vpop.f32.mrf.mxu1 }
0x315e   :  { %5268 = vrot.lane.b32.xlu1 %v5260_v0, %s6908_s5 }
0x315f   :  { %v5262_v40 = vpop.f32.mrf.mxu1 }
0x3160   :  { %v5263_v10 = vadd.f32 %v5625_v28, %v5262_v40 }
0x3161   :  { %v6263_v54 = vpop.f32.mrf.mxu1 }
0x3162   :  { %5270 = vrot.lane.b32.xlu0 %v5263_v10, %s6908_s5 }
0x31d0   :  { %v5269_v51 = vpop.permute.xlu1 %5268 }
0x31d1   :  { %v5274_v52 = vadd.f32 %v5269_v51, %v5103_v12 }
0x31d3   :  { %5282 = vrot.lane.b32.xlu1 %v5274_v52, %s6907_s22 }
0x31d4   :  { %v5271_v44 = vpop.permute.xlu0 %5270 }
0x31d5   :  { %v5275_v13 = vadd.f32 %v5271_v44, %v5104_v36 }
0x31d7   :  { %5284 = vrot.lane.b32.xlu0 %v5275_v13, %s6907_s22 }
0x3245   :  { %v5283_v61 = vpop.permute.xlu1 %5282 }
0x3246   :  { %v5288_v3 = vsel %vm364_vm4, %v5283_v61, 0.0 }
0x3247   :  { %5289 = vadd.xlane.f32.xlu1 %v5288_v3 }
0x3249   :  { %v5285_v1 = vpop.permute.xlu0 %5284 }
0x324a   :  { %v5291_v30 = vsel %vm364_vm4, %v5285_v1, 0.0 }
0x324b   :  { %5292 = vadd.xlane.f32.xlu0 %v5291_v30 }
0x32d0   :  { %v5290_v63 = vpop.xlane.xlu1 %5289 }
0x32d1   :  { %v5294_v48 = vmul.f32 0.03125, %v5290_v63 }
0x32d3   :  { %v5296_v49 = vsub.f32 %v5274_v52, %v5294_v48 }
0x32d4   :  { %v5293_v53 = vpop.xlane.xlu0 %5292 }
0x32d5   :  { %v5298_v59 = vmul.f32 %v5296_v49, %v5296_v49  ;;  %v5295_v41 = vmul.f32 0.03125, %v5293_v53 }
0x32d7   :  { %v5297_v60 = vsub.f32 %v5275_v13, %v5295_v41  ;;  %5302 = vrot.lane.b32.xlu0 %v5298_v59, %s6907_s22 }
0x32d9   :  { %v5299_v14 = vmul.f32 %v5297_v60, %v5297_v60 }
0x32db   :  { %5304 = vrot.lane.b32.xlu1 %v5299_v14, %s6907_s22 }
0x3349   :  { %v5303_v37 = vpop.permute.xlu0 %5302 }
0x334a   :  { %v5308_v21 = vsel %vm364_vm4, %v5303_v37, 0.0 }
0x334b   :  { %5309 = vadd.xlane.f32.xlu1 %v5308_v21 }
0x334d   :  { %v5305_v43 = vpop.permute.xlu1 %5304 }
0x334e   :  { %v5311_v23 = vsel %vm364_vm4, %v5305_v43, 0.0 }
0x334f   :  { %5312 = vadd.xlane.f32.xlu0 %v5311_v23 }
0x335c   :  { %5337 = vrot.lane.b32.xlu1 %v5632_v35, %s6908_s5 }
0x3365   :  { %5327 = vrot.lane.b32.xlu0 %v5631_v56, %s6908_s5 }
0x33d4   :  { %v5310_v34 = vpop.xlane.xlu1 %5309 }
0x33d5   :  { %v5314_v15 = vmul.f32 0.03125, %v5310_v34 }
0x33d7   :  { %v5316_v33 = vadd.f32 1e-05, %v5314_v15 }
0x33d8   :  { %v5313_v46 = vpop.xlane.xlu0 %5312  ;;  %v5338_v19 = vpop.permute.xlu1 %5337 }
0x33d9   :  { %6597 = vrsqrt.f32 %v5316_v33  ;;  %v5315_v16 = vmul.f32 0.03125, %v5313_v46 }
0x33db   :  { %v5317_v55 = vadd.f32 1e-05, %v5315_v16 }
0x33dc   :  { %v5328_v4 = vpop.permute.xlu0 %5327 }
0x33dd   :  { %6599 = vrsqrt.f32 %v5317_v55 }
0x33e6   :  { %v6598_v6 = vpop.eup %6597 }
0x33e7   :  { %v5320_v57 = vmul.f32 %v6598_v6, %v5296_v49 }
0x33e9   :  { %v5330_v45 = vmul.f32 %v5328_v4, %v5320_v57 }
0x33ea   :  { %v6600_v17 = vpop.eup %6599 }
0x33eb   :  { %v5321_v5 = vmul.f32 %v6600_v17, %v5297_v60  ;;  %v5340_v9 = vadd.f32 %v5338_v19, %v5330_v45 }
0x33ed   :  { %v5331_v22 = vmul.f32 %v5328_v4, %v5321_v5  ;;  %5346 = vrot.lane.b32.xlu1 %v5340_v9, %s6907_s22 }
0x33ef   :  { %v5341_v11 = vadd.f32 %v5338_v19, %v5331_v22 }
0x33f1   :  { %5348 = vrot.lane.b32.xlu0 %v5341_v11, %s6907_s22 }
0x345f   :  { %v5347_v38 = vpop.permute.xlu1 %5346 }
0x3460   :  { %v5352_v2 = vsel %vm364_vm4, %v5347_v38, 0.0 }
0x3461   :  { %5353 = vadd.xlane.f32.xlu1 %v5352_v2 }
0x3463   :  { %v5349_v12 = vpop.permute.xlu0 %5348 }
0x3464   :  { %v5355_v36 = vsel %vm364_vm4, %v5349_v12, 0.0 }
0x3465   :  { %5356 = vadd.xlane.f32.xlu0 %v5355_v36 }
0x34ea   :  { %v5354_v31 = vpop.xlane.xlu1 %5353 }
0x34eb   :  { %v5358_v8 = vmul.f32 0.03125, %v5354_v31 }
0x34ed   :  { %v5360_v58 = vsub.f32 %v5340_v9, %v5358_v8 }
0x34ee   :  { %v5357_v50 = vpop.xlane.xlu0 %5356 }
0x34ef   :  { %v5362_v24 = vmul.f32 %v5360_v58, %v5360_v58  ;;  %v5359_v47 = vmul.f32 0.03125, %v5357_v50 }
0x34f1   :  { %v5361_v29 = vsub.f32 %v5341_v11, %v5359_v47  ;;  %5366 = vrot.lane.b32.xlu0 %v5362_v24, %s6907_s22 }
0x34f3   :  { %v5363_v62 = vmul.f32 %v5361_v29, %v5361_v29 }
0x34f5   :  { %5368 = vrot.lane.b32.xlu1 %v5363_v62, %s6907_s22 }
0x3563   :  { %v5367_v20 = vpop.permute.xlu0 %5366 }
0x3564   :  { %v5372_v26 = vsel %vm364_vm4, %v5367_v20, 0.0 }
0x3565   :  { %5373 = vadd.xlane.f32.xlu1 %v5372_v26 }
0x3567   :  { %v5369_v25 = vpop.permute.xlu1 %5368 }
0x3568   :  { %v5375_v42 = vsel %vm364_vm4, %v5369_v25, 0.0 }
0x3569   :  { %5376 = vadd.xlane.f32.xlu0 %v5375_v42 }
0x3576   :  { %5401 = vrot.lane.b32.xlu1 %v5634_v7, %s6908_s5 }
0x357f   :  { %5391 = vrot.lane.b32.xlu0 %v5633_v18, %s6908_s5 }
0x35ee   :  { %v5374_v27 = vpop.xlane.xlu1 %5373 }
0x35ef   :  { %v5378_v28 = vmul.f32 0.03125, %v5374_v27 }
0x35f1   :  { %v5380_v32 = vadd.f32 1e-05, %v5378_v28 }
0x35f2   :  { %v5377_v0 = vpop.xlane.xlu0 %5376  ;;  %v5402_v44 = vpop.permute.xlu1 %5401 }
0x35f3   :  { %6601 = vrsqrt.f32 %v5380_v32  ;;  %v5379_v39 = vmul.f32 0.03125, %v5377_v0 }
0x35f5   :  { %v5381_v40 = vadd.f32 1e-05, %v5379_v39 }
0x35f6   :  { %v5392_v54 = vpop.permute.xlu0 %5391 }
0x35f7   :  { %6603 = vrsqrt.f32 %v5381_v40 }
0x3600   :  { %v6602_v10 = vpop.eup %6601 }
0x3601   :  { %v5384_v51 = vmul.f32 %v6602_v10, %v5360_v58 }
0x3603   :  { %v5394_v52 = vmul.f32 %v5392_v54, %v5384_v51 }
0x3604   :  { %v6604_v13 = vpop.eup %6603 }
0x3605   :  { %v5385_v61 = vmul.f32 %v6604_v13, %v5361_v29  ;;  %v5404_v3 = vadd.f32 %v5402_v44, %v5394_v52 }
0x3607   :  { %v5395_v1 = vmul.f32 %v5392_v54, %v5385_v61  ;;  %v5413_v63 = vrot.slane %v5404_v3, 1  ;;  %v5428_v48 = vrot.slane %v5404_v3, 4  ;;  %v5434_v59 = vrot.slane %v5404_v3, 5 }
0x3608   :  { %v5438_v35 = vrot.slane %v5404_v3, 6  ;;  %v5416_v56 = vrot.slane %v5404_v3, 2  ;;  %v5444_v16 = vrot.slane %v5404_v3, 7  ;;  %v5422_v55 = vrot.slane %v5404_v3, 3 }
0x3609   :  { %v5405_v30 = vadd.f32 %v5402_v44, %v5395_v1 }
0x360b   :  { %v5429_v49 = vrot.slane %v5405_v30, 3  ;;  %v5408_v53 = vrot.slane %v5405_v30, 7  ;;  %v5435_v41 = vrot.slane %v5405_v30, 4  ;;  %v5414_v60 = vsel %vm475_vm3, %v5405_v30, %v5413_v63 }
0x360c   :  { %v5439_v21 = vrot.slane %v5405_v30, 5  ;;  %v5417_v43 = vrot.slane %v5405_v30, 1  ;;  %v5445_v33 = vrot.slane %v5405_v30, 6  ;;  %v5423_v46 = vrot.slane %v5405_v30, 2 }
0x360d   :  { %v5430_v14 = vsel %vm475_vm3, %v5429_v49, %v5428_v48  ;;  %v5409_v37 = vsel %vm475_vm3, %v5408_v53, %v5404_v3  ;;  %v5436_v23 = vsel %vm475_vm3, %v5435_v41, %v5434_v59 }
0x360e   :  { %5431 = vrot.lane.b32.xlu0 %v5430_v14, %s6907_s22  ;;  %5410 = vrot.lane.b32.xlu1 %v5409_v37, %s6907_s22  ;;  %v5440_v34 = vsel %vm475_vm3, %v5439_v21, %v5438_v35  ;;  %v5418_v15 = vsel %vm475_vm3, %v5417_v43, %v5416_v56  ;;  %v5446_v6 = vsel %vm475_vm3, %v5445_v33, %v5444_v16 }
0x360f   :  { %v5424_v4 = vsel %vm475_vm3, %v5423_v46, %v5422_v55 }
0x3612   :  { %5441 = vrot.lane.b32.xlu0 %v5440_v34, %s6908_s5  ;;  %5419 = vrot.lane.b32.xlu1 %v5418_v15, %s6908_s5 }
0x3616   :  { %5447 = vrot.lane.b32.xlu0 %v5446_v6, %s6906_s13  ;;  %5425 = vrot.lane.b32.xlu1 %v5424_v4, %s6906_s13 }
0x3680   :  { %v5432_v57 = vpop.permute.xlu0 %5431  ;;  %v5411_v19 = vpop.permute.xlu1 %5410 }
0x3681   :  { %v5454_v5 = vsel %vm364_vm4, %v5432_v57, %v5436_v23  ;;  %v5450_v9 = vsel %vm364_vm4, %v5411_v19, %v5414_v60 }
0x3684   :  { %v5442_v45 = vpop.permute.xlu0 %5441  ;;  %v5420_v17 = vpop.permute.xlu1 %5419 }
0x3685   :  { %v5455_v22 = vsel %vm3829_vm12, %v5454_v5, %v5442_v45  ;;  %v5451_v11 = vsel %vm3829_vm12, %v5450_v9, %v5420_v17 }
0x3688   :  { %v5448_v38 = vpop.permute.xlu0 %5447  ;;  %v5426_v2 = vpop.permute.xlu1 %5425 }
0x3689   :  { %v5456_v12 = vsel %vm5452_vm0, %v5455_v22, %v5448_v38  ;;  %v5453_v36 = vsel %vm5452_vm0, %v5451_v11, %v5426_v2 }
0x368a   :  { %v5459_v31 = vcombine.low %v5453_v36, %v5456_v12 }
0x368c   :  { %5635 = vst.sshfl [vmem:[%s8295_s24] sm:$0x33 pattern:$0x76325410] %v5459_v31 }
0x368d   :  { %5473 = vsyncpa [#allocation3], 1 }
0x368e   :  { %5474 = vsyncpa [#allocation5], 1 }
0x368f   :  { %5475 = vsyncpa [#allocation8], 1 }
0x3690   :  { %5476 = vsyncpa [#allocation11], 1 }
0x3691   :  { %5477 = vsyncpa [#allocation14], 1 }
0x3692   :  { %5478 = vsyncpa [#allocation17], 1 }
0x3693   :  { %5479 = vsyncpa [#allocation20], 1 }

</bundles_post_ra>
